<compile_context>
chip_gen: v7x
topology: tpu7x:2x2x1
jax: 0.10.0
libtpu: 0.0.40
codegen_flags: <defaults>
</compile_context>

<pallas_src>
import jax
import jax.numpy as jnp
from jax import lax
from jax.experimental import pallas as pl
from jax.experimental.pallas import tpu as pltpu


def _rup(v, m):
    return ((v + m - 1) // m) * m


def _make_kernel(K, PAD, STRIDE, H, W, HO, WO, oup, hidP, use_res, RB,
                 hp_dtype):
    Hp, Wp = H + 2 * PAD, W + 2 * PAD
    nfull = HO // RB
    tail = HO - nfull * RB

    def kernel(x_ref, w1_ref, b1_ref, w2_ref, b2_ref, w3_ref, b3_ref,
               o_ref, hp_ref):
        Cin = x_ref.shape[-1]

        # ---- zero the scratch borders --------------------------------------
        # Re-zeroed every grid step (NOT gated on program_id(0) == 0): with a
        # "parallel" grid axis the steps may be sharded across TensorCores and
        # only one core would ever see program_id == 0, leaving the other
        # core's scratch borders uninitialized.  The strips are tiny.
        if PAD > 0:
            hp_ref[0:PAD, :, :] = jnp.zeros((PAD, Wp, hidP), hp_dtype)
            hp_ref[PAD + H:Hp, :, :] = jnp.zeros((PAD, Wp, hidP), hp_dtype)
            hp_ref[:, 0:PAD, :] = jnp.zeros((Hp, PAD, hidP), hp_dtype)
            hp_ref[:, PAD + W:Wp, :] = jnp.zeros((Hp, PAD, hidP), hp_dtype)

        # ---- 1x1 expand conv (BN scale folded into w1) + bias + ReLU6 ------
        # x arrives with its true channel count; the MXU contraction tiles are
        # zero-filled inside VMEM by the compiler, so no HBM channel padding.
        xm = x_ref[0].reshape(H * W, Cin).astype(jnp.bfloat16)
        h = jnp.dot(xm, w1_ref[...], preferred_element_type=jnp.float32)
        h = jnp.clip(h + b1_ref[...], 0.0, 6.0)
        hp_ref[PAD:PAD + H, PAD:PAD + W, :] = (
            h.reshape(H, W, hidP).astype(hp_dtype))

        # ---- fused depthwise conv + project 1x1, per output-row block ------
        w2 = w2_ref[...]                                   # (K, K, hidP) f32
        taps = [w2[kh, kw] for kh in range(K) for kw in range(K)]  # hoisted
        b2 = b2_ref[...]                                   # (1, hidP)
        w3 = w3_ref[...]                                   # (hidP, oup) bf16
        b3 = b3_ref[...]                                   # (1, oup)

        def process_rows(r0, nrows):
            # Depthwise: the block accumulator stays in vregs across the
            # statically unrolled K*K taps and is consumed in place below.
            acc = jnp.zeros((nrows, WO, hidP), jnp.float32)
            t = 0
            for kh in range(K):
                for kw in range(K):
                    if STRIDE == 1:
                        patch = hp_ref[pl.ds(r0 + kh, nrows),
                                       pl.ds(kw, WO), :]
                    else:
                        # TODO(synk): stride-2 taps are sublane-strided along
                        # W; deinterleave even/odd columns while staging h so
                        # the taps become unit-stride reads.
                        patch = hp_ref[pl.ds(r0 * STRIDE + kh, nrows, STRIDE),
                                       pl.ds(kw, WO, STRIDE), :]
                    acc = acc + patch.astype(jnp.float32) * taps[t]
                    t += 1
            d = jnp.clip(acc + b2, 0.0, 6.0)

            # Project 1x1 (BN folded into w3) + bias (+ residual), one store.
            dm = d.reshape(nrows * WO, hidP).astype(jnp.bfloat16)
            ob = jnp.dot(dm, w3, preferred_element_type=jnp.float32) + b3
            ob = ob.reshape(nrows, WO, oup)
            if use_res:
                ob = ob + x_ref[0, pl.ds(r0, nrows), :, :]
            o_ref[0, pl.ds(r0, nrows), :, :] = ob.astype(o_ref.dtype)

        def body(rb, carry):
            process_rows(pl.multiple_of(rb * RB, RB), RB)
            return carry

        lax.fori_loop(0, nfull, body, 0, unroll=(nfull <= 4))
        if tail > 0:
            process_rows(nfull * RB, tail)

    return kernel


def inverted_residual_pallas(x_nhwc, params, *, kernel_size, stride,
                             dw_scratch_dtype=jnp.bfloat16):
    N, H, W, Cin = x_nhwc.shape
    hid = params["w1"].shape[1]
    oup = params["w3"].shape[1]
    K = kernel_size
    pad = K // 2
    HO = (H + 2 * pad - K) // stride + 1
    WO = (W + 2 * pad - K) // stride + 1
    use_res = (stride == 1) and (Cin == oup) and (HO == H) and (WO == W)

    # Hidden (expanded) activation never leaves VMEM -> keep it 128-lane
    # padded.  Input / output activations stay at their true channel counts.
    hidP = _rup(hid, 128)
    Hp, Wp = H + 2 * pad, W + 2 * pad

    # Fold BN scales into the conv weights (eval-mode BN); bf16 for the MXU.
    w1 = params["w1"] * params["s1"]                    # (Cin, hid)
    w2 = params["w2"] * params["s2"]                    # (K, K, hid)
    w3 = params["w3"] * params["s3"]                    # (hid, oup)
    w1p = jnp.pad(w1, ((0, 0), (0, hidP - hid))).astype(jnp.bfloat16)
    w3p = jnp.pad(w3, ((0, hidP - hid), (0, 0))).astype(jnp.bfloat16)
    w2p = jnp.pad(w2, ((0, 0), (0, 0), (0, hidP - hid)))
    b1p = jnp.pad(params["b1"], ((0, 0), (0, hidP - hid)))
    b2p = jnp.pad(params["b2"], ((0, 0), (0, hidP - hid)))
    b3p = params["b3"]                                  # (1, oup)

    # No residual => x is only ever consumed in bf16 (expand matmul); ship it
    # as bf16 and halve the input DMA.  Keep f32 when the residual needs it.
    x_in = x_nhwc if use_res else x_nhwc.astype(jnp.bfloat16)

    # Output-row block size for the fused depthwise+project loop: keep the
    # per-block f32 accumulator (RB, WO, hidP) roughly within the vreg file.
    RB = int(max(1, min(8, HO, (96 * 1024) // max(1, WO * hidP * 4))))

    kernel = _make_kernel(K, pad, stride, H, W, HO, WO, oup, hidP,
                          use_res, RB, dw_scratch_dtype)

    full = lambda shape: pl.BlockSpec(shape, lambda n: (0,) * len(shape))
    grid_spec = pltpu.PrefetchScalarGridSpec(
        num_scalar_prefetch=0,
        grid=(N,),
        in_specs=[
            pl.BlockSpec((1, H, W, Cin), lambda n: (n, 0, 0, 0)),
            full((Cin, hidP)),
            full((1, hidP)),
            full((K, K, hidP)),
            full((1, hidP)),
            full((hidP, oup)),
            full((1, oup)),
        ],
        out_specs=pl.BlockSpec((1, HO, WO, oup), lambda n: (n, 0, 0, 0)),
        scratch_shapes=[pltpu.VMEM((Hp, Wp, hidP), dw_scratch_dtype)],
    )

    # Scoped-VMEM limit from the per-step live set (VMEM lane/sublane-padded
    # sizes, IO blocks double-buffered) + headroom, capped at 3/4 of the
    # queried per-generation VMEM capacity (leaves compiler scratch room).
    r8 = lambda v: _rup(v, 8)
    r128 = lambda v: _rup(v, 128)
    hp_itm = jnp.dtype(dw_scratch_dtype).itemsize
    x_itm = jnp.dtype(x_in.dtype).itemsize
    x_blk = H * r8(W) * r128(Cin) * x_itm
    o_blk = HO * r8(WO) * r128(oup) * 4
    w_blk = (r8(Cin) * hidP * 2 + r8(hidP) * r128(oup) * 2
             + K * r8(K) * hidP * 4 + 2 * 8 * hidP * 4 + 8 * r128(oup) * 4)
    hp_b = Hp * r8(Wp) * hidP * hp_itm
    tmp = (H * r8(W) * hidP * 4                    # h before staging
           + H * r8(W) * r128(Cin) * 2             # xm (bf16)
           + 4 * RB * r8(WO) * hidP * 4            # acc / d / block temps
           + RB * r8(WO) * r128(oup) * 4)          # projected block
    est = 2 * (x_blk + o_blk + w_blk) + hp_b + tmp
    try:
        cap = int(getattr(pltpu.get_tpu_info(), "vmem_capacity_bytes",
                          128 << 20)) * 3 // 4
    except Exception:
        cap = 96 << 20
    vmem_limit = int(min(max(int(est * 1.5) + (8 << 20), 16 << 20), cap))

    out = pl.pallas_call(
        kernel,
        out_shape=jax.ShapeDtypeStruct((N, HO, WO, oup), jnp.float32),
        grid_spec=grid_spec,
        compiler_params=pltpu.CompilerParams(
            dimension_semantics=("parallel",),
            vmem_limit_bytes=vmem_limit),
    )(x_in, w1p, b1p, w2p, b2p, w3p, b3p)
    return out


def _fold_bn(gamma, beta, mean, var, eps=1e-5):
    scale = gamma / jnp.sqrt(var + eps)
    bias = beta - mean * scale
    return scale[None, :], bias[None, :]


def make_params(key, inp, oup, kernel_size, expand_ratio):
    hid = int(round(inp * expand_ratio))
    keys = jax.random.split(key, 12)
    w1 = jax.random.normal(keys[0], (inp, hid), jnp.float32) * 0.1
    w2 = jax.random.normal(keys[1], (kernel_size, kernel_size, hid),
                           jnp.float32) * 0.1
    w3 = jax.random.normal(keys[2], (hid, oup), jnp.float32) * 0.1

    def bn(i, c):
        g = 1.0 + 0.1 * jax.random.normal(keys[3 + 3 * i], (c,), jnp.float32)
        b = 0.1 * jax.random.normal(keys[4 + 3 * i], (c,), jnp.float32)
        m = 0.1 * jax.random.normal(keys[5 + 3 * i], (c,), jnp.float32)
        v = jnp.abs(1.0 + 0.1 * jax.random.normal(
            jax.random.fold_in(keys[5 + 3 * i], 7), (c,), jnp.float32))
        return _fold_bn(g, b, m, v)

    s1, b1 = bn(0, hid)
    s2, b2 = bn(1, hid)
    s3, b3 = bn(2, oup)
    return dict(w1=w1, s1=s1, b1=b1, w2=w2, s2=s2, b2=b2,
                w3=w3, s3=s3, b3=b3)


def reference_forward(x_nhwc, params, *, kernel_size, stride,
                      dw_scratch_dtype=jnp.bfloat16):
    """Pure-JAX reference mirroring the kernel's folded-BN / bf16-MXU math."""
    N, H, W, Cin = x_nhwc.shape
    hid = params["w1"].shape[1]
    oup = params["w3"].shape[1]
    pad = kernel_size // 2
    use_res = (stride == 1) and (Cin == oup)

    w1f = (params["w1"] * params["s1"]).astype(jnp.bfloat16)
    w2f = params["w2"] * params["s2"]
    w3f = (params["w3"] * params["s3"]).astype(jnp.bfloat16)

    h = jnp.einsum("nhwc,cd->nhwd", x_nhwc.astype(jnp.bfloat16), w1f,
                   preferred_element_type=jnp.float32)
    h = jnp.clip(h + params["b1"], 0.0, 6.0)
    # Matches the VMEM staging dtype of the depthwise scratch in the kernel.
    h = h.astype(dw_scratch_dtype).astype(jnp.float32)

    dw = w2f.reshape(kernel_size, kernel_size, 1, hid)
    d = jax.lax.conv_general_dilated(
        h, dw, window_strides=(stride, stride),
        padding=[(pad, pad), (pad, pad)],
        dimension_numbers=("NHWC", "HWIO", "NHWC"),
        feature_group_count=hid)
    d = jnp.clip(d + params["b2"], 0.0, 6.0)

    o = jnp.einsum("nhwc,cd->nhwd", d.astype(jnp.bfloat16), w3f,
                   preferred_element_type=jnp.float32)
    o = o + params["b3"]
    if use_res:
        o = o + x_nhwc
    return o


if __name__ == "__main__":
    # Small config consistent with the module: inp=4, oup=4, k=3, stride=1,
    # expand_ratio=3 -> hidden_dim=12, residual connection active.
    N, Cin, Hs, Ws = 2, 4, 16, 16
    oup, kernel_size, stride, expand_ratio = 4, 3, 1, 3

    key = jax.random.PRNGKey(0)
    kx, kp = jax.random.split(key)
    x_nchw = jax.random.normal(kx, (N, Cin, Hs, Ws), jnp.float32)
    x_nhwc = jnp.transpose(x_nchw, (0, 2, 3, 1))      # NCHW -> NHWC

    params = make_params(kp, Cin, oup, kernel_size, expand_ratio)

    out = inverted_residual_pallas(x_nhwc, params,
                                   kernel_size=kernel_size, stride=stride)
    out = jax.block_until_ready(out)

    ref = reference_forward(x_nhwc, params,
                            kernel_size=kernel_size, stride=stride)
    assert out.shape == ref.shape, (out.shape, ref.shape)
    err = float(jnp.max(jnp.abs(out - ref)))
    assert jnp.allclose(out, ref, atol=1e-2, rtol=1e-2), err

    print("KERNEL_OK")
</pallas_src>

<mosaic_0001>
module attributes {stable_mosaic.version = 11 : i64} {
  func.func @kernel(%arg0: i32, %arg1: memref<1x16x16x4xf32, #tpu.memory_space<vmem>>, %arg2: memref<4x128xbf16, #tpu.memory_space<vmem>>, %arg3: memref<1x128xf32, #tpu.memory_space<vmem>>, %arg4: memref<3x3x128xf32, #tpu.memory_space<vmem>>, %arg5: memref<1x128xf32, #tpu.memory_space<vmem>>, %arg6: memref<128x4xbf16, #tpu.memory_space<vmem>>, %arg7: memref<1x4xf32, #tpu.memory_space<vmem>>, %arg8: memref<1x16x16x4xf32, #tpu.memory_space<vmem>>, %arg9: memref<18x18x128xbf16, #tpu.memory_space<vmem>>) attributes {dimension_semantics = [#tpu.dimension_semantics<parallel>], iteration_bounds = array<i64: 2>, scalar_prefetch = 0 : i64, scratch_operands = 1 : i64, tpu.core_type = #tpu.core_type<tc>, window_params = [{transform_indices = @transform_0, window_bounds = array<i64: 1, 16, 16, 4>}, {pipeline_mode = #tpu.pipeline_mode<synchronous>, transform_indices = @transform_1, window_bounds = array<i64: 4, 128>}, {pipeline_mode = #tpu.pipeline_mode<synchronous>, transform_indices = @transform_2, window_bounds = array<i64: 1, 128>}, {pipeline_mode = #tpu.pipeline_mode<synchronous>, transform_indices = @transform_3, window_bounds = array<i64: 3, 3, 128>}, {pipeline_mode = #tpu.pipeline_mode<synchronous>, transform_indices = @transform_4, window_bounds = array<i64: 1, 128>}, {pipeline_mode = #tpu.pipeline_mode<synchronous>, transform_indices = @transform_5, window_bounds = array<i64: 128, 4>}, {pipeline_mode = #tpu.pipeline_mode<synchronous>, transform_indices = @transform_6, window_bounds = array<i64: 1, 4>}, {transform_indices = @transform_7, window_bounds = array<i64: 1, 16, 16, 4>}]} {
    %cst = arith.constant 0.000000e+00 : bf16
    %0 = vector.broadcast %cst : bf16 to vector<1x18x128xbf16>
    %c0 = arith.constant 0 : index
    %c0_0 = arith.constant 0 : index
    %c0_1 = arith.constant 0 : index
    %1 = vector.load %arg9[%c0, %c0_0, %c0_1] : memref<18x18x128xbf16, #tpu.memory_space<vmem>>, vector<1x18x128xbf16>
    tpu.vector_store %arg9[%c0, %c0_0, %c0_1], %0 {strides = array<i32>} : memref<18x18x128xbf16, #tpu.memory_space<vmem>>, vector<1x18x128xbf16>,
    %cst_2 = arith.constant 0.000000e+00 : bf16
    %2 = vector.broadcast %cst_2 : bf16 to vector<1x18x128xbf16>
    %c17 = arith.constant 17 : index
    %c0_3 = arith.constant 0 : index
    %c0_4 = arith.constant 0 : index
    %3 = vector.load %arg9[%c17, %c0_3, %c0_4] : memref<18x18x128xbf16, #tpu.memory_space<vmem>>, vector<1x18x128xbf16>
    tpu.vector_store %arg9[%c17, %c0_3, %c0_4], %2 {strides = array<i32>} : memref<18x18x128xbf16, #tpu.memory_space<vmem>>, vector<1x18x128xbf16>,
    %cst_5 = arith.constant 0.000000e+00 : bf16
    %4 = vector.broadcast %cst_5 : bf16 to vector<18x1x128xbf16>
    %c0_6 = arith.constant 0 : index
    %c0_7 = arith.constant 0 : index
    %c0_8 = arith.constant 0 : index
    %5 = vector.load %arg9[%c0_6, %c0_7, %c0_8] : memref<18x18x128xbf16, #tpu.memory_space<vmem>>, vector<18x1x128xbf16>
    tpu.vector_store %arg9[%c0_6, %c0_7, %c0_8], %4 {strides = array<i32>} : memref<18x18x128xbf16, #tpu.memory_space<vmem>>, vector<18x1x128xbf16>,
    %cst_9 = arith.constant 0.000000e+00 : bf16
    %6 = vector.broadcast %cst_9 : bf16 to vector<18x1x128xbf16>
    %c0_10 = arith.constant 0 : index
    %c17_11 = arith.constant 17 : index
    %c0_12 = arith.constant 0 : index
    %7 = vector.load %arg9[%c0_10, %c17_11, %c0_12] : memref<18x18x128xbf16, #tpu.memory_space<vmem>>, vector<18x1x128xbf16>
    tpu.vector_store %arg9[%c0_10, %c17_11, %c0_12], %6 {strides = array<i32>} : memref<18x18x128xbf16, #tpu.memory_space<vmem>>, vector<18x1x128xbf16>,
    %c0_13 = arith.constant 0 : index
    %c0_14 = arith.constant 0 : index
    %c0_15 = arith.constant 0 : index
    %c0_16 = arith.constant 0 : index
    %8 = vector.load %arg1[%c0_13, %c0_14, %c0_15, %c0_16] : memref<1x16x16x4xf32, #tpu.memory_space<vmem>>, vector<1x16x16x4xf32>
    %9 = vector.shape_cast %8 : vector<1x16x16x4xf32> to vector<16x16x4xf32>
    %10 = vector.shape_cast %9 : vector<16x16x4xf32> to vector<256x4xf32>
    %11 = arith.truncf %10 : vector<256x4xf32> to vector<256x4xbf16>
    %c0_17 = arith.constant 0 : index
    %c0_18 = arith.constant 0 : index
    %12 = vector.load %arg2[%c0_17, %c0_18] : memref<4x128xbf16, #tpu.memory_space<vmem>>, vector<4x128xbf16>
    %cst_19 = arith.constant dense<0.000000e+00> : vector<256x128xf32>
    %13 = tpu.matmul %11, %12, %cst_19 {dimension_numbers = #tpu.dot_dimension_numbers<[1], [0], [0], [1], [0, 0, 1, 1], [], []>} : vector<256x4xbf16>, vector<4x128xbf16>, vector<256x128xf32> -> vector<256x128xf32>
    %c0_20 = arith.constant 0 : index
    %c0_21 = arith.constant 0 : index
    %14 = vector.load %arg3[%c0_20, %c0_21] : memref<1x128xf32, #tpu.memory_space<vmem>>, vector<1x128xf32>
    %15 = vector.broadcast %14 : vector<1x128xf32> to vector<256x128xf32>
    %16 = arith.addf %13, %15 : vector<256x128xf32>
    %cst_22 = arith.constant 0.000000e+00 : f32
    %cst_23 = arith.constant 6.000000e+00 : f32
    %17 = vector.broadcast %cst_22 : f32 to vector<256x128xf32>
    %18 = arith.maximumf %17, %16 : vector<256x128xf32>
    %19 = vector.broadcast %cst_23 : f32 to vector<256x128xf32>
    %20 = arith.minimumf %19, %18 : vector<256x128xf32>
    %21 = vector.shape_cast %20 : vector<256x128xf32> to vector<16x16x128xf32>
    %22 = arith.truncf %21 : vector<16x16x128xf32> to vector<16x16x128xbf16>
    %c1 = arith.constant 1 : index
    %c1_24 = arith.constant 1 : index
    %c0_25 = arith.constant 0 : index
    %23 = vector.load %arg9[%c1, %c1_24, %c0_25] : memref<18x18x128xbf16, #tpu.memory_space<vmem>>, vector<16x16x128xbf16>
    tpu.vector_store %arg9[%c1, %c1_24, %c0_25], %22 {strides = array<i32>} : memref<18x18x128xbf16, #tpu.memory_space<vmem>>, vector<16x16x128xbf16>,
    %c0_26 = arith.constant 0 : index
    %c0_27 = arith.constant 0 : index
    %c0_28 = arith.constant 0 : index
    %24 = vector.load %arg4[%c0_26, %c0_27, %c0_28] : memref<3x3x128xf32, #tpu.memory_space<vmem>>, vector<3x3x128xf32>
    %25 = vector.extract_strided_slice %24 {offsets = [0, 0, 0], sizes = [1, 1, 128], strides = [1, 1, 1]} : vector<3x3x128xf32> to vector<1x1x128xf32>
    %26 = vector.shape_cast %25 : vector<1x1x128xf32> to vector<128xf32>
    %27 = vector.extract_strided_slice %24 {offsets = [0, 1, 0], sizes = [1, 1, 128], strides = [1, 1, 1]} : vector<3x3x128xf32> to vector<1x1x128xf32>
    %28 = vector.shape_cast %27 : vector<1x1x128xf32> to vector<128xf32>
    %29 = vector.extract_strided_slice %24 {offsets = [0, 2, 0], sizes = [1, 1, 128], strides = [1, 1, 1]} : vector<3x3x128xf32> to vector<1x1x128xf32>
    %30 = vector.shape_cast %29 : vector<1x1x128xf32> to vector<128xf32>
    %31 = vector.extract_strided_slice %24 {offsets = [1, 0, 0], sizes = [1, 1, 128], strides = [1, 1, 1]} : vector<3x3x128xf32> to vector<1x1x128xf32>
    %32 = vector.shape_cast %31 : vector<1x1x128xf32> to vector<128xf32>
    %33 = vector.extract_strided_slice %24 {offsets = [1, 1, 0], sizes = [1, 1, 128], strides = [1, 1, 1]} : vector<3x3x128xf32> to vector<1x1x128xf32>
    %34 = vector.shape_cast %33 : vector<1x1x128xf32> to vector<128xf32>
    %35 = vector.extract_strided_slice %24 {offsets = [1, 2, 0], sizes = [1, 1, 128], strides = [1, 1, 1]} : vector<3x3x128xf32> to vector<1x1x128xf32>
    %36 = vector.shape_cast %35 : vector<1x1x128xf32> to vector<128xf32>
    %37 = vector.extract_strided_slice %24 {offsets = [2, 0, 0], sizes = [1, 1, 128], strides = [1, 1, 1]} : vector<3x3x128xf32> to vector<1x1x128xf32>
    %38 = vector.shape_cast %37 : vector<1x1x128xf32> to vector<128xf32>
    %39 = vector.extract_strided_slice %24 {offsets = [2, 1, 0], sizes = [1, 1, 128], strides = [1, 1, 1]} : vector<3x3x128xf32> to vector<1x1x128xf32>
    %40 = vector.shape_cast %39 : vector<1x1x128xf32> to vector<128xf32>
    %41 = vector.extract_strided_slice %24 {offsets = [2, 2, 0], sizes = [1, 1, 128], strides = [1, 1, 1]} : vector<3x3x128xf32> to vector<1x1x128xf32>
    %42 = vector.shape_cast %41 : vector<1x1x128xf32> to vector<128xf32>
    %c0_29 = arith.constant 0 : index
    %c0_30 = arith.constant 0 : index
    %43 = vector.load %arg5[%c0_29, %c0_30] : memref<1x128xf32, #tpu.memory_space<vmem>>, vector<1x128xf32>
    %c0_31 = arith.constant 0 : index
    %c0_32 = arith.constant 0 : index
    %44 = vector.load %arg6[%c0_31, %c0_32] : memref<128x4xbf16, #tpu.memory_space<vmem>>, vector<128x4xbf16>
    %c0_33 = arith.constant 0 : index
    %c0_34 = arith.constant 0 : index
    %45 = vector.load %arg7[%c0_33, %c0_34] : memref<1x4xf32, #tpu.memory_space<vmem>>, vector<1x4xf32>
    %c0_i32 = arith.constant 0 : i32
    %c8_i32 = arith.constant 8 : i32
    %46 = arith.muli %c0_i32, %c8_i32 : i32
    %47 = tpu.assume_multiple %46, 8 : i32
    %cst_35 = arith.constant 0.000000e+00 : f32
    %48 = vector.broadcast %cst_35 : f32 to vector<8x16x128xf32>
    %c0_i32_36 = arith.constant 0 : i32
    %49 = arith.addi %47, %c0_i32_36 : i32
    %50 = arith.index_cast %49 : i32 to index
    %c0_37 = arith.constant 0 : index
    %c0_38 = arith.constant 0 : index
    %51 = vector.load %arg9[%50, %c0_37, %c0_38] : memref<18x18x128xbf16, #tpu.memory_space<vmem>>, vector<8x16x128xbf16>
    %52 = arith.extf %51 : vector<8x16x128xbf16> to vector<8x16x128xf32>
    %53 = vector.shape_cast %26 : vector<128xf32> to vector<1x1x128xf32>
    %54 = vector.broadcast %53 : vector<1x1x128xf32> to vector<8x16x128xf32>
    %55 = arith.mulf %52, %54 : vector<8x16x128xf32>
    %56 = arith.addf %48, %55 : vector<8x16x128xf32>
    %c0_i32_39 = arith.constant 0 : i32
    %57 = arith.addi %47, %c0_i32_39 : i32
    %58 = arith.index_cast %57 : i32 to index
    %c1_40 = arith.constant 1 : index
    %c0_41 = arith.constant 0 : index
    %59 = vector.load %arg9[%58, %c1_40, %c0_41] : memref<18x18x128xbf16, #tpu.memory_space<vmem>>, vector<8x16x128xbf16>
    %60 = arith.extf %59 : vector<8x16x128xbf16> to vector<8x16x128xf32>
    %61 = vector.shape_cast %28 : vector<128xf32> to vector<1x1x128xf32>
    %62 = vector.broadcast %61 : vector<1x1x128xf32> to vector<8x16x128xf32>
    %63 = arith.mulf %60, %62 : vector<8x16x128xf32>
    %64 = arith.addf %56, %63 : vector<8x16x128xf32>
    %c0_i32_42 = arith.constant 0 : i32
    %65 = arith.addi %47, %c0_i32_42 : i32
    %66 = arith.index_cast %65 : i32 to index
    %c2 = arith.constant 2 : index
    %c0_43 = arith.constant 0 : index
    %67 = vector.load %arg9[%66, %c2, %c0_43] : memref<18x18x128xbf16, #tpu.memory_space<vmem>>, vector<8x16x128xbf16>
    %68 = arith.extf %67 : vector<8x16x128xbf16> to vector<8x16x128xf32>
    %69 = vector.shape_cast %30 : vector<128xf32> to vector<1x1x128xf32>
    %70 = vector.broadcast %69 : vector<1x1x128xf32> to vector<8x16x128xf32>
    %71 = arith.mulf %68, %70 : vector<8x16x128xf32>
    %72 = arith.addf %64, %71 : vector<8x16x128xf32>
    %c1_i32 = arith.constant 1 : i32
    %73 = arith.addi %47, %c1_i32 : i32
    %74 = arith.index_cast %73 : i32 to index
    %c0_44 = arith.constant 0 : index
    %c0_45 = arith.constant 0 : index
    %75 = vector.load %arg9[%74, %c0_44, %c0_45] : memref<18x18x128xbf16, #tpu.memory_space<vmem>>, vector<8x16x128xbf16>
    %76 = arith.extf %75 : vector<8x16x128xbf16> to vector<8x16x128xf32>
    %77 = vector.shape_cast %32 : vector<128xf32> to vector<1x1x128xf32>
    %78 = vector.broadcast %77 : vector<1x1x128xf32> to vector<8x16x128xf32>
    %79 = arith.mulf %76, %78 : vector<8x16x128xf32>
    %80 = arith.addf %72, %79 : vector<8x16x128xf32>
    %c1_i32_46 = arith.constant 1 : i32
    %81 = arith.addi %47, %c1_i32_46 : i32
    %82 = arith.index_cast %81 : i32 to index
    %c1_47 = arith.constant 1 : index
    %c0_48 = arith.constant 0 : index
    %83 = vector.load %arg9[%82, %c1_47, %c0_48] : memref<18x18x128xbf16, #tpu.memory_space<vmem>>, vector<8x16x128xbf16>
    %84 = arith.extf %83 : vector<8x16x128xbf16> to vector<8x16x128xf32>
    %85 = vector.shape_cast %34 : vector<128xf32> to vector<1x1x128xf32>
    %86 = vector.broadcast %85 : vector<1x1x128xf32> to vector<8x16x128xf32>
    %87 = arith.mulf %84, %86 : vector<8x16x128xf32>
    %88 = arith.addf %80, %87 : vector<8x16x128xf32>
    %c1_i32_49 = arith.constant 1 : i32
    %89 = arith.addi %47, %c1_i32_49 : i32
    %90 = arith.index_cast %89 : i32 to index
    %c2_50 = arith.constant 2 : index
    %c0_51 = arith.constant 0 : index
    %91 = vector.load %arg9[%90, %c2_50, %c0_51] : memref<18x18x128xbf16, #tpu.memory_space<vmem>>, vector<8x16x128xbf16>
    %92 = arith.extf %91 : vector<8x16x128xbf16> to vector<8x16x128xf32>
    %93 = vector.shape_cast %36 : vector<128xf32> to vector<1x1x128xf32>
    %94 = vector.broadcast %93 : vector<1x1x128xf32> to vector<8x16x128xf32>
    %95 = arith.mulf %92, %94 : vector<8x16x128xf32>
    %96 = arith.addf %88, %95 : vector<8x16x128xf32>
    %c2_i32 = arith.constant 2 : i32
    %97 = arith.addi %47, %c2_i32 : i32
    %98 = arith.index_cast %97 : i32 to index
    %c0_52 = arith.constant 0 : index
    %c0_53 = arith.constant 0 : index
    %99 = vector.load %arg9[%98, %c0_52, %c0_53] : memref<18x18x128xbf16, #tpu.memory_space<vmem>>, vector<8x16x128xbf16>
    %100 = arith.extf %99 : vector<8x16x128xbf16> to vector<8x16x128xf32>
    %101 = vector.shape_cast %38 : vector<128xf32> to vector<1x1x128xf32>
    %102 = vector.broadcast %101 : vector<1x1x128xf32> to vector<8x16x128xf32>
    %103 = arith.mulf %100, %102 : vector<8x16x128xf32>
    %104 = arith.addf %96, %103 : vector<8x16x128xf32>
    %c2_i32_54 = arith.constant 2 : i32
    %105 = arith.addi %47, %c2_i32_54 : i32
    %106 = arith.index_cast %105 : i32 to index
    %c1_55 = arith.constant 1 : index
    %c0_56 = arith.constant 0 : index
    %107 = vector.load %arg9[%106, %c1_55, %c0_56] : memref<18x18x128xbf16, #tpu.memory_space<vmem>>, vector<8x16x128xbf16>
    %108 = arith.extf %107 : vector<8x16x128xbf16> to vector<8x16x128xf32>
    %109 = vector.shape_cast %40 : vector<128xf32> to vector<1x1x128xf32>
    %110 = vector.broadcast %109 : vector<1x1x128xf32> to vector<8x16x128xf32>
    %111 = arith.mulf %108, %110 : vector<8x16x128xf32>
    %112 = arith.addf %104, %111 : vector<8x16x128xf32>
    %c2_i32_57 = arith.constant 2 : i32
    %113 = arith.addi %47, %c2_i32_57 : i32
    %114 = arith.index_cast %113 : i32 to index
    %c2_58 = arith.constant 2 : index
    %c0_59 = arith.constant 0 : index
    %115 = vector.load %arg9[%114, %c2_58, %c0_59] : memref<18x18x128xbf16, #tpu.memory_space<vmem>>, vector<8x16x128xbf16>
    %116 = arith.extf %115 : vector<8x16x128xbf16> to vector<8x16x128xf32>
    %117 = vector.shape_cast %42 : vector<128xf32> to vector<1x1x128xf32>
    %118 = vector.broadcast %117 : vector<1x1x128xf32> to vector<8x16x128xf32>
    %119 = arith.mulf %116, %118 : vector<8x16x128xf32>
    %120 = arith.addf %112, %119 : vector<8x16x128xf32>
    %121 = vector.shape_cast %43 : vector<1x128xf32> to vector<1x1x128xf32>
    %122 = vector.broadcast %121 : vector<1x1x128xf32> to vector<8x16x128xf32>
    %123 = arith.addf %120, %122 : vector<8x16x128xf32>
    %cst_60 = arith.constant 0.000000e+00 : f32
    %cst_61 = arith.constant 6.000000e+00 : f32
    %124 = vector.broadcast %cst_60 : f32 to vector<8x16x128xf32>
    %125 = arith.maximumf %124, %123 : vector<8x16x128xf32>
    %126 = vector.broadcast %cst_61 : f32 to vector<8x16x128xf32>
    %127 = arith.minimumf %126, %125 : vector<8x16x128xf32>
    %128 = vector.shape_cast %127 : vector<8x16x128xf32> to vector<128x128xf32>
    %129 = arith.truncf %128 : vector<128x128xf32> to vector<128x128xbf16>
    %cst_62 = arith.constant dense<0.000000e+00> : vector<128x4xf32>
    %130 = tpu.matmul %129, %44, %cst_62 {dimension_numbers = #tpu.dot_dimension_numbers<[1], [0], [0], [1], [0, 0, 1, 1], [], []>} : vector<128x128xbf16>, vector<128x4xbf16>, vector<128x4xf32> -> vector<128x4xf32>
    %131 = vector.broadcast %45 : vector<1x4xf32> to vector<128x4xf32>
    %132 = arith.addf %130, %131 : vector<128x4xf32>
    %133 = vector.shape_cast %132 : vector<128x4xf32> to vector<8x16x4xf32>
    %c0_63 = arith.constant 0 : index
    %134 = arith.index_cast %47 : i32 to index
    %c0_64 = arith.constant 0 : index
    %c0_65 = arith.constant 0 : index
    %135 = vector.load %arg1[%c0_63, %134, %c0_64, %c0_65] : memref<1x16x16x4xf32, #tpu.memory_space<vmem>>, vector<1x8x16x4xf32>
    %136 = vector.shape_cast %135 : vector<1x8x16x4xf32> to vector<8x16x4xf32>
    %137 = arith.addf %133, %136 : vector<8x16x4xf32>
    %c0_66 = arith.constant 0 : index
    %138 = arith.index_cast %47 : i32 to index
    %c0_67 = arith.constant 0 : index
    %c0_68 = arith.constant 0 : index
    %139 = vector.load %arg8[%c0_66, %138, %c0_67, %c0_68] : memref<1x16x16x4xf32, #tpu.memory_space<vmem>>, vector<1x8x16x4xf32>
    %140 = vector.shape_cast %139 : vector<1x8x16x4xf32> to vector<8x16x4xf32>
    %141 = vector.shape_cast %137 : vector<8x16x4xf32> to vector<1x8x16x4xf32>
    tpu.vector_store %arg8[%c0_66, %138, %c0_67, %c0_68], %141 {strides = array<i32>} : memref<1x16x16x4xf32, #tpu.memory_space<vmem>>, vector<1x8x16x4xf32>,
    %c1_i32_69 = arith.constant 1 : i32
    %c8_i32_70 = arith.constant 8 : i32
    %142 = arith.muli %c1_i32_69, %c8_i32_70 : i32
    %143 = tpu.assume_multiple %142, 8 : i32
    %cst_71 = arith.constant 0.000000e+00 : f32
    %144 = vector.broadcast %cst_71 : f32 to vector<8x16x128xf32>
    %c0_i32_72 = arith.constant 0 : i32
    %145 = arith.addi %143, %c0_i32_72 : i32
    %146 = arith.index_cast %145 : i32 to index
    %c0_73 = arith.constant 0 : index
    %c0_74 = arith.constant 0 : index
    %147 = vector.load %arg9[%146, %c0_73, %c0_74] : memref<18x18x128xbf16, #tpu.memory_space<vmem>>, vector<8x16x128xbf16>
    %148 = arith.extf %147 : vector<8x16x128xbf16> to vector<8x16x128xf32>
    %149 = vector.shape_cast %26 : vector<128xf32> to vector<1x1x128xf32>
    %150 = vector.broadcast %149 : vector<1x1x128xf32> to vector<8x16x128xf32>
    %151 = arith.mulf %148, %150 : vector<8x16x128xf32>
    %152 = arith.addf %144, %151 : vector<8x16x128xf32>
    %c0_i32_75 = arith.constant 0 : i32
    %153 = arith.addi %143, %c0_i32_75 : i32
    %154 = arith.index_cast %153 : i32 to index
    %c1_76 = arith.constant 1 : index
    %c0_77 = arith.constant 0 : index
    %155 = vector.load %arg9[%154, %c1_76, %c0_77] : memref<18x18x128xbf16, #tpu.memory_space<vmem>>, vector<8x16x128xbf16>
    %156 = arith.extf %155 : vector<8x16x128xbf16> to vector<8x16x128xf32>
    %157 = vector.shape_cast %28 : vector<128xf32> to vector<1x1x128xf32>
    %158 = vector.broadcast %157 : vector<1x1x128xf32> to vector<8x16x128xf32>
    %159 = arith.mulf %156, %158 : vector<8x16x128xf32>
    %160 = arith.addf %152, %159 : vector<8x16x128xf32>
    %c0_i32_78 = arith.constant 0 : i32
    %161 = arith.addi %143, %c0_i32_78 : i32
    %162 = arith.index_cast %161 : i32 to index
    %c2_79 = arith.constant 2 : index
    %c0_80 = arith.constant 0 : index
    %163 = vector.load %arg9[%162, %c2_79, %c0_80] : memref<18x18x128xbf16, #tpu.memory_space<vmem>>, vector<8x16x128xbf16>
    %164 = arith.extf %163 : vector<8x16x128xbf16> to vector<8x16x128xf32>
    %165 = vector.shape_cast %30 : vector<128xf32> to vector<1x1x128xf32>
    %166 = vector.broadcast %165 : vector<1x1x128xf32> to vector<8x16x128xf32>
    %167 = arith.mulf %164, %166 : vector<8x16x128xf32>
    %168 = arith.addf %160, %167 : vector<8x16x128xf32>
    %c1_i32_81 = arith.constant 1 : i32
    %169 = arith.addi %143, %c1_i32_81 : i32
    %170 = arith.index_cast %169 : i32 to index
    %c0_82 = arith.constant 0 : index
    %c0_83 = arith.constant 0 : index
    %171 = vector.load %arg9[%170, %c0_82, %c0_83] : memref<18x18x128xbf16, #tpu.memory_space<vmem>>, vector<8x16x128xbf16>
    %172 = arith.extf %171 : vector<8x16x128xbf16> to vector<8x16x128xf32>
    %173 = vector.shape_cast %32 : vector<128xf32> to vector<1x1x128xf32>
    %174 = vector.broadcast %173 : vector<1x1x128xf32> to vector<8x16x128xf32>
    %175 = arith.mulf %172, %174 : vector<8x16x128xf32>
    %176 = arith.addf %168, %175 : vector<8x16x128xf32>
    %c1_i32_84 = arith.constant 1 : i32
    %177 = arith.addi %143, %c1_i32_84 : i32
    %178 = arith.index_cast %177 : i32 to index
    %c1_85 = arith.constant 1 : index
    %c0_86 = arith.constant 0 : index
    %179 = vector.load %arg9[%178, %c1_85, %c0_86] : memref<18x18x128xbf16, #tpu.memory_space<vmem>>, vector<8x16x128xbf16>
    %180 = arith.extf %179 : vector<8x16x128xbf16> to vector<8x16x128xf32>
    %181 = vector.shape_cast %34 : vector<128xf32> to vector<1x1x128xf32>
    %182 = vector.broadcast %181 : vector<1x1x128xf32> to vector<8x16x128xf32>
    %183 = arith.mulf %180, %182 : vector<8x16x128xf32>
    %184 = arith.addf %176, %183 : vector<8x16x128xf32>
    %c1_i32_87 = arith.constant 1 : i32
    %185 = arith.addi %143, %c1_i32_87 : i32
    %186 = arith.index_cast %185 : i32 to index
    %c2_88 = arith.constant 2 : index
    %c0_89 = arith.constant 0 : index
    %187 = vector.load %arg9[%186, %c2_88, %c0_89] : memref<18x18x128xbf16, #tpu.memory_space<vmem>>, vector<8x16x128xbf16>
    %188 = arith.extf %187 : vector<8x16x128xbf16> to vector<8x16x128xf32>
    %189 = vector.shape_cast %36 : vector<128xf32> to vector<1x1x128xf32>
    %190 = vector.broadcast %189 : vector<1x1x128xf32> to vector<8x16x128xf32>
    %191 = arith.mulf %188, %190 : vector<8x16x128xf32>
    %192 = arith.addf %184, %191 : vector<8x16x128xf32>
    %c2_i32_90 = arith.constant 2 : i32
    %193 = arith.addi %143, %c2_i32_90 : i32
    %194 = arith.index_cast %193 : i32 to index
    %c0_91 = arith.constant 0 : index
    %c0_92 = arith.constant 0 : index
    %195 = vector.load %arg9[%194, %c0_91, %c0_92] : memref<18x18x128xbf16, #tpu.memory_space<vmem>>, vector<8x16x128xbf16>
    %196 = arith.extf %195 : vector<8x16x128xbf16> to vector<8x16x128xf32>
    %197 = vector.shape_cast %38 : vector<128xf32> to vector<1x1x128xf32>
    %198 = vector.broadcast %197 : vector<1x1x128xf32> to vector<8x16x128xf32>
    %199 = arith.mulf %196, %198 : vector<8x16x128xf32>
    %200 = arith.addf %192, %199 : vector<8x16x128xf32>
    %c2_i32_93 = arith.constant 2 : i32
    %201 = arith.addi %143, %c2_i32_93 : i32
    %202 = arith.index_cast %201 : i32 to index
    %c1_94 = arith.constant 1 : index
    %c0_95 = arith.constant 0 : index
    %203 = vector.load %arg9[%202, %c1_94, %c0_95] : memref<18x18x128xbf16, #tpu.memory_space<vmem>>, vector<8x16x128xbf16>
    %204 = arith.extf %203 : vector<8x16x128xbf16> to vector<8x16x128xf32>
    %205 = vector.shape_cast %40 : vector<128xf32> to vector<1x1x128xf32>
    %206 = vector.broadcast %205 : vector<1x1x128xf32> to vector<8x16x128xf32>
    %207 = arith.mulf %204, %206 : vector<8x16x128xf32>
    %208 = arith.addf %200, %207 : vector<8x16x128xf32>
    %c2_i32_96 = arith.constant 2 : i32
    %209 = arith.addi %143, %c2_i32_96 : i32
    %210 = arith.index_cast %209 : i32 to index
    %c2_97 = arith.constant 2 : index
    %c0_98 = arith.constant 0 : index
    %211 = vector.load %arg9[%210, %c2_97, %c0_98] : memref<18x18x128xbf16, #tpu.memory_space<vmem>>, vector<8x16x128xbf16>
    %212 = arith.extf %211 : vector<8x16x128xbf16> to vector<8x16x128xf32>
    %213 = vector.shape_cast %42 : vector<128xf32> to vector<1x1x128xf32>
    %214 = vector.broadcast %213 : vector<1x1x128xf32> to vector<8x16x128xf32>
    %215 = arith.mulf %212, %214 : vector<8x16x128xf32>
    %216 = arith.addf %208, %215 : vector<8x16x128xf32>
    %217 = vector.shape_cast %43 : vector<1x128xf32> to vector<1x1x128xf32>
    %218 = vector.broadcast %217 : vector<1x1x128xf32> to vector<8x16x128xf32>
    %219 = arith.addf %216, %218 : vector<8x16x128xf32>
    %cst_99 = arith.constant 0.000000e+00 : f32
    %cst_100 = arith.constant 6.000000e+00 : f32
    %220 = vector.broadcast %cst_99 : f32 to vector<8x16x128xf32>
    %221 = arith.maximumf %220, %219 : vector<8x16x128xf32>
    %222 = vector.broadcast %cst_100 : f32 to vector<8x16x128xf32>
    %223 = arith.minimumf %222, %221 : vector<8x16x128xf32>
    %224 = vector.shape_cast %223 : vector<8x16x128xf32> to vector<128x128xf32>
    %225 = arith.truncf %224 : vector<128x128xf32> to vector<128x128xbf16>
    %cst_101 = arith.constant dense<0.000000e+00> : vector<128x4xf32>
    %226 = tpu.matmul %225, %44, %cst_101 {dimension_numbers = #tpu.dot_dimension_numbers<[1], [0], [0], [1], [0, 0, 1, 1], [], []>} : vector<128x128xbf16>, vector<128x4xbf16>, vector<128x4xf32> -> vector<128x4xf32>
    %227 = vector.broadcast %45 : vector<1x4xf32> to vector<128x4xf32>
    %228 = arith.addf %226, %227 : vector<128x4xf32>
    %229 = vector.shape_cast %228 : vector<128x4xf32> to vector<8x16x4xf32>
    %c0_102 = arith.constant 0 : index
    %230 = arith.index_cast %143 : i32 to index
    %c0_103 = arith.constant 0 : index
    %c0_104 = arith.constant 0 : index
    %231 = vector.load %arg1[%c0_102, %230, %c0_103, %c0_104] : memref<1x16x16x4xf32, #tpu.memory_space<vmem>>, vector<1x8x16x4xf32>
    %232 = vector.shape_cast %231 : vector<1x8x16x4xf32> to vector<8x16x4xf32>
    %233 = arith.addf %229, %232 : vector<8x16x4xf32>
    %c0_105 = arith.constant 0 : index
    %234 = arith.index_cast %143 : i32 to index
    %c0_106 = arith.constant 0 : index
    %c0_107 = arith.constant 0 : index
    %235 = vector.load %arg8[%c0_105, %234, %c0_106, %c0_107] : memref<1x16x16x4xf32, #tpu.memory_space<vmem>>, vector<1x8x16x4xf32>
    %236 = vector.shape_cast %235 : vector<1x8x16x4xf32> to vector<8x16x4xf32>
    %237 = vector.shape_cast %233 : vector<8x16x4xf32> to vector<1x8x16x4xf32>
    tpu.vector_store %arg8[%c0_105, %234, %c0_106, %c0_107], %237 {strides = array<i32>} : memref<1x16x16x4xf32, #tpu.memory_space<vmem>>, vector<1x8x16x4xf32>,
    %c2_i32_108 = arith.constant 2 : i32
    return
  }
  func.func @transform_0(%arg0: i32) -> (i32, i32, i32, i32) {
    %c0_i32 = arith.constant 0 : i32
    %c0_i32_0 = arith.constant 0 : i32
    %c0_i32_1 = arith.constant 0 : i32
    %c0_i32_2 = arith.constant 0 : i32
    return %arg0, %c0_i32, %c0_i32_0, %c0_i32_1 : i32, i32, i32, i32
  }
  func.func @transform_1(%arg0: i32) -> (i32, i32) {
    %c0_i32 = arith.constant 0 : i32
    %c0_i32_0 = arith.constant 0 : i32
    %c0_i32_1 = arith.constant 0 : i32
    return %c0_i32, %c0_i32_0 : i32, i32
  }
  func.func @transform_2(%arg0: i32) -> (i32, i32) {
    %c0_i32 = arith.constant 0 : i32
    %c0_i32_0 = arith.constant 0 : i32
    %c0_i32_1 = arith.constant 0 : i32
    return %c0_i32, %c0_i32_0 : i32, i32
  }
  func.func @transform_3(%arg0: i32) -> (i32, i32, i32) {
    %c0_i32 = arith.constant 0 : i32
    %c0_i32_0 = arith.constant 0 : i32
    %c0_i32_1 = arith.constant 0 : i32
    %c0_i32_2 = arith.constant 0 : i32
    return %c0_i32, %c0_i32_0, %c0_i32_1 : i32, i32, i32
  }
  func.func @transform_4(%arg0: i32) -> (i32, i32) {
    %c0_i32 = arith.constant 0 : i32
    %c0_i32_0 = arith.constant 0 : i32
    %c0_i32_1 = arith.constant 0 : i32
    return %c0_i32, %c0_i32_0 : i32, i32
  }
  func.func @transform_5(%arg0: i32) -> (i32, i32) {
    %c0_i32 = arith.constant 0 : i32
    %c0_i32_0 = arith.constant 0 : i32
    %c0_i32_1 = arith.constant 0 : i32
    return %c0_i32, %c0_i32_0 : i32, i32
  }
  func.func @transform_6(%arg0: i32) -> (i32, i32) {
    %c0_i32 = arith.constant 0 : i32
    %c0_i32_0 = arith.constant 0 : i32
    %c0_i32_1 = arith.constant 0 : i32
    return %c0_i32, %c0_i32_0 : i32, i32
  }
  func.func @transform_7(%arg0: i32) -> (i32, i32, i32, i32) {
    %c0_i32 = arith.constant 0 : i32
    %c0_i32_0 = arith.constant 0 : i32
    %c0_i32_1 = arith.constant 0 : i32
    %c0_i32_2 = arith.constant 0 : i32
    return %arg0, %c0_i32, %c0_i32_0, %c0_i32_1 : i32, i32, i32, i32
  }
}

</mosaic_0001>

<bundles_post_ra>
// kernel: tpu_custom_call.1
= control target key start
LH: loop header
LB: loop body
LE: loop exit
PB: predicated region body
PF: predicated region fallthrough
CT: control target
= control target key end

     0   :  { %s4387_s24 = smov 0   ;;  %s5768_s0 = inlined_call_operand.vmem [shape: f32[2,16,16,4], index: 0, kind: input, shape index: {}]   ;;  %s5769_s1 = inlined_call_operand.vmem [shape: bf16[4,128], index: 1, kind: input, shape index: {}]   ;;  %s5770_s2 = inlined_call_operand.vmem [shape: f32[1,128], index: 2, kind: input, shape index: {}]   ;;  %s5771_s3 = inlined_call_operand.vmem [shape: f32[3,3,128], index: 3, kind: input, shape index: {}]   ;;  %s5772_s4 = inlined_call_operand.vmem [shape: f32[1,128], index: 4, kind: input, shape index: {}]   ;;  %s5773_s5 = inlined_call_operand.vmem [shape: bf16[128,4], index: 5, kind: input, shape index: {}]   ;;  %s5774_s6 = inlined_call_operand.vmem [shape: f32[1,4], index: 6, kind: input, shape index: {}]   ;;  %s5775_s7 = inlined_call_operand.vmem [shape: f32[2,16,16,4], index: 7, kind: output, shape index: {}]  }
   0x1 LB: > { %s3894_s25 = sadd.s32 4294967295, %s4344_s24   ;;  %p3898_p0 = scmp.ge.s32.totalorder %s4344_s24, 1  ;;  %s4344_s24 = sphi %s4387_s24, %s17_s24  }
   0x2   : > { %p237_p1 = scmp.lt.s32.totalorder %s4344_s24, 3 }
   0x4   : > { %p238_p2 = pnand %p3898_p0, %p237_p1 }
   0x5   : > { %v448_v0 = vld [vmem:[%s5769_s1] sm:$0x3] (!%p238_p2)  ;;  %vm505_vm0 = vcmask (!%p238_p2), 1041408   ;;  %p269_p3 = scmp.lt.s32.totalorder (!%p238_p2), %s3894_s25, 1  ;;  %vm287_vm1 = vcmask (!%p238_p2), 1040384   ;;  %vm456_vm4 = vcmask (!%p238_p2), 31744  }
   0x6   : > { %241 = sbr.rel (%p238_p2) target bundleno = 893 (0x37d), region = 48  ;;  %4309 = vmatprep.subr.msk.bf16.mxu0 (!%p238_p2), %vm505_vm0, %v448_v0  ;;  %v507_v1 = vsel (!%p238_p2), %vm505_vm0, %v448_v0, 0  ;;  %vm288_vm2 = vsmask.f32 (!%p238_p2), 256  ;;  %v296_v2 = vld [vmem:[#allocation2 + $0x18] sm:$0x1] (!%p238_p2) }
   0x7   : > { %4196 = vmatpush3.bf16.msra.mxu0 (!%p238_p2), %v507_v1  ;;  %vm4402_vm3 = vmand (!%p238_p2), %vm287_vm1, %vm288_vm2  ;;  %vm344_vm5 = vsmask.f32 (!%p238_p2), 7938  ;;  %v293_v54 = vld [vmem:[#allocation2 + $0xc] sm:$0x1] (!%p238_p2)  ;;  %v352_v56 = vld [vmem:[#allocation2 + $0x20] sm:$0x1] (!%p238_p2) }
   0x8   : > { %v297_v4 = vsel (!%p238_p2), %vm4402_vm3, 0, %v296_v2  ;;  %vm4466_vm6 = vmand (!%p238_p2), %vm287_vm1, %vm344_vm5  ;;  %v294_v55 = vsel (!%p238_p2), %vm4402_vm3, 0, %v293_v54  ;;  %v349_v58 = vld [vmem:[#allocation2 + $0x14] sm:$0x1] (!%p238_p2)  ;;  %v302_v60 = vld [vmem:[#allocation2 + $0x30] sm:$0x1] (!%p238_p2) }
   0x9   : > { %298 = vst [vmem:[#allocation2 + $0x18] sm:$0x1] (!%p238_p2), %v297_v4  ;;  %295 = vst [vmem:[#allocation2 + $0xc] sm:$0x1] (!%p238_p2), %v294_v55  ;;  %v353_v57 = vsel (!%p238_p2), %vm4466_vm6, 0, %v352_v56  ;;  %v350_v59 = vsel (!%p238_p2), %vm4466_vm6, 0, %v349_v58  ;;  %v1323_v58 = vlaneseq (!%p238_p2) }
   0xa   : > { %354 = vst [vmem:[#allocation2 + $0x20] sm:$0x1] (!%p238_p2), %v353_v57  ;;  %351 = vst [vmem:[#allocation2 + $0x14] sm:$0x1] (!%p238_p2), %v350_v59  ;;  %v303_v61 = vsel (!%p238_p2), %vm4402_vm3, 0, %v302_v60  ;;  %v4346_v2 = vmov (!%p238_p2), 0  }
   0xb   : > { %v299_v62 = vld [vmem:[#allocation2 + $0x24] sm:$0x1] (!%p238_p2)  ;;  %304 = vst [vmem:[#allocation2 + $0x30] sm:$0x1] (!%p238_p2), %v303_v61  ;;  %v358_v0 = vld [vmem:[#allocation2 + $0x38] sm:$0x1] (!%p238_p2) }
   0xc   : > { %v300_v63 = vsel (!%p238_p2), %vm4402_vm3, 0, %v299_v62  ;;  %v359_v1 = vsel (!%p238_p2), %vm4466_vm6, 0, %v358_v0  ;;  %280 = vst [vmem:[#allocation2] sm:$0xf] (!%p238_p2), %v4346_v2  ;;  %281 = vst [vmem:[#allocation2 + $0x4] sm:$0xf] (!%p238_p2), %v4346_v2 }
   0xd   : > { %s5785_s25 = smov (!%p269_p3, %s3894_s25), 1  ;;  %301 = vst [vmem:[#allocation2 + $0x24] sm:$0x1] %v300_v63  ;;  %360 = vst [vmem:[#allocation2 + $0x38] sm:$0x1] %v359_v1  ;;  %v1324_v59 = vshrl.u32 %v1323_v58, 7 }
   0xe   : > { %s3996_s28 = sshll.u32 %s5785_s25, 8  ;;  %282 = vst [vmem:[#allocation2 + $0x8] sm:$0x1] %v4346_v2  ;;  %284 = vst [vmem:[#allocation2 + $0xcc] sm:$0xf] %v4346_v2  ;;  %v4326_v60 = vld [vmem:[%s5773_s5 + $0x38] sm:$0xff]  }
   0xf   : > { %s4414_s8 = scalar_lea.vmem %s5768_s0, %s3996_s28  ;;  %285 = vst [vmem:[#allocation2 + $0xd0] sm:$0xf] %v4346_v2  ;;  %286 = vst [vmem:[#allocation2 + $0xd4] sm:$0x1] %v4346_v2  ;;  %v355_v4 = vld [vmem:[#allocation2 + $0x2c] sm:$0x1]  ;;  %s5626_s23 = scalar_lea.vmem %s5775_s7, %s3996_s28 }
  0x10   : > { %v400_v5 = vld [vmem:[%s4414_s8] sm:$0xff]  ;;  %v401_v6 = vld [vmem:[%s4414_s8 + $0x8] sm:$0xff]  ;;  %v402_v7 = vld [vmem:[%s4414_s8 + $0x10] sm:$0xff]  ;;  %vm1427_vm7 = vcmask 1046528   ;;  %vm1568_vm8 = vcmask 1045504   ;;  %vm1153_vm9 = vcmask 1043456  }
  0x11   : > { %v432_v8 = vpack.c.bf16 %v401_v6, %v400_v5  ;;  %v403_v9 = vld [vmem:[%s4414_s8 + $0x18] sm:$0xff]  ;;  %v404_v10 = vld [vmem:[%s4414_s8 + $0x20] sm:$0xff]  ;;  %v405_v11 = vld [vmem:[%s4414_s8 + $0x28] sm:$0xff]  ;;  %v356_v5 = vsel %vm4466_vm6, 0, %v355_v4  ;;  %v4564_v4 = vsub.s32 1, %v1324_v59 }
  0x12   : > { %v433_v12 = vpack.c.bf16 %v403_v9, %v402_v7  ;;  %v434_v13 = vpack.c.bf16 %v405_v11, %v404_v10  ;;  %v406_v14 = vld [vmem:[%s4414_s8 + $0x30] sm:$0xff]  ;;  %v407_v15 = vld [vmem:[%s4414_s8 + $0x38] sm:$0xff]  ;;  %v408_v16 = vld [vmem:[%s4414_s8 + $0x40] sm:$0xff]  ;;  %357 = vst [vmem:[#allocation2 + $0x2c] sm:$0x1] %v356_v5 }
  0x13   : > { %4197 = vmatprep.mubr.msk.bf16.mxu0 %vm456_vm4, %v432_v8  ;;  %v409_v17 = vld [vmem:[%s4414_s8 + $0x48] sm:$0xff]  ;;  %v435_v18 = vpack.c.bf16 %v407_v15, %v406_v14  ;;  %v410_v20 = vld [vmem:[%s4414_s8 + $0x50] sm:$0xff]  ;;  %v411_v21 = vld [vmem:[%s4414_s8 + $0x58] sm:$0xff]  ;;  %vm830_vm10 = vsmask.f32 4368 }
  0x14   : > { %4198 = vmatmul.mubr.msk.bf16.vlgmr.msra.gmra.mrb[0].mxu0 %vm456_vm4, %v433_v12  ;;  %v436_v19 = vpack.c.bf16 %v409_v17, %v408_v16  ;;  %v412_v22 = vld [vmem:[%s4414_s8 + $0x60] sm:$0xff]  ;;  %v413_v23 = vld [vmem:[%s4414_s8 + $0x68] sm:$0xff]  ;;  %v437_v24 = vpack.c.bf16 %v411_v21, %v410_v20  ;;  %v414_v26 = vld [vmem:[%s4414_s8 + $0x70] sm:$0xff] }
  0x15   : > { %4201 = vmatprep.mubr.msk.bf16.mxu0 %vm456_vm4, %v434_v13  ;;  %v438_v25 = vpack.c.bf16 %v413_v23, %v412_v22  ;;  %v415_v27 = vld [vmem:[%s4414_s8 + $0x78] sm:$0xff]  ;;  %v416_v28 = vld [vmem:[%s4414_s8 + $0x80] sm:$0xff]  ;;  %v417_v29 = vld [vmem:[%s4414_s8 + $0x88] sm:$0xff] }
  0x16   : > { %v439_v30 = vpack.c.bf16 %v415_v27, %v414_v26  ;;  %v440_v31 = vpack.c.bf16 %v417_v29, %v416_v28  ;;  %v418_v32 = vld [vmem:[%s4414_s8 + $0x90] sm:$0xff]  ;;  %v419_v33 = vld [vmem:[%s4414_s8 + $0x98] sm:$0xff]  ;;  %v420_v34 = vld [vmem:[%s4414_s8 + $0xa0] sm:$0xff] }
  0x17   : > { %v421_v35 = vld [vmem:[%s4414_s8 + $0xa8] sm:$0xff]  ;;  %v441_v36 = vpack.c.bf16 %v419_v33, %v418_v32  ;;  %v422_v38 = vld [vmem:[%s4414_s8 + $0xb0] sm:$0xff]  ;;  %v423_v39 = vld [vmem:[%s4414_s8 + $0xb8] sm:$0xff] }
  0x18   : > { %v442_v37 = vpack.c.bf16 %v421_v35, %v420_v34  ;;  %v424_v40 = vld [vmem:[%s4414_s8 + $0xc0] sm:$0xff]  ;;  %v425_v41 = vld [vmem:[%s4414_s8 + $0xc8] sm:$0xff]  ;;  %v443_v42 = vpack.c.bf16 %v423_v39, %v422_v38  ;;  %v426_v44 = vld [vmem:[%s4414_s8 + $0xd0] sm:$0xff] }
  0x19   : > { %v444_v43 = vpack.c.bf16 %v425_v41, %v424_v40  ;;  %v427_v45 = vld [vmem:[%s4414_s8 + $0xd8] sm:$0xff]  ;;  %v428_v46 = vld [vmem:[%s4414_s8 + $0xe0] sm:$0xff]  ;;  %v429_v47 = vld [vmem:[%s4414_s8 + $0xe8] sm:$0xff] }
  0x1a   : > { %v445_v48 = vpack.c.bf16 %v427_v45, %v426_v44  ;;  %v446_v49 = vpack.c.bf16 %v429_v47, %v428_v46  ;;  %v430_v50 = vld [vmem:[%s4414_s8 + $0xf0] sm:$0xff]  ;;  %v431_v51 = vld [vmem:[%s4414_s8 + $0xf8] sm:$0xff]  ;;  %v308_v6 = vld [vmem:[#allocation2 + $0x48] sm:$0x1] }
  0x1b   : > { %v447_v52 = vpack.c.bf16 %v431_v51, %v430_v50  ;;  %v290_v7 = vld [vmem:[#allocation2] sm:$0x1]  ;;  %v346_v8 = vld [vmem:[#allocation2 + $0x8] sm:$0x1]  ;;  %v309_v9 = vsel %vm4402_vm3, 0, %v308_v6  ;;  %v4321_v28 = vld [vmem:[%s5773_s5 + $0x10] sm:$0xff]  }
  0x1c   : > { %4202 = vmatmul.mubr.msk.bf16.gmra.mrb[4].mxu0 %vm456_vm4, %v435_v18  ;;  %v305_v10 = vld [vmem:[#allocation2 + $0x3c] sm:$0x1]  ;;  %v291_v11 = vsel %vm4402_vm3, 0, %v290_v7  ;;  %v347_v12 = vsel %vm4466_vm6, 0, %v346_v8  ;;  %310 = vst [vmem:[#allocation2 + $0x48] sm:$0x1] %v309_v9  ;;  %vm4628_vm11 = vmand %vm1153_vm9, %vm344_vm5 }
  0x1d   : > { %4205 = vmatprep.mubr.msk.bf16.mxu0 %vm456_vm4, %v436_v19  ;;  %v306_v13 = vsel %vm4402_vm3, 0, %v305_v10  ;;  %v364_v14 = vld [vmem:[#allocation2 + $0x50] sm:$0x1]  ;;  %292 = vst [vmem:[#allocation2] sm:$0x1] %v291_v11  ;;  %v4499_v18 = vld [vmem:[%s5773_s5] sm:$0xff]   ;;  %vm4634_vm12 = vmor %vm288_vm2, %vm830_vm10 }
  0x1e   : > { %348 = vst [vmem:[#allocation2 + $0x8] sm:$0x1] %v347_v12  ;;  %307 = vst [vmem:[#allocation2 + $0x3c] sm:$0x1] %v306_v13  ;;  %v365_v15 = vsel %vm4466_vm6, 0, %v364_v14  ;;  %4229 = vmatprep.subr.bf16.mxu1 %v4499_v18  ;;  %4261 = vmatprep.subr.bf16.mxu0 %v4499_v18  ;;  %v4320_v22 = vld [vmem:[%s5773_s5 + $0x8] sm:$0xff]  }
  0x1f   : > { %v361_v16 = vld [vmem:[#allocation2 + $0x44] sm:$0x1]  ;;  %366 = vst [vmem:[#allocation2 + $0x50] sm:$0x1] %v365_v15  ;;  %v314_v19 = vld [vmem:[#allocation2 + $0x60] sm:$0x1]  ;;  %4230 = vmatpush3.bf16.msra.mxu1 %v4499_v18  ;;  %4262 = vmatpush3.bf16.msra.mxu0 %v4499_v18 }
  0x20   : > { %v362_v17 = vsel %vm4466_vm6, 0, %v361_v16  ;;  %v315_v20 = vsel %vm4402_vm3, 0, %v314_v19  ;;  %v311_v21 = vld [vmem:[#allocation2 + $0x54] sm:$0x1]  ;;  %4231 = vmatprep.subr.bf16.mxu1 %v4320_v22  ;;  %4263 = vmatprep.subr.bf16.mxu0 %v4320_v22  ;;  %v367_v26 = vld [vmem:[#allocation2 + $0x5c] sm:$0x1] }
  0x21   : > { %363 = vst [vmem:[#allocation2 + $0x44] sm:$0x1] %v362_v17  ;;  %316 = vst [vmem:[#allocation2 + $0x60] sm:$0x1] %v315_v20  ;;  %v312_v23 = vsel %vm4402_vm3, 0, %v311_v21  ;;  %v368_v27 = vsel %vm4466_vm6, 0, %v367_v26 }
  0x22   : > { %313 = vst [vmem:[#allocation2 + $0x54] sm:$0x1] %v312_v23  ;;  %369 = vst [vmem:[#allocation2 + $0x5c] sm:$0x1] %v368_v27  ;;  %v320_v29 = vld [vmem:[#allocation2 + $0x78] sm:$0x1] }
  0x23   : > { %4232 = vmatpush3.bf16.msra.mxu1 %v4320_v22  ;;  %4264 = vmatpush3.bf16.msra.mxu0 %v4320_v22  ;;  %v376_v33 = vld [vmem:[#allocation2 + $0x80] sm:$0x1]  ;;  %v4322_v34 = vld [vmem:[%s5773_s5 + $0x18] sm:$0xff]   ;;  %v326_v39 = vld [vmem:[#allocation2 + $0x90] sm:$0x1]  ;;  %v1518_v11 = vsub.s32 2, %v1324_v59 }
  0x24   : > { %4206 = vmatmul.mubr.msk.bf16.gmra.mrb[8].mxu0 %vm456_vm4, %v437_v24  ;;  %v370_v24 = vld [vmem:[#allocation2 + $0x68] sm:$0x1]  ;;  %4233 = vmatprep.subr.bf16.mxu1 %v4321_v28  ;;  %v377_v35 = vsel %vm4466_vm6, 0, %v376_v33  ;;  %v4323_v38 = vld [vmem:[%s5773_s5 + $0x20] sm:$0xff]   ;;  %v327_v40 = vsel %vm4402_vm3, 0, %v326_v39  ;;  %v1325_v14 = vsub.s32 0, %v1324_v59 }
  0x25   : > { %4209 = vmatprep.mubr.msk.bf16.mxu0 %vm456_vm4, %v438_v25  ;;  %v371_v25 = vsel %vm4466_vm6, 0, %v370_v24  ;;  %4265 = vmatprep.subr.bf16.mxu0 %v4321_v28  ;;  %378 = vst [vmem:[#allocation2 + $0x80] sm:$0x1] %v377_v35  ;;  %v323_v41 = vld [vmem:[#allocation2 + $0x84] sm:$0x1] }
  0x26   : > { %372 = vst [vmem:[#allocation2 + $0x68] sm:$0x1] %v371_v25  ;;  %328 = vst [vmem:[#allocation2 + $0x90] sm:$0x1] %v327_v40  ;;  %v382_v44 = vld [vmem:[#allocation2 + $0x98] sm:$0x1] }
  0x27   : > { %4234 = vmatpush3.bf16.msra.mxu1 %v4321_v28  ;;  %4266 = vmatpush3.bf16.msra.mxu0 %v4321_v28  ;;  %v383_v45 = vsel %vm4466_vm6, 0, %v382_v44  ;;  %v379_v46 = vld [vmem:[#allocation2 + $0x8c] sm:$0x1]  ;;  %v329_v51 = vld [vmem:[#allocation2 + $0x9c] sm:$0x1]  ;;  %v4031_v6 = vld [vmem:[#allocation2] sm:$0xff]  }
  0x28   : > { %4235 = vmatprep.subr.bf16.mxu1 %v4322_v34  ;;  %4267 = vmatprep.subr.bf16.mxu0 %v4322_v34  ;;  %384 = vst [vmem:[#allocation2 + $0x98] sm:$0x1] %v383_v45  ;;  %v380_v47 = vsel %vm4466_vm6, 0, %v379_v46  ;;  %v388_v54 = vld [vmem:[#allocation2 + $0xb0] sm:$0x1]  ;;  %v4032_v8 = vunpack.c.l.bf16 %v4031_v6  ;;  %v4033_v9 = vunpack.c.h.bf16 %v4031_v6 }
  0x29   : > { %381 = vst [vmem:[#allocation2 + $0x8c] sm:$0x1] %v380_v47  ;;  %v389_v55 = vsel %vm4466_vm6, 0, %v388_v54  ;;  %v385_v56 = vld [vmem:[#allocation2 + $0xa4] sm:$0x1] }
  0x2a   : > { %390 = vst [vmem:[#allocation2 + $0xb0] sm:$0x1] %v389_v55  ;;  %v386_v57 = vsel %vm4466_vm6, 0, %v385_v56  ;;  %v338_v61 = vld [vmem:[#allocation2 + $0xc0] sm:$0x1] }
  0x2b   : > { %4236 = vmatpush3.bf16.msra.mxu1 %v4322_v34  ;;  %4268 = vmatpush3.bf16.msra.mxu0 %v4322_v34  ;;  %387 = vst [vmem:[#allocation2 + $0xa4] sm:$0x1] %v386_v57  ;;  %v335_v62 = vld [vmem:[#allocation2 + $0xb4] sm:$0x1]  ;;  %v339_v63 = vsel %vm4402_vm3, 0, %v338_v61 }
  0x2c   : > { %4210 = vmatmul.mubr.msk.bf16.gmra.mrb[12].mxu0 %vm456_vm4, %v439_v30  ;;  %v321_v30 = vsel %vm4402_vm3, 0, %v320_v29  ;;  %4237 = vmatprep.subr.bf16.mxu1 %v4323_v38  ;;  %v336_v0 = vsel %vm4402_vm3, 0, %v335_v62  ;;  %v394_v1 = vld [vmem:[#allocation2 + $0xc8] sm:$0x1]  ;;  %340 = vst [vmem:[#allocation2 + $0xc0] sm:$0x1] %v339_v63 }
  0x2d   : > { %4213 = vmatprep.mubr.msk.bf16.mxu0 %vm456_vm4, %v440_v31  ;;  %v317_v31 = vld [vmem:[#allocation2 + $0x6c] sm:$0x1]  ;;  %322 = vst [vmem:[#allocation2 + $0x78] sm:$0x1] %v321_v30  ;;  %4269 = vmatprep.subr.bf16.mxu0 %v4323_v38  ;;  %337 = vst [vmem:[#allocation2 + $0xb4] sm:$0x1] %v336_v0 }
  0x2e   : > { %v318_v32 = vsel %vm4402_vm3, 0, %v317_v31  ;;  %v395_v2 = vsel %vm4466_vm6, 0, %v394_v1  ;;  %v1267_v5 = vld [vmem:[%s5771_s3] sm:$0x7]  ;;  %v1359_v7 = vld [vmem:[#allocation2 + $0x8] sm:$0x1] }
  0x2f   : > { %319 = vst [vmem:[#allocation2 + $0x6c] sm:$0x1] %v318_v32  ;;  %4238 = vmatpush3.bf16.msra.mxu1 %v4323_v38  ;;  %4270 = vmatpush3.bf16.msra.mxu0 %v4323_v38  ;;  %396 = vst [vmem:[#allocation2 + $0xc8] sm:$0x1] %v395_v2  ;;  %v4571_v10 = vrot.slane %v1267_v5, %v4564_v4  ;;  %v1367_v12 = vunpack.c.l.bf16 %v1359_v7  ;;  %v1500_v13 = vld [vmem:[#allocation2] sm:$0xe]  ;;  %v4578_v20 = vrot.slane %v1267_v5, %v1325_v14 }
  0x30   : > { %v1508_v17 = vunpack.c.l.bf16 %v1500_v13  ;;  %v4589_v32 = vld [vmem:[%s5770_s2] ss:$0 sm:$0xff]  ;;  %v1268_v47 = vld [vmem:[%s5771_s3 + $0x4] sm:$0x7]  ;;  %v1269_v54 = vld [vmem:[%s5771_s3 + $0x8] sm:$0x7] }
  0x31   : > { %v1379_v15 = vmul.f32 %v4032_v8, %v4571_v10  ;;  %v1380_v16 = vmul.f32 %v4033_v9, %v4571_v10  ;;  %v1381_v19 = vmul.f32 %v4571_v10, %v1367_v12  ;;  %v1327_v27 = vmul.f32 %v4032_v8, %v4578_v20  ;;  %v391_v1 = vld [vmem:[#allocation2 + $0xbc] sm:$0x1] }
  0x32   : > { %v1328_v28 = vmul.f32 %v4033_v9, %v4578_v20  ;;  %v4608_v56 = vrot.slane %v1268_v47, %v1325_v14  ;;  %v4611_v59 = vrot.slane %v1268_v47, %v4564_v4  ;;  %v4615_v63 = vrot.slane %v1269_v54, %v1325_v14 }
  0x33   : > { %v1428_v21 = vrot.slane %v1379_v15, 1  ;;  %v1429_v22 = vrot.slane %v1380_v16, 1  ;;  %v1431_v25 = vrot.slane %v1381_v19, 1  ;;  %v4618_v0 = vrot.slane %v1269_v54, %v4564_v4 }
  0x34   : > { %4214 = vmatmul.mubr.msk.bf16.gmra.mrb[16].mxu0 %vm456_vm4, %v441_v36  ;;  %v373_v36 = vld [vmem:[#allocation2 + $0x74] sm:$0x1]  ;;  %v4620_v7 = vrot.slane %v1269_v54, %v1518_v11  ;;  %v392_v8 = vsel %vm4466_vm6, 0, %v391_v1 }
  0x35   : > { %4217 = vmatprep.mubr.msk.bf16.mxu0 %vm456_vm4, %v442_v37  ;;  %v374_v37 = vsel %vm4466_vm6, 0, %v373_v36  ;;  %v1430_v29 = vsel %vm1427_vm7, %v1428_v21, %v1429_v22  ;;  %v1432_v33 = vsel %vm1427_vm7, %v1429_v22, %v1431_v25  ;;  %393 = vst [vmem:[#allocation2 + $0xbc] sm:$0x1] %v392_v8 }
  0x36   : > { %375 = vst [vmem:[#allocation2 + $0x74] sm:$0x1] %v374_v37  ;;  %v1484_v36 = vadd.f32 %v1430_v29, %v1327_v27  ;;  %v1485_v39 = vadd.f32 %v1432_v33, %v1328_v28  ;;  %v1162_v27 = vld [vmem:[#allocation2 + $0x18] sm:$0xf] }
  0x3c   : > { %4218 = vmatmul.mubr.msk.bf16.gmra.mrb[20].mxu0 %vm456_vm4, %v443_v42  ;;  %v4324_v42 = vld [vmem:[%s5773_s5 + $0x28] sm:$0xff]  }
  0x3d   : > { %4221 = vmatprep.mubr.msk.bf16.mxu0 %vm456_vm4, %v444_v43  ;;  %v324_v43 = vsel %vm4402_vm3, 0, %v323_v41  ;;  %4239 = vmatprep.subr.bf16.mxu1 %v4324_v42 }
  0x3e   : > { %325 = vst [vmem:[#allocation2 + $0x84] sm:$0x1] %v324_v43  ;;  %4271 = vmatprep.subr.bf16.mxu0 %v4324_v42  ;;  %4240 = vmatpush3.bf16.msra.mxu1 %v4324_v42 }
  0x3f   : > { %4272 = vmatpush3.bf16.msra.mxu0 %v4324_v42 }
  0x44   : > { %4222 = vmatmul.mubr.msk.bf16.gmra.mrb[24].mxu0 %vm456_vm4, %v445_v48  ;;  %v4325_v48 = vld [vmem:[%s5773_s5 + $0x30] sm:$0xff]  }
  0x45   : > { %4225 = vmatprep.mubr.msk.bf16.mxu0 %vm456_vm4, %v446_v49  ;;  %4241 = vmatprep.subr.bf16.mxu1 %v4325_v48  ;;  %v332_v49 = vld [vmem:[#allocation2 + $0xa8] sm:$0x1] }
  0x46   : > { %4273 = vmatprep.subr.bf16.mxu0 %v4325_v48  ;;  %4242 = vmatpush3.bf16.msra.mxu1 %v4325_v48  ;;  %v333_v50 = vsel %vm4402_vm3, 0, %v332_v49 }
  0x47   : > { %4274 = vmatpush3.bf16.msra.mxu0 %v4325_v48  ;;  %334 = vst [vmem:[#allocation2 + $0xa8] sm:$0x1] %v333_v50  ;;  %4243 = vmatprep.subr.bf16.mxu1 %v4326_v60 }
  0x48   : > { %4275 = vmatprep.subr.bf16.mxu0 %v4326_v60 }
  0x4a   : > { %4244 = vmatpush3.bf16.msra.mxu1 %v4326_v60 }
  0x4b   : > { %4276 = vmatpush3.bf16.msra.mxu0 %v4326_v60  ;;  %4293 = vmatprep.subr.bf16.mxu1 %v4499_v18  ;;  %v4575_v18 = vrot.slane %v1267_v5, %v1518_v11  ;;  %v4613_v60 = vrot.slane %v1268_v47, %v1518_v11  ;;  %v1159_v47 = vld [vmem:[#allocation2 + $0x14] sm:$0x1] }
  0x4c   : > { %4226 = vmatmul.mubr.msk.bf16.gmra.mrb[28].mxu0 %vm456_vm4, %v447_v52  ;;  %v330_v52 = vsel %vm4402_vm3, 0, %v329_v51 }
  0x4d   : > { %331 = vst [vmem:[#allocation2 + $0x9c] sm:$0x1] %v330_v52  ;;  %v1520_v23 = vmul.f32 %v4575_v18, %v1508_v17  ;;  %v1521_v24 = vmul.f32 %v4033_v9, %v4575_v18  ;;  %v1522_v26 = vmul.f32 %v4575_v18, %v1367_v12 }
  0x4f   : > { %v1569_v30 = vrot.slane %v1520_v23, 2  ;;  %v1570_v31 = vrot.slane %v1521_v24, 2  ;;  %v1572_v34 = vrot.slane %v1522_v26, 2 }
  0x51   : > { %v1571_v40 = vsel %vm1568_vm8, %v1569_v30, %v1570_v31  ;;  %v1573_v43 = vsel %vm1568_vm8, %v1570_v31, %v1572_v34 }
  0x52   : > { %v4601_v50 = vadd.f32 %v1571_v40, %v1484_v36  ;;  %v4606_v55 = vadd.f32 %v1573_v43, %v1485_v39 }
  0xe7   : > { %v4199_v35 = vpop.f32.mrb[0].mxu0 }
  0xe8   : > { %v552_v37 = vadd.f32 %v4199_v35, %v4589_v32  ;;  %v543_v38 = vpop.f32.mrb[1].mxu0  ;;  %v1155_v35 = vld [vmem:[#allocation2 + $0xc] sm:$0xf] }
  0xe9   : > { %v544_v41 = vadd.f32 %v4589_v32, %v543_v38  ;;  %v4200_v42 = vpop.f32.mrb[2].mxu0 }
  0xea   : > { %v672_v44 = vmax.f32 %v552_v37, 0.0  ;;  %v555_v45 = vadd.f32 %v4200_v42, %v4589_v32  ;;  %v546_v46 = vpop.f32.mrb[3].mxu0 }
  0xeb   : > { %v670_v48 = vmax.f32 %v544_v41, 0.0  ;;  %v547_v49 = vadd.f32 %v4589_v32, %v546_v46  ;;  %v1166_v41 = vld [vmem:[#allocation2 + $0x20] sm:$0x1] }
  0xec   : > { %v704_v51 = vmin.f32 %v672_v44, 6.0  ;;  %v673_v52 = vmax.f32 %v555_v45, 0.0 }
  0xed   : > { %v702_v57 = vmin.f32 %v670_v48, 6.0  ;;  %v671_v58 = vmax.f32 %v547_v49, 0.0 }
  0xee   : > { %v4000_v61 = vpack.c.bf16 %v704_v51, %v704_v51  ;;  %v705_v62 = vmin.f32 %v673_v52, 6.0 }
  0xef   : > { %v3998_v2 = vpack.c.bf16 %v702_v57, %v702_v57  ;;  %v703_v5 = vmin.f32 %v671_v58, 6.0  ;;  %v4203_v6 = vpop.f32.mrb[4].mxu0 }
  0xf0   : > { %v850_v9 = vshrl.u32 %v4000_v61, 16  ;;  %v853_v12 = vshll.u32 %v4000_v61, 16  ;;  %v4001_v13 = vpack.c.bf16 %v705_v62, %v705_v62  ;;  %v568_v15 = vadd.f32 %v4203_v6, %v4589_v32  ;;  %v559_v16 = vpop.f32.mrb[5].mxu0 }
  0xf1   : > { %v833_v14 = vshrl.u32 %v3998_v2, 16  ;;  %v836_v17 = vshll.u32 %v3998_v2, 16  ;;  %v3999_v4 = vpack.c.bf16 %v703_v5, %v703_v5  ;;  %v560_v19 = vadd.f32 %v4589_v32, %v559_v16  ;;  %v4204_v21 = vpop.f32.mrb[6].mxu0 }
  0xf2   : > { %v852_v22 = vrot.slane %v850_v9, 7  ;;  %v858_v23 = vshrl.u32 %v4001_v13, 16  ;;  %v861_v11 = vshll.u32 %v4001_v13, 16  ;;  %v676_v24 = vmax.f32 %v568_v15, 0.0  ;;  %v562_v25 = vpop.f32.mrb[7].mxu0 }
  0xf3   : > { %v835_v28 = vrot.slane %v833_v14, 7  ;;  %v841_v29 = vshrl.u32 %v3999_v4, 16  ;;  %v844_v30 = vshll.u32 %v3999_v4, 16  ;;  %v674_v31 = vmax.f32 %v560_v19, 0.0  ;;  %v1176_v4 = vld [vmem:[#allocation2 + $0x30] sm:$0xf] }
  0xf4   : > { %v855_v33 = vor.u32 %v853_v12, %v852_v22  ;;  %v856_v34 = vrot.slane %v852_v22, 4  ;;  %v860_v36 = vrot.slane %v858_v23, 7  ;;  %v708_v37 = vmin.f32 %v676_v24, 6.0 }
  0xf5   : > { %v838_v38 = vor.u32 %v836_v17, %v835_v28  ;;  %v839_v39 = vrot.slane %v835_v28, 4  ;;  %v843_v42 = vrot.slane %v841_v29, 7  ;;  %v706_v43 = vmin.f32 %v674_v31, 6.0  ;;  %v1169_v28 = vld [vmem:[#allocation2 + $0x24] sm:$0xf] }
  0xf6   : > { %v1163_v44 = vsel %vm4628_vm11, %v855_v33, %v1162_v27  ;;  %v863_v45 = vor.u32 %v861_v11, %v860_v36  ;;  %v865_v46 = vrot.slane %v860_v36, 4  ;;  %v4004_v48 = vpack.c.bf16 %v708_v37, %v708_v37 }
  0xf7   : > { %1164 = vst [vmem:[#allocation2 + $0x18] sm:$0xf] %v1163_v44  ;;  %v1156_v49 = vsel %vm4628_vm11, %v838_v38, %v1155_v35  ;;  %v846_v51 = vor.u32 %v844_v30, %v843_v42  ;;  %v848_v52 = vrot.slane %v843_v42, 4  ;;  %v4002_v54 = vpack.c.bf16 %v706_v43, %v706_v43  ;;  %v4207_v57 = vpop.f32.mrb[8].mxu0 }
  0xf8   : > { %1157 = vst [vmem:[#allocation2 + $0xc] sm:$0xf] %v1156_v49  ;;  %v864_v58 = vsel %vm4634_vm12, %v856_v34, %v863_v45  ;;  %v1167_v61 = vsel %vm4402_vm3, %v865_v46, %v1166_v41  ;;  %v884_v62 = vshrl.u32 %v4004_v48, 16  ;;  %v887_v1 = vshll.u32 %v4004_v48, 16  ;;  %v575_v2 = vpop.f32.mrb[9].mxu0 }
  0xf9   : > { %1165 = vst [vmem:[#allocation2 + $0x1c] sm:$0xf] %v864_v58  ;;  %1168 = vst [vmem:[#allocation2 + $0x20] sm:$0x1] %v1167_v61  ;;  %v847_v5 = vsel %vm4634_vm12, %v839_v39, %v846_v51  ;;  %v1160_v6 = vsel %vm4402_vm3, %v848_v52, %v1159_v47  ;;  %v867_v8 = vshrl.u32 %v4002_v54, 16  ;;  %v870_v9 = vshll.u32 %v4002_v54, 16 }
  0xfa   : > { %v4208_v12 = vpop.f32.mrb[10].mxu0  ;;  %1158 = vst [vmem:[#allocation2 + $0x10] sm:$0xf] %v847_v5  ;;  %1161 = vst [vmem:[#allocation2 + $0x14] sm:$0x1] %v1160_v6  ;;  %v4650_v13 = vrot.slane %v884_v62, 7  ;;  %v571_v15 = vadd.f32 %v4204_v21, %v4589_v32  ;;  %v563_v16 = vadd.f32 %v4589_v32, %v562_v25  ;;  %v584_v14 = vadd.f32 %v4207_v57, %v4589_v32 }
  0xfb   : > { %v578_v17 = vpop.f32.mrb[11].mxu0  ;;  %v4655_v19 = vrot.slane %v867_v8, 7  ;;  %v576_v22 = vadd.f32 %v4589_v32, %v575_v2  ;;  %v587_v23 = vadd.f32 %v4208_v12, %v4589_v32 }
  0xfc   : > { %v579_v11 = vadd.f32 %v4589_v32, %v578_v17  ;;  %v889_v24 = vor.u32 %v887_v1, %v4650_v13  ;;  %v890_v27 = vrot.slane %v4650_v13, 4  ;;  %v677_v21 = vmax.f32 %v571_v15, 0.0  ;;  %v1180_v13 = vld [vmem:[#allocation2 + $0x38] sm:$0x1]  ;;  %v1173_v17 = vld [vmem:[#allocation2 + $0x2c] sm:$0x1] }
  0xfd   : > { %v675_v29 = vmax.f32 %v563_v16, 0.0  ;;  %v872_v25 = vor.u32 %v870_v9, %v4655_v19  ;;  %v873_v30 = vrot.slane %v4655_v19, 4  ;;  %v680_v31 = vmax.f32 %v584_v14, 0.0 }
  0xfe   : > { %v678_v33 = vmax.f32 %v576_v22, 0.0  ;;  %v1177_v34 = vsel %vm4628_vm11, %v889_v24, %v1176_v4  ;;  %v709_v35 = vmin.f32 %v677_v21, 6.0  ;;  %v681_v37 = vmax.f32 %v587_v23, 0.0 }
  0xff   : > { %v707_v36 = vmin.f32 %v675_v29, 6.0  ;;  %1178 = vst [vmem:[#allocation2 + $0x30] sm:$0xf] %v1177_v34  ;;  %v1170_v38 = vsel %vm4628_vm11, %v872_v25, %v1169_v28  ;;  %v712_v39 = vmin.f32 %v680_v31, 6.0  ;;  %v679_v42 = vmax.f32 %v579_v11, 0.0  ;;  %v4211_v43 = vpop.f32.mrb[12].mxu0 }
 0x100   : > { %v710_v41 = vmin.f32 %v678_v33, 6.0  ;;  %1171 = vst [vmem:[#allocation2 + $0x24] sm:$0xf] %v1170_v38  ;;  %v4005_v44 = vpack.c.bf16 %v709_v35, %v709_v35  ;;  %v713_v46 = vmin.f32 %v681_v37, 6.0  ;;  %v600_v47 = vadd.f32 %v4211_v43, %v4589_v32  ;;  %v591_v48 = vpop.f32.mrb[13].mxu0 }
 0x101   : > { %v4003_v45 = vpack.c.bf16 %v707_v36, %v707_v36  ;;  %v4008_v49 = vpack.c.bf16 %v712_v39, %v712_v39  ;;  %v711_v52 = vmin.f32 %v679_v42, 6.0  ;;  %v592_v54 = vadd.f32 %v4589_v32, %v591_v48  ;;  %v4212_v57 = vpop.f32.mrb[14].mxu0  ;;  %v1190_v29 = vld [vmem:[#allocation2 + $0x48] sm:$0xf]  ;;  %v1183_v25 = vld [vmem:[#allocation2 + $0x3c] sm:$0xf] }
 0x102   : > { %v4006_v51 = vpack.c.bf16 %v710_v41, %v710_v41  ;;  %v892_v58 = vshrl.u32 %v4005_v44, 16  ;;  %v895_v61 = vshll.u32 %v4005_v44, 16  ;;  %v594_v2 = vpop.f32.mrb[15].mxu0  ;;  %v4009_v16 = vpack.c.bf16 %v713_v46, %v713_v46 }
 0x103   : > { %v875_v62 = vshrl.u32 %v4003_v45, 16  ;;  %v878_v1 = vshll.u32 %v4003_v45, 16  ;;  %v918_v5 = vshrl.u32 %v4008_v49, 16  ;;  %v921_v6 = vshll.u32 %v4008_v49, 16 }
 0x104   : > { %v901_v8 = vshrl.u32 %v4006_v51, 16  ;;  %v904_v9 = vshll.u32 %v4006_v51, 16  ;;  %v894_v12 = vrot.slane %v892_v58, 7  ;;  %v4007_v14 = vpack.c.bf16 %v711_v52, %v711_v52 }
 0x105   : > { %v877_v15 = vrot.slane %v875_v62, 7  ;;  %v920_v4 = vrot.slane %v918_v5, 7  ;;  %v684_v22 = vmax.f32 %v600_v47, 0.0  ;;  %v682_v23 = vmax.f32 %v592_v54, 0.0  ;;  %v1194_v62 = vld [vmem:[#allocation2 + $0x50] sm:$0x1] }
 0x106   : > { %v903_v19 = vrot.slane %v901_v8, 7  ;;  %v897_v11 = vor.u32 %v895_v61, %v894_v12  ;;  %v899_v24 = vrot.slane %v894_v12, 4  ;;  %v926_v44 = vshrl.u32 %v4009_v16, 16 }
 0x107   : > { %v880_v28 = vor.u32 %v878_v1, %v877_v15  ;;  %v882_v21 = vrot.slane %v877_v15, 4  ;;  %v923_v31 = vor.u32 %v921_v6, %v920_v4  ;;  %v924_v33 = vrot.slane %v920_v4, 4  ;;  %v4215_v36 = vpop.f32.mrb[16].mxu0 }
 0x108   : > { %v906_v34 = vor.u32 %v904_v9, %v903_v19  ;;  %v907_v35 = vrot.slane %v903_v19, 4  ;;  %v898_v37 = vsel %vm4634_vm12, %v890_v27, %v897_v11  ;;  %v1181_v38 = vsel %vm4402_vm3, %v899_v24, %v1180_v13  ;;  %v607_v42 = vpop.f32.mrb[17].mxu0  ;;  %v1187_v13 = vld [vmem:[#allocation2 + $0x44] sm:$0x1] }
 0x109   : > { %v881_v39 = vsel %vm4634_vm12, %v873_v30, %v880_v28  ;;  %v1174_v41 = vsel %vm4402_vm3, %v882_v21, %v1173_v17  ;;  %1179 = vst [vmem:[#allocation2 + $0x34] sm:$0xf] %v898_v37  ;;  %1182 = vst [vmem:[#allocation2 + $0x38] sm:$0x1] %v1181_v38  ;;  %v1191_v43 = vsel %vm4628_vm11, %v923_v31, %v1190_v29  ;;  %v929_v45 = vshll.u32 %v4009_v16, 16  ;;  %v4216_v46 = vpop.f32.mrb[18].mxu0 }
 0x10a   : > { %1172 = vst [vmem:[#allocation2 + $0x28] sm:$0xf] %v881_v39  ;;  %1175 = vst [vmem:[#allocation2 + $0x2c] sm:$0x1] %v1174_v41  ;;  %v1184_v27 = vsel %vm4628_vm11, %v906_v34, %v1183_v25  ;;  %v909_v30 = vshrl.u32 %v4007_v14, 16  ;;  %v912_v47 = vshll.u32 %v4007_v14, 16  ;;  %v603_v54 = vadd.f32 %v4212_v57, %v4589_v32 }
 0x10b   : > { %1192 = vst [vmem:[#allocation2 + $0x48] sm:$0xf] %v1191_v43  ;;  %1185 = vst [vmem:[#allocation2 + $0x3c] sm:$0xf] %v1184_v27  ;;  %v716_v48 = vmin.f32 %v684_v22, 6.0  ;;  %v714_v49 = vmin.f32 %v682_v23, 6.0  ;;  %v595_v58 = vadd.f32 %v4589_v32, %v594_v2  ;;  %v616_v61 = vadd.f32 %v4215_v36, %v4589_v32 }
 0x10c   : > { %v610_v51 = vpop.f32.mrb[19].mxu0  ;;  %v928_v52 = vrot.slane %v926_v44, 7  ;;  %v911_v1 = vrot.slane %v909_v30, 7  ;;  %v608_v8 = vadd.f32 %v4589_v32, %v607_v42  ;;  %v685_v15 = vmax.f32 %v603_v54, 0.0  ;;  %v1204_v29 = vld [vmem:[#allocation2 + $0x60] sm:$0xf] }
 0x10d   : > { %v4012_v5 = vpack.c.bf16 %v716_v48, %v716_v48  ;;  %v4010_v6 = vpack.c.bf16 %v714_v49, %v714_v49  ;;  %v683_v16 = vmax.f32 %v595_v58, 0.0  ;;  %v688_v36 = vmax.f32 %v616_v61, 0.0  ;;  %v1197_v42 = vld [vmem:[#allocation2 + $0x54] sm:$0xf] }
 0x10e   : > { %v931_v9 = vor.u32 %v929_v45, %v928_v52  ;;  %v933_v12 = vrot.slane %v928_v52, 4  ;;  %v914_v14 = vor.u32 %v912_v47, %v911_v1  ;;  %v916_v17 = vrot.slane %v911_v1, 4 }
 0x10f   : > { %v952_v4 = vshrl.u32 %v4012_v5, 16  ;;  %v955_v19 = vshll.u32 %v4012_v5, 16  ;;  %v935_v22 = vshrl.u32 %v4010_v6, 16  ;;  %v938_v23 = vshll.u32 %v4010_v6, 16  ;;  %v4219_v11 = vpop.f32.mrb[20].mxu0 }
 0x110   : > { %v932_v57 = vsel %vm4634_vm12, %v924_v33, %v931_v9  ;;  %v1195_v2 = vsel %vm4402_vm3, %v933_v12, %v1194_v62  ;;  %v915_v24 = vsel %vm4634_vm12, %v907_v35, %v914_v14  ;;  %v1188_v28 = vsel %vm4402_vm3, %v916_v17, %v1187_v13  ;;  %v4694_v31 = vpop.f32.mrb[21].mxu0  ;;  %v1208_v9 = vld [vmem:[#allocation2 + $0x68] sm:$0x1] }
 0x111   : > { %1193 = vst [vmem:[#allocation2 + $0x4c] sm:$0xf] %v932_v57  ;;  %1196 = vst [vmem:[#allocation2 + $0x50] sm:$0x1] %v1195_v2  ;;  %v954_v21 = vrot.slane %v952_v4, 7  ;;  %v717_v25 = vmin.f32 %v685_v15, 6.0  ;;  %v619_v43 = vadd.f32 %v4216_v46, %v4589_v32 }
 0x112   : > { %1186 = vst [vmem:[#allocation2 + $0x40] sm:$0xf] %v915_v24  ;;  %1189 = vst [vmem:[#allocation2 + $0x44] sm:$0x1] %v1188_v28  ;;  %v937_v33 = vrot.slane %v935_v22, 7  ;;  %v715_v34 = vmin.f32 %v683_v16, 6.0  ;;  %v632_v16 = vadd.f32 %v4219_v11, %v4589_v32 }
 0x113   : > { %v686_v37 = vmax.f32 %v608_v8, 0.0  ;;  %v4696_v38 = vpop.f32.mrb[22].mxu0  ;;  %v957_v39 = vor.u32 %v955_v19, %v954_v21  ;;  %v958_v41 = vrot.slane %v954_v21, 4  ;;  %v4013_v35 = vpack.c.bf16 %v717_v25, %v717_v25  ;;  %v1201_v19 = vld [vmem:[#allocation2 + $0x5c] sm:$0x1] }
 0x114   : > { %v4699_v27 = vpop.f32.mrb[23].mxu0  ;;  %v940_v44 = vor.u32 %v938_v23, %v937_v33  ;;  %v941_v45 = vrot.slane %v937_v33, 4  ;;  %v4011_v30 = vpack.c.bf16 %v715_v34, %v715_v34  ;;  %v720_v47 = vmin.f32 %v688_v36, 6.0  ;;  %v1218_v25 = vld [vmem:[#allocation2 + $0x78] sm:$0xf] }
 0x115   : > { %v1205_v48 = vsel %vm4628_vm11, %v957_v39, %v1204_v29  ;;  %v960_v49 = vshrl.u32 %v4013_v35, 16  ;;  %v963_v52 = vshll.u32 %v4013_v35, 16  ;;  %v718_v54 = vmin.f32 %v686_v37, 6.0 }
 0x116   : > { %1206 = vst [vmem:[#allocation2 + $0x60] sm:$0xf] %v1205_v48  ;;  %v1198_v58 = vsel %vm4628_vm11, %v940_v44, %v1197_v42  ;;  %v943_v61 = vshrl.u32 %v4011_v30, 16  ;;  %v946_v62 = vshll.u32 %v4011_v30, 16  ;;  %v4016_v1 = vpack.c.bf16 %v720_v47, %v720_v47 }
 0x117   : > { %1199 = vst [vmem:[#allocation2 + $0x54] sm:$0xf] %v1198_v58  ;;  %v962_v46 = vrot.slane %v960_v49, 7  ;;  %v4014_v5 = vpack.c.bf16 %v718_v54, %v718_v54  ;;  %v689_v6 = vmax.f32 %v619_v43, 0.0  ;;  %v611_v8 = vadd.f32 %v4589_v32, %v610_v51  ;;  %v4223_v14 = vpop.f32.mrb[24].mxu0 }
 0x118   : > { %v945_v12 = vrot.slane %v943_v61, 7  ;;  %v986_v13 = vshrl.u32 %v4016_v1, 16  ;;  %v989_v15 = vshll.u32 %v4016_v1, 16  ;;  %v4707_v22 = vpop.f32.mrb[25].mxu0  ;;  %v692_v49 = vmax.f32 %v632_v16, 0.0 }
 0x119   : > { %v965_v17 = vor.u32 %v963_v52, %v962_v46  ;;  %v967_v4 = vrot.slane %v962_v46, 4  ;;  %v969_v57 = vshrl.u32 %v4014_v5, 16  ;;  %v972_v2 = vshll.u32 %v4014_v5, 16  ;;  %v4709_v29 = vpop.f32.mrb[26].mxu0 }
 0x11a   : > { %v948_v23 = vor.u32 %v946_v62, %v945_v12  ;;  %v950_v24 = vrot.slane %v945_v12, 4  ;;  %v988_v28 = vrot.slane %v986_v13, 7  ;;  %v721_v21 = vmin.f32 %v689_v6, 6.0  ;;  %v4717_v36 = vpop.f32.mrb[27].mxu0 }
 0x11b   : > { %v966_v51 = vsel %vm4634_vm12, %v958_v41, %v965_v17  ;;  %v1209_v11 = vsel %vm4402_vm3, %v967_v4, %v1208_v9  ;;  %v4715_v33 = vrot.slane %v969_v57, 7  ;;  %v687_v34 = vmax.f32 %v611_v8, 0.0  ;;  %v1211_v41 = vld [vmem:[#allocation2 + $0x6c] sm:$0xf] }
 0x11c   : > { %1207 = vst [vmem:[#allocation2 + $0x64] sm:$0xf] %v966_v51  ;;  %1210 = vst [vmem:[#allocation2 + $0x68] sm:$0x1] %v1209_v11  ;;  %v949_v37 = vsel %vm4634_vm12, %v941_v45, %v948_v23  ;;  %v1202_v39 = vsel %vm4402_vm3, %v950_v24, %v1201_v19  ;;  %v991_v42 = vor.u32 %v989_v15, %v988_v28  ;;  %v992_v35 = vrot.slane %v988_v28, 4 }
 0x11d   : > { %1200 = vst [vmem:[#allocation2 + $0x58] sm:$0xf] %v949_v37  ;;  %1203 = vst [vmem:[#allocation2 + $0x5c] sm:$0x1] %v1202_v39  ;;  %v974_v43 = vor.u32 %v972_v2, %v4715_v33  ;;  %v975_v44 = vrot.slane %v4715_v33, 4  ;;  %v4017_v30 = vpack.c.bf16 %v721_v21, %v721_v21  ;;  %v719_v47 = vmin.f32 %v687_v34, 6.0 }
 0x11e   : > { %v1219_v48 = vsel %vm4628_vm11, %v991_v42, %v1218_v25  ;;  %v624_v45 = vadd.f32 %v4589_v32, %v4694_v31  ;;  %v635_v52 = vadd.f32 %v4696_v38, %v4589_v32  ;;  %v724_v1 = vmin.f32 %v692_v49, 6.0  ;;  %v1222_v15 = vld [vmem:[#allocation2 + $0x80] sm:$0x1]  ;;  %v1215_v21 = vld [vmem:[#allocation2 + $0x74] sm:$0x1] }
 0x11f   : > { %1220 = vst [vmem:[#allocation2 + $0x78] sm:$0xf] %v1219_v48  ;;  %v1212_v54 = vsel %vm4628_vm11, %v974_v43, %v1211_v41  ;;  %v994_v58 = vshrl.u32 %v4017_v30, 16  ;;  %v997_v61 = vshll.u32 %v4017_v30, 16  ;;  %v4015_v62 = vpack.c.bf16 %v719_v47, %v719_v47  ;;  %v4735_v8 = vpop.f32.mrb[28].mxu0 }
 0x120   : > { %1213 = vst [vmem:[#allocation2 + $0x6c] sm:$0xf] %v1212_v54  ;;  %v690_v46 = vmax.f32 %v624_v45, 0.0  ;;  %v693_v5 = vmax.f32 %v635_v52, 0.0  ;;  %v627_v6 = vadd.f32 %v4589_v32, %v4699_v27  ;;  %v648_v38 = vadd.f32 %v4223_v14, %v4589_v32  ;;  %v4738_v13 = vpop.f32.mrb[29].mxu0 }
 0x121   : > { %v996_v31 = vrot.slane %v994_v58, 7  ;;  %v977_v9 = vshrl.u32 %v4015_v62, 16  ;;  %v980_v12 = vshll.u32 %v4015_v62, 16  ;;  %v4020_v16 = vpack.c.bf16 %v724_v1, %v724_v1  ;;  %v4740_v57 = vpop.f32.mrb[30].mxu0  ;;  %v1232_v49 = vld [vmem:[#allocation2 + $0x90] sm:$0xf] }
 0x122   : > { %v722_v17 = vmin.f32 %v690_v46, 6.0  ;;  %v725_v4 = vmin.f32 %v693_v5, 6.0  ;;  %v691_v19 = vmax.f32 %v627_v6, 0.0  ;;  %v696_v27 = vmax.f32 %v648_v38, 0.0  ;;  %v4742_v28 = vpop.f32.mrb[31].mxu0 }
 0x123   : > { %v999_v2 = vor.u32 %v997_v61, %v996_v31  ;;  %v1001_v23 = vrot.slane %v996_v31, 4  ;;  %v979_v24 = vrot.slane %v977_v9, 7  ;;  %v1020_v51 = vshrl.u32 %v4020_v16, 16  ;;  %v1225_v62 = vld [vmem:[#allocation2 + $0x84] sm:$0xf] }
 0x124   : > { %v1023_v11 = vshll.u32 %v4020_v16, 16  ;;  %v4018_v25 = vpack.c.bf16 %v722_v17, %v722_v17  ;;  %v4021_v14 = vpack.c.bf16 %v725_v4, %v725_v4  ;;  %v728_v46 = vmin.f32 %v696_v27, 6.0  ;;  %v1236_v38 = vld [vmem:[#allocation2 + $0x98] sm:$0x1] }
 0x125   : > { %v1000_v33 = vsel %vm4634_vm12, %v992_v35, %v999_v2  ;;  %v1223_v34 = vsel %vm4402_vm3, %v1001_v23, %v1222_v15  ;;  %v982_v37 = vor.u32 %v980_v12, %v979_v24  ;;  %v984_v39 = vrot.slane %v979_v24, 4 }
 0x126   : > { %1221 = vst [vmem:[#allocation2 + $0x7c] sm:$0xf] %v1000_v33  ;;  %1224 = vst [vmem:[#allocation2 + $0x80] sm:$0x1] %v1223_v34  ;;  %v1022_v42 = vrot.slane %v1020_v51, 7  ;;  %v1003_v41 = vshrl.u32 %v4018_v25, 16  ;;  %v640_v5 = vadd.f32 %v4589_v32, %v4707_v22  ;;  %v4024_v4 = vpack.c.bf16 %v728_v46, %v728_v46 }
 0x127   : > { %v1006_v43 = vshll.u32 %v4018_v25, 16  ;;  %v1028_v30 = vshrl.u32 %v4021_v14, 16  ;;  %v983_v47 = vsel %vm4634_vm12, %v975_v44, %v982_v37  ;;  %v1216_v48 = vsel %vm4402_vm3, %v984_v39, %v1215_v21  ;;  %v1853_v46 = vld [vmem:[#allocation2 + $0xc] sm:$0xe] }
 0x128   : > { %v1031_v45 = vshll.u32 %v4021_v14, 16  ;;  %v723_v35 = vmin.f32 %v691_v19, 6.0  ;;  %1214 = vst [vmem:[#allocation2 + $0x70] sm:$0xf] %v983_v47  ;;  %1217 = vst [vmem:[#allocation2 + $0x74] sm:$0x1] %v1216_v48  ;;  %v1025_v52 = vor.u32 %v1023_v11, %v1022_v42  ;;  %v651_v44 = vadd.f32 %v4709_v29, %v4589_v32 }
 0x129   : > { %v1026_v54 = vrot.slane %v1022_v42, 4  ;;  %v1005_v58 = vrot.slane %v1003_v41, 7  ;;  %v1030_v61 = vrot.slane %v1028_v30, 7  ;;  %v1645_v19 = vld [vmem:[#allocation2 + $0xc] sm:$0xff]   ;;  %v694_v29 = vmax.f32 %v640_v5, 0.0 }
 0x12a   : > { %v4019_v1 = vpack.c.bf16 %v723_v35, %v723_v35  ;;  %v1233_v6 = vsel %vm4628_vm11, %v1025_v52, %v1232_v49  ;;  %v697_v23 = vmax.f32 %v651_v44, 0.0  ;;  %v1054_v21 = vshrl.u32 %v4024_v4, 16  ;;  %v1229_v11 = vld [vmem:[#allocation2 + $0x8c] sm:$0x1] }
 0x12b   : > { %v1008_v31 = vor.u32 %v1006_v43, %v1005_v58  ;;  %v1009_v9 = vrot.slane %v1005_v58, 4  ;;  %v1033_v12 = vor.u32 %v1031_v45, %v1030_v61  ;;  %1234 = vst [vmem:[#allocation2 + $0x90] sm:$0xf] %v1233_v6  ;;  %v1035_v15 = vrot.slane %v1030_v61, 4  ;;  %v1246_v43 = vld [vmem:[#allocation2 + $0xa8] sm:$0xf] }
 0x12c   : > { %v1011_v16 = vshrl.u32 %v4019_v1, 16  ;;  %v1014_v17 = vshll.u32 %v4019_v1, 16  ;;  %v1057_v51 = vshll.u32 %v4024_v4, 16  ;;  %v726_v25 = vmin.f32 %v694_v29, 6.0 }
 0x12d   : > { %v1226_v2 = vsel %vm4628_vm11, %v1008_v31, %v1225_v62  ;;  %v1034_v22 = vsel %vm4634_vm12, %v1026_v54, %v1033_v12  ;;  %v1237_v24 = vsel %vm4402_vm3, %v1035_v15, %v1236_v38  ;;  %v729_v14 = vmin.f32 %v697_v23, 6.0 }
 0x12e   : > { %1227 = vst [vmem:[#allocation2 + $0x84] sm:$0xf] %v1226_v2  ;;  %1235 = vst [vmem:[#allocation2 + $0x94] sm:$0xf] %v1034_v22  ;;  %v1013_v27 = vrot.slane %v1011_v16, 7  ;;  %v643_v33 = vadd.f32 %v4589_v32, %v4717_v36  ;;  %v1661_v34 = vunpack.c.l.bf16 %v1645_v19  ;;  %v1056_v42 = vrot.slane %v1054_v21, 7 }
 0x12f   : > { %1238 = vst [vmem:[#allocation2 + $0x98] sm:$0x1] %v1237_v24  ;;  %v1662_v41 = vunpack.c.h.bf16 %v1645_v19  ;;  %v4022_v30 = vpack.c.bf16 %v726_v25, %v726_v25  ;;  %v4025_v47 = vpack.c.bf16 %v729_v14, %v729_v14  ;;  %v1713_v36 = vld [vmem:[#allocation2 + $0x14] sm:$0x1]  ;;  %v1239_v16 = vld [vmem:[#allocation2 + $0x9c] sm:$0xf]  ;;  %v1861_v22 = vunpack.c.l.bf16 %v1853_v46 }
 0x130   : > { %v1016_v37 = vor.u32 %v1014_v17, %v1013_v27  ;;  %v1018_v39 = vrot.slane %v1013_v27, 4  ;;  %v695_v48 = vmax.f32 %v643_v33, 0.0  ;;  %v1681_v49 = vmul.f32 %v4608_v56, %v1661_v34  ;;  %v1250_v17 = vld [vmem:[#allocation2 + $0xb0] sm:$0x1]  ;;  %v4063_v25 = vld [vmem:[#allocation2 + $0x18] sm:$0xff]  }
 0x131   : > { %v1059_v52 = vor.u32 %v1057_v51, %v1056_v42  ;;  %v1060_v54 = vrot.slane %v1056_v42, 4  ;;  %v1037_v58 = vshrl.u32 %v4022_v30, 16  ;;  %v1040_v61 = vshll.u32 %v4022_v30, 16  ;;  %v1243_v30 = vld [vmem:[#allocation2 + $0xa4] sm:$0x1] }
 0x132   : > { %v1017_v45 = vsel %vm4634_vm12, %v1009_v9, %v1016_v37  ;;  %v1230_v35 = vsel %vm4402_vm3, %v1018_v39, %v1229_v11  ;;  %v1062_v62 = vshrl.u32 %v4025_v47, 16  ;;  %v1065_v1 = vshll.u32 %v4025_v47, 16 }
 0x133   : > { %1228 = vst [vmem:[#allocation2 + $0x88] sm:$0xf] %v1017_v45  ;;  %1231 = vst [vmem:[#allocation2 + $0x8c] sm:$0x1] %v1230_v35  ;;  %v1247_v5 = vsel %vm4628_vm11, %v1059_v52, %v1246_v43  ;;  %v727_v44 = vmin.f32 %v695_v48, 6.0  ;;  %v1682_v6 = vmul.f32 %v4608_v56, %v1662_v41  ;;  %v1697_v31 = vadd.f32 %v1681_v49, %v4601_v50 }
 0x134   : > { %1248 = vst [vmem:[#allocation2 + $0xa8] sm:$0xf] %v1247_v5  ;;  %v1039_v9 = vrot.slane %v1037_v58, 7  ;;  %v1064_v12 = vrot.slane %v1062_v62, 7  ;;  %v1721_v38 = vunpack.c.l.bf16 %v1713_v36  ;;  %v1733_v15 = vmul.f32 %v4611_v59, %v1661_v34  ;;  %v2065_v58 = vld [vmem:[#allocation2 + $0x20] sm:$0x1] }
 0x135   : > { %v4023_v4 = vpack.c.bf16 %v727_v44, %v727_v44  ;;  %v1698_v19 = vadd.f32 %v1682_v6, %v4606_v55  ;;  %v1734_v2 = vmul.f32 %v4611_v59, %v1662_v41  ;;  %v1873_v42 = vmul.f32 %v4613_v60, %v1861_v22 }
 0x136   : > { %v1042_v29 = vor.u32 %v1040_v61, %v1039_v9  ;;  %v1043_v23 = vrot.slane %v1039_v9, 4  ;;  %v1067_v24 = vor.u32 %v1065_v1, %v1064_v12  ;;  %v1069_v27 = vrot.slane %v1064_v12, 4 }
 0x137   : > { %v1045_v21 = vshrl.u32 %v4023_v4, 16  ;;  %v1048_v50 = vshll.u32 %v4023_v4, 16  ;;  %v1735_v51 = vmul.f32 %v4611_v59, %v1721_v38  ;;  %v1781_v11 = vrot.slane %v1733_v15, 1 }
 0x138   : > { %v1240_v14 = vsel %vm4628_vm11, %v1042_v29, %v1239_v16  ;;  %v1068_v33 = vsel %vm4634_vm12, %v1060_v54, %v1067_v24  ;;  %v1251_v55 = vsel %vm4402_vm3, %v1069_v27, %v1250_v17  ;;  %v1782_v34 = vrot.slane %v1734_v2, 1 }
 0x139   : > { %1241 = vst [vmem:[#allocation2 + $0x9c] sm:$0xf] %v1240_v14  ;;  %1249 = vst [vmem:[#allocation2 + $0xac] sm:$0xf] %v1068_v33  ;;  %v1047_v37 = vrot.slane %v1045_v21, 7  ;;  %v1784_v39 = vrot.slane %v1735_v51, 1  ;;  %v1874_v43 = vmul.f32 %v4613_v60, %v1662_v41  ;;  %v1875_v48 = vmul.f32 %v4613_v60, %v1721_v38 }
 0x13a   : > { %1252 = vst [vmem:[#allocation2 + $0xb0] sm:$0x1] %v1251_v55  ;;  %v1783_v47 = vsel %vm1427_vm7, %v1781_v11, %v1782_v34  ;;  %v4789_v49 = vunpack.c.l.bf16 %v4063_v25  ;;  %v4791_v45 = vunpack.c.h.bf16 %v4063_v25  ;;  %v1921_v62 = vrot.slane %v1873_v42, 2  ;;  %v2205_v41 = vld [vmem:[#allocation2 + $0x18] sm:$0xe] }
 0x13b   : > { %v1050_v35 = vor.u32 %v1048_v50, %v1047_v37  ;;  %v1052_v52 = vrot.slane %v1047_v37, 4  ;;  %v1785_v54 = vsel %vm1427_vm7, %v1782_v34, %v1784_v39  ;;  %v1837_v36 = vadd.f32 %v1783_v47, %v1697_v31  ;;  %v1293_v39 = vld [vmem:[#allocation2 + $0xc] sm:$0xff]  }
 0x13c   : > { %v1838_v61 = vadd.f32 %v1785_v54, %v1698_v19  ;;  %v1922_v1 = vrot.slane %v1874_v43, 2  ;;  %v1924_v46 = vrot.slane %v1875_v48, 2  ;;  %v2033_v6 = vmul.f32 %v4789_v49, %v4615_v63  ;;  %v4822_v48 = vld [vmem:[#allocation2 + $0x14] sm:$0x1] }
 0x13d   : > { %v1051_v5 = vsel %vm4634_vm12, %v1043_v23, %v1050_v35  ;;  %v1244_v44 = vsel %vm4402_vm3, %v1052_v52, %v1243_v30  ;;  %v2034_v9 = vmul.f32 %v4791_v45, %v4615_v63  ;;  %v2073_v38 = vunpack.c.l.bf16 %v2065_v58 }
 0x13e   : > { %1242 = vst [vmem:[#allocation2 + $0xa0] sm:$0xf] %v1051_v5  ;;  %1245 = vst [vmem:[#allocation2 + $0xa4] sm:$0x1] %v1244_v44  ;;  %v1923_v31 = vsel %vm1568_vm8, %v1921_v62, %v1922_v1  ;;  %v1925_v12 = vsel %vm1568_vm8, %v1922_v1, %v1924_v46  ;;  %v2085_v15 = vmul.f32 %v4789_v49, %v4618_v0  ;;  %v2213_v19 = vunpack.c.l.bf16 %v2205_v41 }
 0x13f   : > { %v1977_v16 = vadd.f32 %v1923_v31, %v1837_v36  ;;  %v1978_v17 = vadd.f32 %v1925_v12, %v1838_v61  ;;  %v2086_v4 = vmul.f32 %v4791_v45, %v4618_v0  ;;  %v2087_v2 = vmul.f32 %v4618_v0, %v2073_v38 }
 0x140   : > { %v2133_v22 = vrot.slane %v2085_v15, 1  ;;  %v2226_v29 = vmul.f32 %v4791_v45, %v4620_v7  ;;  %v2227_v23 = vmul.f32 %v4620_v7, %v2073_v38  ;;  %v2225_v50 = vmul.f32 %v4620_v7, %v2213_v19 }
 0x141   : > { %v2049_v24 = vadd.f32 %v2033_v6, %v1977_v16  ;;  %v2050_v27 = vadd.f32 %v2034_v9, %v1978_v17  ;;  %v2134_v21 = vrot.slane %v2086_v4, 1  ;;  %v2136_v51 = vrot.slane %v2087_v2, 1 }
 0x142   : > { %v2274_v11 = vrot.slane %v2226_v29, 2  ;;  %v2276_v25 = vrot.slane %v2227_v23, 2  ;;  %v664_v14 = vadd.f32 %v4735_v8, %v4589_v32  ;;  %v2273_v55 = vrot.slane %v2225_v50, 2  ;;  %v4827_v8 = vld [vmem:[%s5772_s4] ss:$0 sm:$0xff] }
 0x143   : > { %v2135_v33 = vsel %vm1427_vm7, %v2133_v22, %v2134_v21  ;;  %v656_v34 = vadd.f32 %v4589_v32, %v4738_v13  ;;  %v667_v37 = vadd.f32 %v4740_v57, %v4589_v32  ;;  %v2137_v42 = vsel %vm1427_vm7, %v2134_v21, %v2136_v51  ;;  %v1260_v51 = vld [vmem:[#allocation2 + $0xc0] sm:$0xf] }
 0x144   : > { %v2189_v43 = vadd.f32 %v2135_v33, %v2049_v24  ;;  %v2277_v30 = vsel %vm1568_vm8, %v2274_v11, %v2276_v25  ;;  %v700_v47 = vmax.f32 %v664_v14, 0.0  ;;  %v2190_v35 = vadd.f32 %v2137_v42, %v2050_v27 }
 0x145   : > { %v2275_v13 = vsel %vm1568_vm8, %v2273_v55, %v2274_v11  ;;  %v698_v52 = vmax.f32 %v656_v34, 0.0  ;;  %v701_v54 = vmax.f32 %v667_v37, 0.0  ;;  %v1309_v36 = vunpack.c.l.bf16 %v1293_v39  ;;  %v1253_v34 = vld [vmem:[#allocation2 + $0xb4] sm:$0xf] }
 0x146   : > { %v2329_v32 = vadd.f32 %v2275_v13, %v2189_v43  ;;  %v732_v57 = vmin.f32 %v700_v47, 6.0  ;;  %v1310_v58 = vunpack.c.h.bf16 %v1293_v39  ;;  %v2330_v61 = vadd.f32 %v2277_v30, %v2190_v35  ;;  %v1501_v35 = vld [vmem:[#allocation2 + $0xc] sm:$0xe] }
 0x147   : > { %v730_v62 = vmin.f32 %v698_v52, 6.0  ;;  %v733_v1 = vmin.f32 %v701_v54, 6.0  ;;  %v1368_v46 = vunpack.c.l.bf16 %v4822_v48  ;;  %v1329_v44 = vmul.f32 %v4578_v20, %v1309_v36  ;;  %v1264_v48 = vld [vmem:[#allocation2 + $0xc8] sm:$0x1] }
 0x148   : > { %v2351_v41 = vadd.f32 %v4827_v8, %v2329_v32  ;;  %v4028_v5 = vpack.c.bf16 %v732_v57, %v732_v57  ;;  %v1330_v6 = vmul.f32 %v4578_v20, %v1310_v58  ;;  %v2352_v9 = vadd.f32 %v4827_v8, %v2330_v61  ;;  %v1714_v57 = vld [vmem:[#allocation2 + $0x20] sm:$0x1] }
 0x149   : > { %v4026_v31 = vpack.c.bf16 %v730_v62, %v730_v62  ;;  %v4029_v12 = vpack.c.bf16 %v733_v1, %v733_v1  ;;  %v1382_v38 = vmul.f32 %v4571_v10, %v1309_v36  ;;  %v1383_v4 = vmul.f32 %v4571_v10, %v1310_v58 }
 0x14a   : > { %v2367_v15 = vmax.f32 %v2351_v41, 0.0  ;;  %v1088_v16 = vshrl.u32 %v4028_v5, 16  ;;  %v1091_v17 = vshll.u32 %v4028_v5, 16  ;;  %v2368_v19 = vmax.f32 %v2352_v9, 0.0 }
 0x14b   : > { %v1071_v2 = vshrl.u32 %v4026_v31, 16  ;;  %v1074_v22 = vshll.u32 %v4026_v31, 16  ;;  %v1096_v29 = vshrl.u32 %v4029_v12, 16  ;;  %v1099_v27 = vshll.u32 %v4029_v12, 16  ;;  %v1854_v12 = vld [vmem:[#allocation2 + $0x18] sm:$0xe] }
 0x14c   : > { %v2383_v23 = vmin.f32 %v2367_v15, 6.0  ;;  %v1090_v24 = vrot.slane %v1088_v16, 7  ;;  %v1384_v21 = vmul.f32 %v4571_v10, %v1368_v46  ;;  %v2384_v50 = vmin.f32 %v2368_v19, 6.0 }
 0x14d   : > { %v4838_v11 = vrot.slane %v1071_v2, 7  ;;  %v1098_v25 = vrot.slane %v1096_v29, 7  ;;  %v1433_v14 = vrot.slane %v1382_v38, 1  ;;  %v1434_v37 = vrot.slane %v1383_v4, 1 }
 0x14e   : > { %v1093_v33 = vor.u32 %v1091_v17, %v1090_v24  ;;  %v1094_v55 = vrot.slane %v1090_v24, 4  ;;  %v1436_v39 = vrot.slane %v1384_v21, 1  ;;  %v2399_v42 = vpack.c.bf16 %v2384_v50, %v2383_v23 }
 0x14f   : > { %v1076_v43 = vor.u32 %v1074_v22, %v4838_v11  ;;  %v1077_v30 = vrot.slane %v4838_v11, 4  ;;  %v1101_v47 = vor.u32 %v1099_v27, %v1098_v25  ;;  %v1103_v52 = vrot.slane %v1098_v25, 4  ;;  %v1999_v22 = vld [vmem:[#allocation2 + $0x24] sm:$0xff]  }
 0x150   : > { %v1261_v13 = vsel %vm4628_vm11, %v1093_v33, %v1260_v51  ;;  %v1435_v54 = vsel %vm1427_vm7, %v1433_v14, %v1434_v37  ;;  %v1437_v32 = vsel %vm1427_vm7, %v1434_v37, %v1436_v39  ;;  %4245 = vmatprep.mubr.bf16.mxu1 %v2399_v42  ;;  %v1509_v5 = vunpack.c.l.bf16 %v1501_v35  ;;  %v2066_v14 = vld [vmem:[#allocation2 + $0x2c] sm:$0x1] }
 0x151   : > { %1262 = vst [vmem:[#allocation2 + $0xc0] sm:$0xf] %v1261_v13  ;;  %v1254_v36 = vsel %vm4628_vm11, %v1076_v43, %v1253_v34  ;;  %v1102_v61 = vsel %vm4634_vm12, %v1094_v55, %v1101_v47  ;;  %v1486_v62 = vadd.f32 %v1435_v54, %v1329_v44  ;;  %v1487_v1 = vadd.f32 %v1437_v32, %v1330_v6 }
 0x152   : > { %1255 = vst [vmem:[#allocation2 + $0xb4] sm:$0xf] %v1254_v36  ;;  %1263 = vst [vmem:[#allocation2 + $0xc4] sm:$0xf] %v1102_v61  ;;  %v1265_v41 = vsel %vm4402_vm3, %v1103_v52, %v1264_v48  ;;  %v1524_v9 = vmul.f32 %v4575_v18, %v1310_v58  ;;  %v1525_v31 = vmul.f32 %v4575_v18, %v1368_v46  ;;  %v1722_v44 = vunpack.c.l.bf16 %v1714_v57  ;;  %v2206_v48 = vld [vmem:[#allocation2 + $0x24] sm:$0xe] }
 0x153   : > { %1266 = vst [vmem:[#allocation2 + $0xc8] sm:$0x1] %v1265_v41  ;;  %v1683_v26 = vmul.f32 %v4789_v49, %v4608_v56  ;;  %v1684_v38 = vmul.f32 %v4791_v45, %v4608_v56  ;;  %v1736_v6 = vmul.f32 %v4789_v49, %v4611_v59  ;;  %v1523_v15 = vmul.f32 %v4575_v18, %v1509_v5 }
 0x154   : > { %v1575_v16 = vrot.slane %v1524_v9, 2  ;;  %v1577_v17 = vrot.slane %v1525_v31, 2  ;;  %v1737_v58 = vmul.f32 %v4791_v45, %v4611_v59  ;;  %v1738_v46 = vmul.f32 %v4611_v59, %v1722_v44 }
 0x155   : > { %v1786_v4 = vrot.slane %v1736_v6, 1  ;;  %v1862_v19 = vunpack.c.l.bf16 %v1854_v12  ;;  %v1877_v2 = vmul.f32 %v4791_v45, %v4613_v60  ;;  %v1574_v29 = vrot.slane %v1523_v15, 2 }
 0x156   : > { %v1578_v23 = vsel %vm1568_vm8, %v1575_v16, %v1577_v17  ;;  %v1787_v24 = vrot.slane %v1737_v58, 1  ;;  %v1878_v27 = vmul.f32 %v4613_v60, %v1722_v44  ;;  %v1789_v50 = vrot.slane %v1738_v46, 1  ;;  %v4327_v46 = vld [vmem:[%s5770_s2] ss:$0 sm:$0xff] }
 0x157   : > { %v1628_v21 = vadd.f32 %v1578_v23, %v1487_v1  ;;  %v1876_v51 = vmul.f32 %v4613_v60, %v1862_v19  ;;  %v1927_v25 = vrot.slane %v1877_v2, 2  ;;  %v1576_v33 = vsel %vm1568_vm8, %v1574_v29, %v1575_v16  ;;  %v1361_v19 = vld [vmem:[#allocation2 + $0x20] sm:$0x1] }
 0x158   : > { %v1788_v55 = vsel %vm1427_vm7, %v1786_v4, %v1787_v24  ;;  %v1929_v34 = vrot.slane %v1878_v27, 2  ;;  %v2015_v37 = vunpack.c.l.bf16 %v1999_v22  ;;  %v1627_v39 = vadd.f32 %v1576_v33, %v1486_v62 }
 0x159   : > { %v1700_v42 = vadd.f32 %v1684_v38, %v1628_v21  ;;  %v1790_v43 = vsel %vm1427_vm7, %v1787_v24, %v1789_v50  ;;  %v1926_v47 = vrot.slane %v1876_v51, 2  ;;  %v2016_v13 = vunpack.c.h.bf16 %v1999_v22  ;;  %v1502_v51 = vld [vmem:[#allocation2 + $0x18] sm:$0xe] }
 0x15a   : > { %v1930_v35 = vsel %vm1568_vm8, %v1927_v25, %v1929_v34  ;;  %v2035_v52 = vmul.f32 %v4615_v63, %v2015_v37  ;;  %v2074_v54 = vunpack.c.l.bf16 %v2066_v14  ;;  %v1699_v32 = vadd.f32 %v1683_v26, %v1627_v39 }
 0x15b   : > { %v1840_v57 = vadd.f32 %v1790_v43, %v1700_v42  ;;  %v1928_v36 = vsel %vm1568_vm8, %v1926_v47, %v1927_v25  ;;  %v2088_v61 = vmul.f32 %v4618_v0, %v2015_v37  ;;  %v2036_v1 = vmul.f32 %v4615_v63, %v2016_v13 }
 0x15c   : > { %v2089_v62 = vmul.f32 %v4618_v0, %v2016_v13  ;;  %v2090_v41 = vmul.f32 %v4618_v0, %v2074_v54  ;;  %v2214_v5 = vunpack.c.l.bf16 %v2206_v48  ;;  %v1839_v9 = vadd.f32 %v1788_v55, %v1699_v32 }
 0x15d   : > { %v1980_v31 = vadd.f32 %v1930_v35, %v1840_v57  ;;  %v2138_v12 = vrot.slane %v2088_v61, 1  ;;  %v2229_v38 = vmul.f32 %v4620_v7, %v2016_v13  ;;  %v2230_v15 = vmul.f32 %v4620_v7, %v2074_v54 }
 0x15e   : > { %v2139_v44 = vrot.slane %v2089_v62, 1  ;;  %v2141_v6 = vrot.slane %v2090_v41, 1  ;;  %v2228_v26 = vmul.f32 %v4620_v7, %v2214_v5  ;;  %v1979_v16 = vadd.f32 %v1928_v36, %v1839_v9  ;;  %v1649_v5 = vld [vmem:[#allocation2 + $0x24] sm:$0xff]  }
 0x15f   : > { %v2052_v17 = vadd.f32 %v2036_v1, %v1980_v31  ;;  %v2279_v58 = vrot.slane %v2229_v38, 2  ;;  %v659_v4 = vadd.f32 %v4327_v46, %v4742_v28  ;;  %v2281_v23 = vrot.slane %v2230_v15, 2  ;;  %v1715_v15 = vld [vmem:[#allocation2 + $0x2c] sm:$0x1] }
 0x160   : > { %v2140_v2 = vsel %vm1427_vm7, %v2138_v12, %v2139_v44  ;;  %v2142_v22 = vsel %vm1427_vm7, %v2139_v44, %v2141_v6  ;;  %v2278_v29 = vrot.slane %v2228_v26, 2  ;;  %v2051_v24 = vadd.f32 %v2035_v52, %v1979_v16  ;;  %v1257_v16 = vld [vmem:[#allocation2 + $0xbc] sm:$0x1] }
 0x161   : > { %v2192_v27 = vadd.f32 %v2142_v22, %v2052_v17  ;;  %v699_v21 = vmax.f32 %v659_v4, 0.0  ;;  %v1331_v50 = vmul.f32 %v4789_v49, %v4578_v20  ;;  %v2282_v14 = vsel %vm1568_vm8, %v2279_v58, %v2281_v23 }
 0x162   : > { %v2280_v25 = vsel %vm1568_vm8, %v2278_v29, %v2279_v58  ;;  %v1332_v28 = vmul.f32 %v4791_v45, %v4578_v20  ;;  %v1369_v33 = vunpack.c.l.bf16 %v1361_v19  ;;  %v2191_v55 = vadd.f32 %v2140_v2, %v2051_v24 }
 0x163   : > { %v2332_v34 = vadd.f32 %v2282_v14, %v2192_v27  ;;  %v731_v37 = vmin.f32 %v699_v21, 6.0  ;;  %v1385_v39 = vmul.f32 %v4789_v49, %v4571_v10  ;;  %v1386_v42 = vmul.f32 %v4791_v45, %v4571_v10 }
 0x164   : > { %v1387_v43 = vmul.f32 %v4571_v10, %v1369_v33  ;;  %v1510_v47 = vunpack.c.l.bf16 %v1502_v51  ;;  %v1527_v48 = vmul.f32 %v4791_v45, %v4575_v18  ;;  %v2331_v35 = vadd.f32 %v2280_v25, %v2191_v55  ;;  %v1855_v51 = vld [vmem:[#allocation2 + $0x24] sm:$0xe] }
 0x165   : > { %v2354_v13 = vadd.f32 %v4827_v8, %v2332_v34  ;;  %v4027_v52 = vpack.c.bf16 %v731_v37, %v731_v37  ;;  %v1438_v54 = vrot.slane %v1385_v39, 1  ;;  %v1439_v32 = vrot.slane %v1386_v42, 1 }
 0x166   : > { %v1441_v57 = vrot.slane %v1387_v43, 1  ;;  %v1526_v36 = vmul.f32 %v4575_v18, %v1510_v47  ;;  %v1528_v49 = vmul.f32 %v4575_v18, %v1369_v33  ;;  %v2353_v61 = vadd.f32 %v4827_v8, %v2331_v35  ;;  %v4133_v33 = vld [vmem:[#allocation2 + $0x30] sm:$0xff]   ;;  %v2067_v43 = vld [vmem:[#allocation2 + $0x38] sm:$0x1] }
 0x167   : > { %v2370_v1 = vmax.f32 %v2354_v13, 0.0  ;;  %v1079_v62 = vshrl.u32 %v4027_v52, 16  ;;  %v1082_v41 = vshll.u32 %v4027_v52, 16  ;;  %v1440_v9 = vsel %vm1427_vm7, %v1438_v54, %v1439_v32  ;;  %v4328_v52 = vld [vmem:[%s5773_s5] sm:$0xff]  }
 0x168   : > { %v1442_v45 = vsel %vm1427_vm7, %v1439_v32, %v1441_v57  ;;  %v1579_v31 = vrot.slane %v1526_v36, 2  ;;  %v1580_v12 = vrot.slane %v1527_v48, 2  ;;  %v2369_v38 = vmax.f32 %v2353_v61, 0.0 }
 0x169   : > { %v2386_v44 = vmin.f32 %v2370_v1, 6.0  ;;  %v1081_v6 = vrot.slane %v1079_v62, 7  ;;  %v1488_v26 = vadd.f32 %v1440_v9, %v1331_v50  ;;  %v1489_v17 = vadd.f32 %v1442_v45, %v1332_v28 }
 0x16a   : > { %v1581_v58 = vsel %vm1568_vm8, %v1579_v31, %v1580_v12  ;;  %v1582_v46 = vrot.slane %v1528_v49, 2  ;;  %v1665_v4 = vunpack.c.l.bf16 %v1649_v5  ;;  %v2385_v19 = vmin.f32 %v2369_v38, 6.0  ;;  %v4329_v49 = vld [vmem:[%s5773_s5 + $0x8] sm:$0xff]  }
 0x16b   : > { %v1084_v2 = vor.u32 %v1082_v41, %v1081_v6  ;;  %v1086_v22 = vrot.slane %v1081_v6, 4  ;;  %v1629_v29 = vadd.f32 %v1581_v58, %v1488_v26  ;;  %v1666_v24 = vunpack.c.h.bf16 %v1649_v5  ;;  %v2207_v5 = vld [vmem:[#allocation2 + $0x30] sm:$0xe] }
 0x16c   : > { %v1583_v23 = vsel %vm1568_vm8, %v1580_v12, %v1582_v46  ;;  %v1685_v27 = vmul.f32 %v4608_v56, %v1665_v4  ;;  %v1723_v21 = vunpack.c.l.bf16 %v1715_v15  ;;  %v2400_v25 = vpack.c.bf16 %v2386_v44, %v2385_v19  ;;  %v1297_v46 = vld [vmem:[#allocation2 + $0x24] sm:$0xff]  }
 0x16d   : > { %v1085_v50 = vsel %vm4634_vm12, %v1077_v30, %v1084_v2  ;;  %v1258_v14 = vsel %vm4402_vm3, %v1086_v22, %v1257_v16  ;;  %v1630_v28 = vadd.f32 %v1583_v23, %v1489_v17  ;;  %v1686_v55 = vmul.f32 %v4608_v56, %v1666_v24 }
 0x16e   : > { %1256 = vst [vmem:[#allocation2 + $0xb8] sm:$0xf] %v1085_v50  ;;  %1259 = vst [vmem:[#allocation2 + $0xbc] sm:$0x1] %v1258_v14  ;;  %v1701_v34 = vadd.f32 %v1685_v27, %v1629_v29  ;;  %v1739_v37 = vmul.f32 %v4611_v59, %v1665_v4  ;;  %v1740_v39 = vmul.f32 %v4611_v59, %v1666_v24  ;;  %4246 = vmatmul.mubr.bf16.vlgmr.msra.gmra.mrb[0].mxu1 %v2400_v25  ;;  %v4330_v4 = vld [vmem:[%s5773_s5 + $0x10] sm:$0xff]  }
 0x16f   : > { %v1741_v11 = vmul.f32 %v4611_v59, %v1723_v21  ;;  %v1863_v42 = vunpack.c.l.bf16 %v1855_v51  ;;  %v1880_v40 = vmul.f32 %v4613_v60, %v1666_v24  ;;  %v1881_v30 = vmul.f32 %v4613_v60, %v1723_v21  ;;  %4301 = vmatpush3.bf16.msra.mxu1 %v4328_v52  ;;  %v1362_v51 = vld [vmem:[#allocation2 + $0x2c] sm:$0x1] }
 0x170   : > { %v1702_v47 = vadd.f32 %v1686_v55, %v1630_v28  ;;  %v1791_v48 = vrot.slane %v1739_v37, 1  ;;  %v1792_v35 = vrot.slane %v1740_v39, 1  ;;  %v4922_v13 = vunpack.c.l.bf16 %v4133_v33  ;;  %4294 = vmatprep.subr.bf16.mxu1 %v4329_v49  ;;  %v4331_v39 = vld [vmem:[%s5773_s5 + $0x18] sm:$0xff]  }
 0x171   : > { %v1794_v54 = vrot.slane %v1741_v11, 1  ;;  %v1879_v32 = vmul.f32 %v4613_v60, %v1863_v42  ;;  %v1932_v57 = vrot.slane %v1880_v40, 2  ;;  %v1934_v36 = vrot.slane %v1881_v30, 2 }
 0x172   : > { %v1793_v61 = vsel %vm1427_vm7, %v1791_v48, %v1792_v35  ;;  %v4932_v1 = vunpack.c.h.bf16 %v4133_v33  ;;  %v2037_v62 = vmul.f32 %v4922_v13, %v4615_v63  ;;  %v2075_v41 = vunpack.c.l.bf16 %v2067_v43  ;;  %v1503_v43 = vld [vmem:[#allocation2 + $0x24] sm:$0xe] }
 0x173   : > { %v1795_v9 = vsel %vm1427_vm7, %v1792_v35, %v1794_v54  ;;  %v1841_v45 = vadd.f32 %v1793_v61, %v1701_v34  ;;  %v1931_v31 = vrot.slane %v1879_v32, 2  ;;  %v1935_v12 = vsel %vm1568_vm8, %v1932_v57, %v1934_v36  ;;  %4302 = vmatpush3.bf16.msra.mxu1 %v4329_v49 }
 0x174   : > { %v1842_v38 = vadd.f32 %v1795_v9, %v1702_v47  ;;  %v2038_v44 = vmul.f32 %v4932_v1, %v4615_v63  ;;  %v2091_v6 = vmul.f32 %v4922_v13, %v4618_v0  ;;  %v2092_v26 = vmul.f32 %v4932_v1, %v4618_v0  ;;  %4295 = vmatprep.subr.bf16.mxu1 %v4330_v4 }
 0x175   : > { %v1933_v15 = vsel %vm1568_vm8, %v1931_v31, %v1932_v57  ;;  %v2093_v16 = vmul.f32 %v4618_v0, %v2075_v41  ;;  %v2215_v17 = vunpack.c.l.bf16 %v2207_v5  ;;  %v2232_v58 = vmul.f32 %v4932_v1, %v4620_v7  ;;  %v4332_v5 = vld [vmem:[%s5773_s5 + $0x20] sm:$0xff]  }
 0x176   : > { %v1981_v19 = vadd.f32 %v1933_v15, %v1841_v45  ;;  %v1982_v2 = vadd.f32 %v1935_v12, %v1842_v38  ;;  %v2143_v22 = vrot.slane %v2091_v6, 1  ;;  %v2144_v29 = vrot.slane %v2092_v26, 1  ;;  %v1716_v15 = vld [vmem:[#allocation2 + $0x38] sm:$0x1] }
 0x177   : > { %v2146_v23 = vrot.slane %v2093_v16, 1  ;;  %v2231_v24 = vmul.f32 %v4620_v7, %v2215_v17  ;;  %v2233_v27 = vmul.f32 %v4620_v7, %v2075_v41  ;;  %v2284_v21 = vrot.slane %v2232_v58, 2  ;;  %4303 = vmatpush3.bf16.msra.mxu1 %v4330_v4 }
 0x178   : > { %v2053_v25 = vadd.f32 %v2037_v62, %v1981_v19  ;;  %v2054_v50 = vadd.f32 %v2038_v44, %v1982_v2  ;;  %v2145_v14 = vsel %vm1427_vm7, %v2143_v22, %v2144_v29  ;;  %v1313_v28 = vunpack.c.l.bf16 %v1297_v46  ;;  %4296 = vmatprep.subr.bf16.mxu1 %v4331_v39 }
 0x179   : > { %v2147_v33 = vsel %vm1427_vm7, %v2144_v29, %v2146_v23  ;;  %v2283_v55 = vrot.slane %v2231_v24, 2  ;;  %v2286_v34 = vrot.slane %v2233_v27, 2  ;;  %v1314_v37 = vunpack.c.h.bf16 %v1297_v46  ;;  %v1856_v29 = vld [vmem:[#allocation2 + $0x30] sm:$0xe]  ;;  %v4333_v23 = vld [vmem:[%s5773_s5 + $0x28] sm:$0xff]  }
 0x17a   : > { %v2193_v11 = vadd.f32 %v2145_v14, %v2053_v25  ;;  %v2194_v42 = vadd.f32 %v2147_v33, %v2054_v50  ;;  %v1333_v40 = vmul.f32 %v4578_v20, %v1313_v28  ;;  %v1370_v30 = vunpack.c.l.bf16 %v1362_v51 }
 0x17b   : > { %v2285_v47 = vsel %vm1568_vm8, %v2283_v55, %v2284_v21  ;;  %v2287_v48 = vsel %vm1568_vm8, %v2284_v21, %v2286_v34  ;;  %v1334_v35 = vmul.f32 %v4578_v20, %v1314_v37  ;;  %v1388_v52 = vmul.f32 %v4571_v10, %v1313_v28  ;;  %4304 = vmatpush3.bf16.msra.mxu1 %v4331_v39  ;;  %v2003_v39 = vld [vmem:[#allocation2 + $0x3c] sm:$0xff]  }
 0x17c   : > { %v2333_v54 = vadd.f32 %v2285_v47, %v2193_v11  ;;  %v2334_v32 = vadd.f32 %v2287_v48, %v2194_v42  ;;  %v1389_v57 = vmul.f32 %v4571_v10, %v1314_v37  ;;  %v1390_v36 = vmul.f32 %v4571_v10, %v1370_v30  ;;  %4297 = vmatprep.subr.bf16.mxu1 %v4332_v5 }
 0x17d   : > { %v1443_v49 = vrot.slane %v1388_v52, 1  ;;  %v1511_v61 = vunpack.c.l.bf16 %v1503_v43  ;;  %v1530_v62 = vmul.f32 %v4575_v18, %v1314_v37  ;;  %v1531_v41 = vmul.f32 %v4575_v18, %v1370_v30  ;;  %v4334_v43 = vld [vmem:[%s5773_s5 + $0x30] sm:$0xff]  }
 0x17e   : > { %v2355_v9 = vadd.f32 %v4827_v8, %v2333_v54  ;;  %v2356_v45 = vadd.f32 %v4827_v8, %v2334_v32  ;;  %v1444_v31 = vrot.slane %v1389_v57, 1  ;;  %v1446_v12 = vrot.slane %v1390_v36, 1  ;;  %v2068_v54 = vld [vmem:[#allocation2 + $0x44] sm:$0x1] }
 0x17f   : > { %v1529_v38 = vmul.f32 %v4575_v18, %v1511_v61  ;;  %v1585_v44 = vrot.slane %v1530_v62, 2  ;;  %v1587_v6 = vrot.slane %v1531_v41, 2  ;;  %v1687_v26 = vmul.f32 %v4922_v13, %v4608_v56  ;;  %4305 = vmatpush3.bf16.msra.mxu1 %v4332_v5 }
 0x180   : > { %v2371_v16 = vmax.f32 %v2355_v9, 0.0  ;;  %v2372_v17 = vmax.f32 %v2356_v45, 0.0  ;;  %v1445_v58 = vsel %vm1427_vm7, %v1443_v49, %v1444_v31  ;;  %v1447_v46 = vsel %vm1427_vm7, %v1444_v31, %v1446_v12  ;;  %4298 = vmatprep.subr.bf16.mxu1 %v4333_v23  ;;  %v2208_v9 = vld [vmem:[#allocation2 + $0x3c] sm:$0xe] }
 0x181   : > { %v1490_v4 = vadd.f32 %v1445_v58, %v1333_v40  ;;  %v1491_v19 = vadd.f32 %v1447_v46, %v1334_v35  ;;  %v1584_v2 = vrot.slane %v1529_v38, 2  ;;  %v1588_v22 = vsel %vm1568_vm8, %v1585_v44, %v1587_v6 }
 0x182   : > { %v2387_v24 = vmin.f32 %v2371_v16, 6.0  ;;  %v2388_v27 = vmin.f32 %v2372_v17, 6.0  ;;  %v1688_v21 = vmul.f32 %v4932_v1, %v4608_v56  ;;  %v1724_v51 = vunpack.c.l.bf16 %v1716_v15 }
 0x183   : > { %v1586_v25 = vsel %vm1568_vm8, %v1584_v2, %v1585_v44  ;;  %v1632_v50 = vadd.f32 %v1588_v22, %v1491_v19  ;;  %v1742_v14 = vmul.f32 %v4922_v13, %v4611_v59  ;;  %v1743_v28 = vmul.f32 %v4932_v1, %v4611_v59  ;;  %4306 = vmatpush3.bf16.msra.mxu1 %v4333_v23  ;;  %v4335_v44 = vld [vmem:[%s5773_s5 + $0x38] sm:$0xff]  }
 0x184   : > { %v2401_v33 = vpack.c.bf16 %v2388_v27, %v2387_v24  ;;  %v1631_v55 = vadd.f32 %v1586_v25, %v1490_v4  ;;  %v1744_v34 = vmul.f32 %v4611_v59, %v1724_v51  ;;  %v1864_v37 = vunpack.c.l.bf16 %v1856_v29  ;;  %4299 = vmatprep.subr.bf16.mxu1 %v4334_v43 }
 0x185   : > { %v1704_v11 = vadd.f32 %v1688_v21, %v1632_v50  ;;  %v1796_v42 = vrot.slane %v1742_v14, 1  ;;  %v1797_v40 = vrot.slane %v1743_v28, 1  ;;  %v1883_v30 = vmul.f32 %v4932_v1, %v4613_v60 }
 0x186   : > { %4249 = vmatprep.mubr.bf16.mxu1 %v2401_v33  ;;  %v1703_v47 = vadd.f32 %v1687_v26, %v1631_v55  ;;  %v1799_v48 = vrot.slane %v1744_v34, 1  ;;  %v1882_v35 = vmul.f32 %v4613_v60, %v1864_v37  ;;  %v1884_v52 = vmul.f32 %v4613_v60, %v1724_v51  ;;  %v1363_v51 = vld [vmem:[#allocation2 + $0x38] sm:$0x1]  ;;  %v1504_v33 = vld [vmem:[#allocation2 + $0x30] sm:$0xe] }
 0x187   : > { %v1798_v32 = vsel %vm1427_vm7, %v1796_v42, %v1797_v40  ;;  %v1937_v57 = vrot.slane %v1883_v30, 2  ;;  %v2019_v36 = vunpack.c.l.bf16 %v2003_v39  ;;  %v2020_v49 = vunpack.c.h.bf16 %v2003_v39  ;;  %4307 = vmatpush3.bf16.msra.mxu1 %v4334_v43 }
 0x188   : > { %v1800_v61 = vsel %vm1427_vm7, %v1797_v40, %v1799_v48  ;;  %v1843_v62 = vadd.f32 %v1798_v32, %v1703_v47  ;;  %v1936_v41 = vrot.slane %v1882_v35, 2  ;;  %v1939_v5 = vrot.slane %v1884_v52, 2  ;;  %4300 = vmatprep.subr.bf16.mxu1 %v4335_v44  ;;  %v1653_v52 = vld [vmem:[#allocation2 + $0x3c] sm:$0xff]  }
 0x189   : > { %v1844_v45 = vadd.f32 %v1800_v61, %v1704_v11  ;;  %v2039_v31 = vmul.f32 %v4615_v63, %v2019_v36  ;;  %v2040_v12 = vmul.f32 %v4615_v63, %v2020_v49  ;;  %v2076_v38 = vunpack.c.l.bf16 %v2068_v54 }
 0x18a   : > { %v1938_v6 = vsel %vm1568_vm8, %v1936_v41, %v1937_v57  ;;  %v1940_v26 = vsel %vm1568_vm8, %v1937_v57, %v1939_v5  ;;  %v2094_v15 = vmul.f32 %v4618_v0, %v2019_v36  ;;  %v2095_v16 = vmul.f32 %v4618_v0, %v2020_v49 }
 0x18b   : > { %v1983_v17 = vadd.f32 %v1938_v6, %v1843_v62  ;;  %v1984_v58 = vadd.f32 %v1940_v26, %v1844_v45  ;;  %v2096_v46 = vmul.f32 %v4618_v0, %v2076_v38  ;;  %v2216_v4 = vunpack.c.l.bf16 %v2208_v9  ;;  %4308 = vmatpush3.bf16.msra.mxu1 %v4335_v44 }
 0x18c   : > { %v2148_v19 = vrot.slane %v2094_v15, 1  ;;  %v2149_v2 = vrot.slane %v2095_v16, 1  ;;  %v2235_v22 = vmul.f32 %v4620_v7, %v2020_v49  ;;  %v2236_v29 = vmul.f32 %v4620_v7, %v2076_v38  ;;  %v1717_v16 = vld [vmem:[#allocation2 + $0x44] sm:$0x1] }
 0x18d   : > { %v2055_v23 = vadd.f32 %v2039_v31, %v1983_v17  ;;  %v2056_v24 = vadd.f32 %v2040_v12, %v1984_v58  ;;  %v2151_v27 = vrot.slane %v2096_v46, 1  ;;  %v2234_v21 = vmul.f32 %v4620_v7, %v2216_v4 }
 0x18e   : > { %v2150_v25 = vsel %vm1427_vm7, %v2148_v19, %v2149_v2  ;;  %v2289_v50 = vrot.slane %v2235_v22, 2  ;;  %v2291_v14 = vrot.slane %v2236_v29, 2  ;;  %v1335_v28 = vmul.f32 %v4922_v13, %v4578_v20  ;;  %v1857_v19 = vld [vmem:[#allocation2 + $0x3c] sm:$0xe] }
 0x18f   : > { %v2152_v55 = vsel %vm1427_vm7, %v2149_v2, %v2151_v27  ;;  %v2195_v34 = vadd.f32 %v2150_v25, %v2055_v23  ;;  %v2288_v37 = vrot.slane %v2234_v21, 2  ;;  %v1336_v39 = vmul.f32 %v4932_v1, %v4578_v20  ;;  %v4134_v25 = vld [vmem:[#allocation2 + $0x48] sm:$0xff]  }
 0x190   : > { %v2196_v11 = vadd.f32 %v2152_v55, %v2056_v24  ;;  %v2292_v42 = vsel %vm1568_vm8, %v2289_v50, %v2291_v14  ;;  %v1371_v40 = vunpack.c.l.bf16 %v1363_v51  ;;  %v1391_v30 = vmul.f32 %v4922_v13, %v4571_v10  ;;  %v2069_v55 = vld [vmem:[#allocation2 + $0x50] sm:$0x1] }
 0x191   : > { %v2290_v43 = vsel %vm1568_vm8, %v2288_v37, %v2289_v50  ;;  %v1392_v47 = vmul.f32 %v4932_v1, %v4571_v10  ;;  %v1512_v48 = vunpack.c.l.bf16 %v1504_v33  ;;  %v1533_v35 = vmul.f32 %v4932_v1, %v4575_v18 }
 0x192   : > { %v2335_v54 = vadd.f32 %v2290_v43, %v2195_v34  ;;  %v2336_v32 = vadd.f32 %v2292_v42, %v2196_v11  ;;  %v1393_v57 = vmul.f32 %v4571_v10, %v1371_v40  ;;  %v1448_v36 = vrot.slane %v1391_v30, 1 }
 0x193   : > { %v1449_v49 = vrot.slane %v1392_v47, 1  ;;  %v1532_v61 = vmul.f32 %v4575_v18, %v1512_v48  ;;  %v1534_v13 = vmul.f32 %v4575_v18, %v1371_v40  ;;  %v1590_v62 = vrot.slane %v1533_v35, 2 }
 0x194   : > { %v2357_v41 = vadd.f32 %v4827_v8, %v2335_v54  ;;  %v2358_v5 = vadd.f32 %v4827_v8, %v2336_v32  ;;  %v1451_v9 = vrot.slane %v1393_v57, 1  ;;  %v1669_v45 = vunpack.c.l.bf16 %v1653_v52 }
 0x195   : > { %v1450_v1 = vsel %vm1427_vm7, %v1448_v36, %v1449_v49  ;;  %v1589_v31 = vrot.slane %v1532_v61, 2  ;;  %v1592_v12 = vrot.slane %v1534_v13, 2  ;;  %v1670_v38 = vunpack.c.h.bf16 %v1653_v52 }
 0x196   : > { %v2373_v44 = vmax.f32 %v2357_v41, 0.0  ;;  %v2374_v6 = vmax.f32 %v2358_v5, 0.0  ;;  %v1452_v26 = vsel %vm1427_vm7, %v1449_v49, %v1451_v9  ;;  %v1492_v15 = vadd.f32 %v1450_v1, %v1335_v28  ;;  %v2209_v49 = vld [vmem:[#allocation2 + $0x48] sm:$0xe] }
 0x197   : > { %v1493_v17 = vadd.f32 %v1452_v26, %v1336_v39  ;;  %v1591_v58 = vsel %vm1568_vm8, %v1589_v31, %v1590_v62  ;;  %v1593_v46 = vsel %vm1568_vm8, %v1590_v62, %v1592_v12  ;;  %v1689_v4 = vmul.f32 %v4608_v56, %v1669_v45  ;;  %v1301_v31 = vld [vmem:[#allocation2 + $0x3c] sm:$0xff]  }
 0x198   : > { %v2389_v2 = vmin.f32 %v2373_v44, 6.0  ;;  %v2390_v22 = vmin.f32 %v2374_v6, 6.0  ;;  %v1633_v29 = vadd.f32 %v1591_v58, %v1492_v15  ;;  %v1690_v23 = vmul.f32 %v4608_v56, %v1670_v38 }
 0x199   : > { %v1634_v24 = vadd.f32 %v1593_v46, %v1493_v17  ;;  %v1725_v27 = vunpack.c.l.bf16 %v1717_v16  ;;  %v1745_v21 = vmul.f32 %v4611_v59, %v1669_v45  ;;  %v1746_v51 = vmul.f32 %v4611_v59, %v1670_v38 }
 0x19a   : > { %v2402_v50 = vpack.c.bf16 %v2390_v22, %v2389_v2  ;;  %v1705_v14 = vadd.f32 %v1689_v4, %v1633_v29  ;;  %v1865_v28 = vunpack.c.l.bf16 %v1857_v19  ;;  %v1886_v33 = vmul.f32 %v4613_v60, %v1670_v38  ;;  %v1364_v2 = vld [vmem:[#allocation2 + $0x44] sm:$0x1] }
 0x19b   : > { %v1706_v34 = vadd.f32 %v1690_v23, %v1634_v24  ;;  %v1747_v37 = vmul.f32 %v4611_v59, %v1725_v27  ;;  %v1801_v39 = vrot.slane %v1745_v21, 1  ;;  %v1802_v11 = vrot.slane %v1746_v51, 1 }
 0x19c   : > { %4250 = vmatmul.mubr.bf16.gmra.mrb[4].mxu1 %v2402_v50  ;;  %v1885_v42 = vmul.f32 %v4613_v60, %v1865_v28  ;;  %v1887_v40 = vmul.f32 %v4613_v60, %v1725_v27  ;;  %v1942_v30 = vrot.slane %v1886_v33, 2  ;;  %v5042_v43 = vunpack.c.l.bf16 %v4134_v25  ;;  %v1505_v27 = vld [vmem:[#allocation2 + $0x3c] sm:$0xe] }
 0x19d   : > { %v1803_v47 = vsel %vm1427_vm7, %v1801_v39, %v1802_v11  ;;  %v1804_v48 = vrot.slane %v1747_v37, 1  ;;  %v5045_v35 = vunpack.c.h.bf16 %v4134_v25  ;;  %v2077_v52 = vunpack.c.l.bf16 %v2069_v55 }
 0x19e   : > { %v1845_v54 = vadd.f32 %v1803_v47, %v1705_v14  ;;  %v1941_v32 = vrot.slane %v1885_v42, 2  ;;  %v1944_v57 = vrot.slane %v1887_v40, 2  ;;  %v2041_v36 = vmul.f32 %v5042_v43, %v4615_v63 }
 0x19f   : > { %v1805_v61 = vsel %vm1427_vm7, %v1802_v11, %v1804_v48  ;;  %v2042_v13 = vmul.f32 %v5045_v35, %v4615_v63  ;;  %v2097_v62 = vmul.f32 %v5042_v43, %v4618_v0  ;;  %v2098_v41 = vmul.f32 %v5045_v35, %v4618_v0 }
 0x1a0   : > { %v1846_v5 = vadd.f32 %v1805_v61, %v1706_v34  ;;  %v1943_v9 = vsel %vm1568_vm8, %v1941_v32, %v1942_v30  ;;  %v1945_v45 = vsel %vm1568_vm8, %v1942_v30, %v1944_v57  ;;  %v2099_v1 = vmul.f32 %v4618_v0, %v2077_v52 }
 0x1a1   : > { %v1985_v12 = vadd.f32 %v1943_v9, %v1845_v54  ;;  %v2153_v38 = vrot.slane %v2097_v62, 1  ;;  %v2154_v44 = vrot.slane %v2098_v41, 1  ;;  %v2217_v6 = vunpack.c.l.bf16 %v2209_v49  ;;  %v1718_v9 = vld [vmem:[#allocation2 + $0x50] sm:$0x1] }
 0x1a2   : > { %v1986_v26 = vadd.f32 %v1945_v45, %v1846_v5  ;;  %v2156_v15 = vrot.slane %v2099_v1, 1  ;;  %v2238_v16 = vmul.f32 %v5045_v35, %v4620_v7  ;;  %v2239_v17 = vmul.f32 %v4620_v7, %v2077_v52 }
 0x1a3   : > { %v2057_v58 = vadd.f32 %v2041_v36, %v1985_v12  ;;  %v2155_v46 = vsel %vm1427_vm7, %v2153_v38, %v2154_v44  ;;  %v2237_v4 = vmul.f32 %v4620_v7, %v2217_v6  ;;  %v1317_v19 = vunpack.c.l.bf16 %v1301_v31  ;;  %v1858_v38 = vld [vmem:[#allocation2 + $0x48] sm:$0xe] }
 0x1a4   : > { %v2058_v22 = vadd.f32 %v2042_v13, %v1986_v26  ;;  %v2157_v29 = vsel %vm1427_vm7, %v2154_v44, %v2156_v15  ;;  %v2294_v23 = vrot.slane %v2238_v16, 2  ;;  %v2296_v24 = vrot.slane %v2239_v17, 2 }
 0x1a5   : > { %v2197_v21 = vadd.f32 %v2155_v46, %v2057_v58  ;;  %v2293_v51 = vrot.slane %v2237_v4, 2  ;;  %v1318_v25 = vunpack.c.h.bf16 %v1301_v31  ;;  %v1337_v50 = vmul.f32 %v4578_v20, %v1317_v19 }
 0x1a6   : > { %v2198_v14 = vadd.f32 %v2157_v29, %v2058_v22  ;;  %v2297_v28 = vsel %vm1568_vm8, %v2294_v23, %v2296_v24  ;;  %v1372_v33 = vunpack.c.l.bf16 %v1364_v2  ;;  %v1394_v55 = vmul.f32 %v4571_v10, %v1317_v19  ;;  %v2007_v22 = vld [vmem:[#allocation2 + $0x54] sm:$0xff]  }
 0x1a7   : > { %v2295_v34 = vsel %vm1568_vm8, %v2293_v51, %v2294_v23  ;;  %v1338_v37 = vmul.f32 %v4578_v20, %v1318_v25  ;;  %v1395_v39 = vmul.f32 %v4571_v10, %v1318_v25  ;;  %v1513_v11 = vunpack.c.l.bf16 %v1505_v27 }
 0x1a8   : > { %v2337_v42 = vadd.f32 %v2295_v34, %v2197_v21  ;;  %v2338_v40 = vadd.f32 %v2297_v28, %v2198_v14  ;;  %v1396_v30 = vmul.f32 %v4571_v10, %v1372_v33  ;;  %v1453_v47 = vrot.slane %v1394_v55, 1  ;;  %v2070_v21 = vld [vmem:[#allocation2 + $0x5c] sm:$0x1] }
 0x1a9   : > { %v1454_v48 = vrot.slane %v1395_v39, 1  ;;  %v1535_v52 = vmul.f32 %v4575_v18, %v1513_v11  ;;  %v1536_v54 = vmul.f32 %v4575_v18, %v1318_v25  ;;  %v1537_v32 = vmul.f32 %v4575_v18, %v1372_v33 }
 0x1aa   : > { %v2359_v57 = vadd.f32 %v4827_v8, %v2337_v42  ;;  %v2360_v36 = vadd.f32 %v4827_v8, %v2338_v40  ;;  %v1456_v49 = vrot.slane %v1396_v30, 1  ;;  %v1691_v61 = vmul.f32 %v5042_v43, %v4608_v56 }
 0x1ab   : > { %v1455_v13 = vsel %vm1427_vm7, %v1453_v47, %v1454_v48  ;;  %v1594_v62 = vrot.slane %v1535_v52, 2  ;;  %v1595_v41 = vrot.slane %v1536_v54, 2  ;;  %v1597_v5 = vrot.slane %v1537_v32, 2  ;;  %v2210_v52 = vld [vmem:[#allocation2 + $0x54] sm:$0xe] }
 0x1ac   : > { %v2375_v45 = vmax.f32 %v2359_v57, 0.0  ;;  %v2376_v1 = vmax.f32 %v2360_v36, 0.0  ;;  %v1457_v31 = vsel %vm1427_vm7, %v1454_v48, %v1456_v49  ;;  %v1494_v12 = vadd.f32 %v1455_v13, %v1337_v50 }
 0x1ad   : > { %v1495_v44 = vadd.f32 %v1457_v31, %v1338_v37  ;;  %v1596_v6 = vsel %vm1568_vm8, %v1594_v62, %v1595_v41  ;;  %v1598_v8 = vsel %vm1568_vm8, %v1595_v41, %v1597_v5  ;;  %v1692_v26 = vmul.f32 %v5045_v35, %v4608_v56 }
 0x1ae   : > { %v2391_v15 = vmin.f32 %v2375_v45, 6.0  ;;  %v2392_v16 = vmin.f32 %v2376_v1, 6.0  ;;  %v1635_v17 = vadd.f32 %v1596_v6, %v1494_v12  ;;  %v1726_v58 = vunpack.c.l.bf16 %v1718_v9 }
 0x1af   : > { %v1636_v46 = vadd.f32 %v1598_v8, %v1495_v44  ;;  %v1748_v4 = vmul.f32 %v5042_v43, %v4611_v59  ;;  %v1749_v19 = vmul.f32 %v5045_v35, %v4611_v59  ;;  %v1866_v2 = vunpack.c.l.bf16 %v1858_v38  ;;  %v1365_v44 = vld [vmem:[#allocation2 + $0x50] sm:$0x1] }
 0x1b0   : > { %v2403_v29 = vpack.c.bf16 %v2392_v16, %v2391_v15  ;;  %v1707_v23 = vadd.f32 %v1691_v61, %v1635_v17  ;;  %v1750_v24 = vmul.f32 %v4611_v59, %v1726_v58  ;;  %v1889_v27 = vmul.f32 %v5045_v35, %v4613_v60  ;;  %v1506_v16 = vld [vmem:[#allocation2 + $0x48] sm:$0xe] }
 0x1b1   : > { %v1708_v51 = vadd.f32 %v1692_v26, %v1636_v46  ;;  %v1806_v25 = vrot.slane %v1748_v4, 1  ;;  %v1807_v50 = vrot.slane %v1749_v19, 1  ;;  %v1888_v14 = vmul.f32 %v4613_v60, %v1866_v2 }
 0x1b2   : > { %4253 = vmatprep.mubr.bf16.mxu1 %v2403_v29  ;;  %v1809_v28 = vrot.slane %v1750_v24, 1  ;;  %v1890_v33 = vmul.f32 %v4613_v60, %v1726_v58  ;;  %v1947_v55 = vrot.slane %v1889_v27, 2  ;;  %v2023_v34 = vunpack.c.l.bf16 %v2007_v22 }
 0x1b3   : > { %v1808_v37 = vsel %vm1427_vm7, %v1806_v25, %v1807_v50  ;;  %v1946_v39 = vrot.slane %v1888_v14, 2  ;;  %v2024_v11 = vunpack.c.h.bf16 %v2007_v22  ;;  %v2078_v42 = vunpack.c.l.bf16 %v2070_v21 }
 0x1b4   : > { %v1810_v40 = vsel %vm1427_vm7, %v1807_v50, %v1809_v28  ;;  %v1847_v30 = vadd.f32 %v1808_v37, %v1707_v23  ;;  %v1949_v47 = vrot.slane %v1890_v33, 2  ;;  %v2043_v48 = vmul.f32 %v4615_v63, %v2023_v34  ;;  %v1657_v28 = vld [vmem:[#allocation2 + $0x54] sm:$0xff]  }
 0x1b5   : > { %v1848_v54 = vadd.f32 %v1810_v40, %v1708_v51  ;;  %v1948_v32 = vsel %vm1568_vm8, %v1946_v39, %v1947_v55  ;;  %v2044_v57 = vmul.f32 %v4615_v63, %v2024_v11  ;;  %v2100_v36 = vmul.f32 %v4618_v0, %v2023_v34 }
 0x1b6   : > { %v1950_v49 = vsel %vm1568_vm8, %v1947_v55, %v1949_v47  ;;  %v1987_v61 = vadd.f32 %v1948_v32, %v1847_v30  ;;  %v2101_v13 = vmul.f32 %v4618_v0, %v2024_v11  ;;  %v2102_v62 = vmul.f32 %v4618_v0, %v2078_v42 }
 0x1b7   : > { %v1988_v41 = vadd.f32 %v1950_v49, %v1848_v54  ;;  %v2158_v5 = vrot.slane %v2100_v36, 1  ;;  %v2218_v9 = vunpack.c.l.bf16 %v2210_v52  ;;  %v2241_v45 = vmul.f32 %v4620_v7, %v2024_v11  ;;  %v1719_v36 = vld [vmem:[#allocation2 + $0x5c] sm:$0x1] }
 0x1b8   : > { %v2059_v1 = vadd.f32 %v2043_v48, %v1987_v61  ;;  %v2159_v31 = vrot.slane %v2101_v13, 1  ;;  %v2161_v12 = vrot.slane %v2102_v62, 1  ;;  %v2242_v38 = vmul.f32 %v4620_v7, %v2078_v42 }
 0x1b9   : > { %v2060_v6 = vadd.f32 %v2044_v57, %v1988_v41  ;;  %v2240_v8 = vmul.f32 %v4620_v7, %v2218_v9  ;;  %v2299_v26 = vrot.slane %v2241_v45, 2  ;;  %v1339_v15 = vmul.f32 %v5042_v43, %v4578_v20  ;;  %v1859_v41 = vld [vmem:[#allocation2 + $0x54] sm:$0xe] }
 0x1ba   : > { %v2160_v17 = vsel %vm1427_vm7, %v2158_v5, %v2159_v31  ;;  %v2162_v58 = vsel %vm1427_vm7, %v2159_v31, %v2161_v12  ;;  %v2301_v46 = vrot.slane %v2242_v38, 2  ;;  %v1340_v4 = vmul.f32 %v5045_v35, %v4578_v20 }
 0x1bb   : > { %v2199_v19 = vadd.f32 %v2160_v17, %v2059_v1  ;;  %v2200_v2 = vadd.f32 %v2162_v58, %v2060_v6  ;;  %v2298_v22 = vrot.slane %v2240_v8, 2  ;;  %v1373_v29 = vunpack.c.l.bf16 %v1365_v44 }
 0x1bc   : > { %v2302_v23 = vsel %vm1568_vm8, %v2299_v26, %v2301_v46  ;;  %v1397_v24 = vmul.f32 %v5042_v43, %v4571_v10  ;;  %v1398_v27 = vmul.f32 %v5045_v35, %v4571_v10  ;;  %v1514_v21 = vunpack.c.l.bf16 %v1506_v16  ;;  %v5125_v43 = vld [vmem:[%s5772_s4] ss:$0 sm:$0xff] }
 0x1bd   : > { %v2300_v51 = vsel %vm1568_vm8, %v2298_v22, %v2299_v26  ;;  %v2340_v25 = vadd.f32 %v2302_v23, %v2200_v2  ;;  %v1399_v50 = vmul.f32 %v4571_v10, %v1373_v29  ;;  %v1539_v14 = vmul.f32 %v5045_v35, %v4575_v18  ;;  %v4135_v16 = vld [vmem:[#allocation2 + $0x60] sm:$0xff]  }
 0x1be   : > { %v2339_v33 = vadd.f32 %v2300_v51, %v2199_v19  ;;  %v1458_v55 = vrot.slane %v1397_v24, 1  ;;  %v1459_v34 = vrot.slane %v1398_v27, 1  ;;  %v1538_v37 = vmul.f32 %v4575_v18, %v1514_v21  ;;  %v2071_v19 = vld [vmem:[#allocation2 + $0x68] sm:$0x1] }
 0x1bf   : > { %v2362_v39 = vadd.f32 %v5125_v43, %v2340_v25  ;;  %v1461_v11 = vrot.slane %v1399_v50, 1  ;;  %v1540_v42 = vmul.f32 %v4575_v18, %v1373_v29  ;;  %v1600_v40 = vrot.slane %v1539_v14, 2 }
 0x1c0   : > { %v2361_v30 = vadd.f32 %v5125_v43, %v2339_v33  ;;  %v1460_v35 = vsel %vm1427_vm7, %v1458_v55, %v1459_v34  ;;  %v1599_v47 = vrot.slane %v1538_v37, 2  ;;  %v1673_v48 = vunpack.c.l.bf16 %v1657_v28  ;;  %v2211_v33 = vld [vmem:[#allocation2 + $0x60] sm:$0xe] }
 0x1c1   : > { %v2378_v52 = vmax.f32 %v2362_v39, 0.0  ;;  %v1462_v54 = vsel %vm1427_vm7, %v1459_v34, %v1461_v11  ;;  %v1496_v32 = vadd.f32 %v1460_v35, %v1339_v15  ;;  %v1602_v57 = vrot.slane %v1540_v42, 2 }
 0x1c2   : > { %v2377_v49 = vmax.f32 %v2361_v30, 0.0  ;;  %v1497_v61 = vadd.f32 %v1462_v54, %v1340_v4  ;;  %v1601_v13 = vsel %vm1568_vm8, %v1599_v47, %v1600_v40  ;;  %v1674_v62 = vunpack.c.h.bf16 %v1657_v28  ;;  %v1305_v54 = vld [vmem:[#allocation2 + $0x54] sm:$0xff]  }
 0x1c3   : > { %v2394_v5 = vmin.f32 %v2378_v52, 6.0  ;;  %v1603_v9 = vsel %vm1568_vm8, %v1600_v40, %v1602_v57  ;;  %v1637_v45 = vadd.f32 %v1601_v13, %v1496_v32  ;;  %v1693_v1 = vmul.f32 %v4608_v56, %v1673_v48 }
 0x1c4   : > { %v2393_v31 = vmin.f32 %v2377_v49, 6.0  ;;  %v1638_v12 = vadd.f32 %v1603_v9, %v1497_v61  ;;  %v1694_v38 = vmul.f32 %v4608_v56, %v1674_v62  ;;  %v1727_v44 = vunpack.c.l.bf16 %v1719_v36 }
 0x1c5   : > { %v1709_v6 = vadd.f32 %v1693_v1, %v1637_v45  ;;  %v1751_v8 = vmul.f32 %v4611_v59, %v1673_v48  ;;  %v1752_v26 = vmul.f32 %v4611_v59, %v1674_v62  ;;  %v1867_v15 = vunpack.c.l.bf16 %v1859_v41 }
 0x1c6   : > { %v2404_v17 = vpack.c.bf16 %v2394_v5, %v2393_v31  ;;  %v1710_v58 = vadd.f32 %v1694_v38, %v1638_v12  ;;  %v1753_v46 = vmul.f32 %v4611_v59, %v1727_v44  ;;  %v1892_v4 = vmul.f32 %v4613_v60, %v1674_v62  ;;  %v1366_v31 = vld [vmem:[#allocation2 + $0x5c] sm:$0x1] }
 0x1c7   : > { %v1811_v2 = vrot.slane %v1751_v8, 1  ;;  %v1812_v22 = vrot.slane %v1752_v26, 1  ;;  %v1891_v29 = vmul.f32 %v4613_v60, %v1867_v15  ;;  %v1893_v23 = vmul.f32 %v4613_v60, %v1727_v44  ;;  %v1507_v8 = vld [vmem:[#allocation2 + $0x54] sm:$0xe] }
 0x1c8   : > { %4254 = vmatmul.mubr.bf16.gmra.mrb[8].mxu1 %v2404_v17  ;;  %v1814_v24 = vrot.slane %v1753_v46, 1  ;;  %v1952_v27 = vrot.slane %v1892_v4, 2  ;;  %v5142_v21 = vunpack.c.l.bf16 %v4135_v16  ;;  %v5144_v51 = vunpack.c.h.bf16 %v4135_v16 }
 0x1c9   : > { %v1813_v25 = vsel %vm1427_vm7, %v1811_v2, %v1812_v22  ;;  %v1951_v50 = vrot.slane %v1891_v29, 2  ;;  %v1954_v14 = vrot.slane %v1893_v23, 2  ;;  %v2079_v28 = vunpack.c.l.bf16 %v2071_v19 }
 0x1ca   : > { %v1815_v55 = vsel %vm1427_vm7, %v1812_v22, %v1814_v24  ;;  %v1849_v34 = vadd.f32 %v1813_v25, %v1709_v6  ;;  %v2045_v37 = vmul.f32 %v5142_v21, %v4615_v63  ;;  %v2046_v39 = vmul.f32 %v5144_v51, %v4615_v63 }
 0x1cb   : > { %v1850_v11 = vadd.f32 %v1815_v55, %v1710_v58  ;;  %v1953_v42 = vsel %vm1568_vm8, %v1951_v50, %v1952_v27  ;;  %v1955_v40 = vsel %vm1568_vm8, %v1952_v27, %v1954_v14  ;;  %v2103_v30 = vmul.f32 %v5142_v21, %v4618_v0 }
 0x1cc   : > { %v1989_v35 = vadd.f32 %v1953_v42, %v1849_v34  ;;  %v2104_v47 = vmul.f32 %v5144_v51, %v4618_v0  ;;  %v2105_v48 = vmul.f32 %v4618_v0, %v2079_v28  ;;  %v2219_v52 = vunpack.c.l.bf16 %v2211_v33 }
 0x1cd   : > { %v1990_v32 = vadd.f32 %v1955_v40, %v1850_v11  ;;  %v2163_v57 = vrot.slane %v2103_v30, 1  ;;  %v2244_v36 = vmul.f32 %v5144_v51, %v4620_v7  ;;  %v2245_v49 = vmul.f32 %v4620_v7, %v2079_v28 }
 0x1ce   : > { %v2061_v61 = vadd.f32 %v2045_v37, %v1989_v35  ;;  %v2164_v13 = vrot.slane %v2104_v47, 1  ;;  %v2166_v62 = vrot.slane %v2105_v48, 1  ;;  %v2243_v41 = vmul.f32 %v4620_v7, %v2219_v52  ;;  %v1720_v47 = vld [vmem:[#allocation2 + $0x68] sm:$0x1] }
 0x1cf   : > { %v2062_v5 = vadd.f32 %v2046_v39, %v1990_v32  ;;  %v2304_v9 = vrot.slane %v2244_v36, 2  ;;  %v2306_v45 = vrot.slane %v2245_v49, 2  ;;  %v1321_v1 = vunpack.c.l.bf16 %v1305_v54 }
 0x1d0   : > { %v2165_v12 = vsel %vm1427_vm7, %v2163_v57, %v2164_v13  ;;  %v2167_v38 = vsel %vm1427_vm7, %v2164_v13, %v2166_v62  ;;  %v2303_v44 = vrot.slane %v2243_v41, 2  ;;  %v1322_v6 = vunpack.c.h.bf16 %v1305_v54  ;;  %v1860_v57 = vld [vmem:[#allocation2 + $0x60] sm:$0xe] }
 0x1d1   : > { %v2201_v26 = vadd.f32 %v2165_v12, %v2061_v61  ;;  %v2202_v15 = vadd.f32 %v2167_v38, %v2062_v5  ;;  %v2307_v16 = vsel %vm1568_vm8, %v2304_v9, %v2306_v45  ;;  %v1341_v17 = vmul.f32 %v4578_v20, %v1321_v1  ;;  %v2011_v38 = vld [vmem:[#allocation2 + $0x6c] sm:$0xff]  }
 0x1d2   : > { %v2305_v58 = vsel %vm1568_vm8, %v2303_v44, %v2304_v9  ;;  %v1342_v46 = vmul.f32 %v4578_v20, %v1322_v6  ;;  %v1374_v4 = vunpack.c.l.bf16 %v1366_v31  ;;  %v1400_v19 = vmul.f32 %v4571_v10, %v1321_v1 }
 0x1d3   : > { %v2341_v2 = vadd.f32 %v2305_v58, %v2201_v26  ;;  %v2342_v22 = vadd.f32 %v2307_v16, %v2202_v15  ;;  %v1401_v29 = vmul.f32 %v4571_v10, %v1322_v6  ;;  %v1515_v23 = vunpack.c.l.bf16 %v1507_v8  ;;  %v2072_v15 = vld [vmem:[#allocation2 + $0x74] sm:$0x1] }
 0x1d4   : > { %v1402_v24 = vmul.f32 %v4571_v10, %v1374_v4  ;;  %v1463_v27 = vrot.slane %v1400_v19, 1  ;;  %v1542_v25 = vmul.f32 %v4575_v18, %v1322_v6  ;;  %v1543_v50 = vmul.f32 %v4575_v18, %v1374_v4 }
 0x1d5   : > { %v2363_v14 = vadd.f32 %v5125_v43, %v2341_v2  ;;  %v2364_v28 = vadd.f32 %v5125_v43, %v2342_v22  ;;  %v1464_v33 = vrot.slane %v1401_v29, 1  ;;  %v1541_v55 = vmul.f32 %v4575_v18, %v1515_v23 }
 0x1d6   : > { %v1466_v34 = vrot.slane %v1402_v24, 1  ;;  %v1605_v37 = vrot.slane %v1542_v25, 2  ;;  %v1607_v39 = vrot.slane %v1543_v50, 2  ;;  %v1695_v11 = vmul.f32 %v5142_v21, %v4608_v56  ;;  %v2212_v25 = vld [vmem:[#allocation2 + $0x6c] sm:$0xe] }
 0x1d7   : > { %v2379_v42 = vmax.f32 %v2363_v14, 0.0  ;;  %v2380_v40 = vmax.f32 %v2364_v28, 0.0  ;;  %v1465_v30 = vsel %vm1427_vm7, %v1463_v27, %v1464_v33  ;;  %v1604_v35 = vrot.slane %v1541_v55, 2 }
 0x1d8   : > { %v1467_v48 = vsel %vm1427_vm7, %v1464_v33, %v1466_v34  ;;  %v1498_v52 = vadd.f32 %v1465_v30, %v1341_v17  ;;  %v1608_v54 = vsel %vm1568_vm8, %v1605_v37, %v1607_v39  ;;  %v1696_v32 = vmul.f32 %v5144_v51, %v4608_v56 }
 0x1d9   : > { %v2395_v36 = vmin.f32 %v2379_v42, 6.0  ;;  %v2396_v49 = vmin.f32 %v2380_v40, 6.0  ;;  %v1499_v61 = vadd.f32 %v1467_v48, %v1342_v46  ;;  %v1606_v13 = vsel %vm1568_vm8, %v1604_v35, %v1605_v37 }
 0x1da   : > { %v1639_v62 = vadd.f32 %v1606_v13, %v1498_v52  ;;  %v1728_v41 = vunpack.c.l.bf16 %v1720_v47  ;;  %v1754_v5 = vmul.f32 %v5142_v21, %v4611_v59  ;;  %v1755_v9 = vmul.f32 %v5144_v51, %v4611_v59 }
 0x1db   : > { %v2405_v45 = vpack.c.bf16 %v2396_v49, %v2395_v36  ;;  %v1640_v1 = vadd.f32 %v1608_v54, %v1499_v61  ;;  %v1868_v31 = vunpack.c.l.bf16 %v1860_v57  ;;  %v1895_v12 = vmul.f32 %v5144_v51, %v4613_v60  ;;  %v2676_v49 = vld [vmem:[#allocation2 + $0x68] sm:$0x1] }
 0x1dc   : > { %v1711_v44 = vadd.f32 %v1695_v11, %v1639_v62  ;;  %v1756_v6 = vmul.f32 %v4611_v59, %v1728_v41  ;;  %v1816_v8 = vrot.slane %v1754_v5, 1  ;;  %v1817_v26 = vrot.slane %v1755_v9, 1  ;;  %v2812_v5 = vld [vmem:[#allocation2 + $0x60] sm:$0xe] }
 0x1dd   : > { %4257 = vmatprep.mubr.bf16.mxu1 %v2405_v45  ;;  %v1712_v16 = vadd.f32 %v1696_v32, %v1640_v1  ;;  %v1894_v17 = vmul.f32 %v4613_v60, %v1868_v31  ;;  %v1896_v58 = vmul.f32 %v4613_v60, %v1728_v41  ;;  %v1957_v46 = vrot.slane %v1895_v12, 2 }
 0x1de   : > { %v1818_v4 = vsel %vm1427_vm7, %v1816_v8, %v1817_v26  ;;  %v1819_v19 = vrot.slane %v1756_v6, 1  ;;  %v2027_v2 = vunpack.c.l.bf16 %v2011_v38  ;;  %v2028_v22 = vunpack.c.h.bf16 %v2011_v38 }
 0x1df   : > { %v1851_v29 = vadd.f32 %v1818_v4, %v1711_v44  ;;  %v1956_v23 = vrot.slane %v1894_v17, 2  ;;  %v1959_v24 = vrot.slane %v1896_v58, 2  ;;  %v2080_v27 = vunpack.c.l.bf16 %v2072_v15  ;;  %v2952_v17 = vld [vmem:[#allocation2 + $0x6c] sm:$0xff]  }
 0x1e0   : > { %v1820_v50 = vsel %vm1427_vm7, %v1817_v26, %v1819_v19  ;;  %v2047_v14 = vmul.f32 %v4615_v63, %v2027_v2  ;;  %v2048_v28 = vmul.f32 %v4615_v63, %v2028_v22  ;;  %v2106_v33 = vmul.f32 %v4618_v0, %v2027_v2 }
 0x1e1   : > { %v1852_v55 = vadd.f32 %v1820_v50, %v1712_v16  ;;  %v1958_v34 = vsel %vm1568_vm8, %v1956_v23, %v1957_v46  ;;  %v1960_v37 = vsel %vm1568_vm8, %v1957_v46, %v1959_v24  ;;  %v2107_v39 = vmul.f32 %v4618_v0, %v2028_v22 }
 0x1e2   : > { %v1991_v11 = vadd.f32 %v1958_v34, %v1851_v29  ;;  %v2108_v42 = vmul.f32 %v4618_v0, %v2080_v27  ;;  %v2168_v40 = vrot.slane %v2106_v33, 1  ;;  %v2220_v30 = vunpack.c.l.bf16 %v2212_v25 }
 0x1e3   : > { %v1992_v35 = vadd.f32 %v1960_v37, %v1852_v55  ;;  %v2169_v47 = vrot.slane %v2107_v39, 1  ;;  %v2247_v48 = vmul.f32 %v4620_v7, %v2028_v22  ;;  %v2248_v52 = vmul.f32 %v4620_v7, %v2080_v27  ;;  %v3016_v39 = vld [vmem:[#allocation2 + $0x74] sm:$0x1] }
 0x1e4   : > { %v2063_v54 = vadd.f32 %v2047_v14, %v1991_v11  ;;  %v2171_v32 = vrot.slane %v2108_v42, 1  ;;  %v2246_v57 = vmul.f32 %v4620_v7, %v2220_v30  ;;  %v2644_v36 = vmul.f32 %v5142_v21, %v4578_v20 }
 0x1e5   : > { %v2064_v61 = vadd.f32 %v2048_v28, %v1992_v35  ;;  %v2170_v13 = vsel %vm1427_vm7, %v2168_v40, %v2169_v47  ;;  %v2309_v62 = vrot.slane %v2247_v48, 2  ;;  %v2311_v41 = vrot.slane %v2248_v52, 2  ;;  %v3152_v35 = vld [vmem:[#allocation2 + $0x6c] sm:$0xe] }
 0x1e6   : > { %v2172_v9 = vsel %vm1427_vm7, %v2169_v47, %v2171_v32  ;;  %v2203_v45 = vadd.f32 %v2170_v13, %v2063_v54  ;;  %v2308_v1 = vrot.slane %v2246_v57, 2  ;;  %v2645_v31 = vmul.f32 %v5144_v51, %v4578_v20 }
 0x1e7   : > { %v2204_v12 = vadd.f32 %v2172_v9, %v2064_v61  ;;  %v2312_v38 = vsel %vm1568_vm8, %v2309_v62, %v2311_v41  ;;  %v2684_v44 = vunpack.c.l.bf16 %v2676_v49  ;;  %v2692_v6 = vmul.f32 %v5142_v21, %v4571_v10  ;;  %v4111_v61 = vld [vmem:[#allocation2 + $0x78] sm:$0xff]   ;;  %v3356_v9 = vld [vmem:[#allocation2 + $0x80] sm:$0x1] }
 0x1e8   : > { %v2310_v8 = vsel %vm1568_vm8, %v2308_v1, %v2309_v62  ;;  %v2693_v26 = vmul.f32 %v5144_v51, %v4571_v10  ;;  %v2820_v15 = vunpack.c.l.bf16 %v2812_v5  ;;  %v2829_v16 = vmul.f32 %v5144_v51, %v4575_v18 }
 0x1e9   : > { %v2343_v58 = vadd.f32 %v2310_v8, %v2203_v45  ;;  %v2344_v46 = vadd.f32 %v2312_v38, %v2204_v12  ;;  %v2694_v4 = vmul.f32 %v2684_v44, %v4571_v10  ;;  %v2740_v19 = vrot.slane %v2692_v6, 1 }
 0x1ea   : > { %v2741_v2 = vrot.slane %v2693_v26, 1  ;;  %v2828_v22 = vmul.f32 %v2820_v15, %v4575_v18  ;;  %v2830_v21 = vmul.f32 %v2684_v44, %v4575_v18  ;;  %v2877_v29 = vrot.slane %v2829_v16, 2 }
 0x1eb   : > { %v2365_v23 = vadd.f32 %v5125_v43, %v2343_v58  ;;  %v2366_v24 = vadd.f32 %v5125_v43, %v2344_v46  ;;  %v2743_v27 = vrot.slane %v2694_v4, 1  ;;  %v2968_v25 = vunpack.c.l.bf16 %v2952_v17 }
 0x1ec   : > { %v2742_v51 = vsel %vm1427_vm7, %v2740_v19, %v2741_v2  ;;  %v2876_v50 = vrot.slane %v2828_v22, 2  ;;  %v2879_v14 = vrot.slane %v2830_v21, 2  ;;  %v2969_v28 = vunpack.c.h.bf16 %v2952_v17 }
 0x1ed   : > { %v2381_v33 = vmax.f32 %v2365_v23, 0.0  ;;  %v2382_v55 = vmax.f32 %v2366_v24, 0.0  ;;  %v2744_v34 = vsel %vm1427_vm7, %v2741_v2, %v2743_v27  ;;  %v2796_v37 = vadd.f32 %v2742_v51, %v2644_v36  ;;  %v3492_v2 = vld [vmem:[#allocation2 + $0x78] sm:$0xe] }
 0x1ee   : > { %v2797_v11 = vadd.f32 %v2744_v34, %v2645_v31  ;;  %v2878_v42 = vsel %vm1568_vm8, %v2876_v50, %v2877_v29  ;;  %v2880_v40 = vsel %vm1568_vm8, %v2877_v29, %v2879_v14  ;;  %v2984_v30 = vmul.f32 %v2968_v25, %v4608_v56  ;;  %v2614_v50 = vld [vmem:[#allocation2 + $0x6c] sm:$0xff]  }
 0x1ef   : > { %v2397_v47 = vmin.f32 %v2381_v33, 6.0  ;;  %v2398_v48 = vmin.f32 %v2382_v55, 6.0  ;;  %v2932_v52 = vadd.f32 %v2878_v42, %v2796_v37  ;;  %v2985_v54 = vmul.f32 %v2969_v28, %v4608_v56 }
 0x1f0   : > { %v2933_v32 = vadd.f32 %v2880_v40, %v2797_v11  ;;  %v3024_v57 = vunpack.c.l.bf16 %v3016_v39  ;;  %v3032_v49 = vmul.f32 %v2968_v25, %v4611_v59  ;;  %v3033_v36 = vmul.f32 %v2969_v28, %v4611_v59 }
 0x1f1   : > { %v2406_v13 = vpack.c.bf16 %v2398_v48, %v2397_v47  ;;  %v3000_v62 = vadd.f32 %v2984_v30, %v2932_v52  ;;  %v3160_v41 = vunpack.c.l.bf16 %v3152_v35  ;;  %v3169_v5 = vmul.f32 %v2969_v28, %v4613_v60  ;;  %v2677_v47 = vld [vmem:[#allocation2 + $0x74] sm:$0x1] }
 0x1f2   : > { %v3001_v45 = vadd.f32 %v2985_v54, %v2933_v32  ;;  %v3034_v1 = vmul.f32 %v3024_v57, %v4611_v59  ;;  %v3080_v31 = vrot.slane %v3032_v49, 1  ;;  %v3081_v12 = vrot.slane %v3033_v36, 1 }
 0x1f3   : > { %4258 = vmatmul.mubr.bf16.gmra.mrb[12].mxu1 %v2406_v13  ;;  %v3168_v38 = vmul.f32 %v3160_v41, %v4613_v60  ;;  %v3170_v44 = vmul.f32 %v3024_v57, %v4613_v60  ;;  %v3217_v6 = vrot.slane %v3169_v5, 2  ;;  %v5237_v8 = vunpack.c.l.bf16 %v4111_v61  ;;  %v2813_v57 = vld [vmem:[#allocation2 + $0x6c] sm:$0xe] }
 0x1f4   : > { %v3082_v26 = vsel %vm1427_vm7, %v3080_v31, %v3081_v12  ;;  %v3083_v15 = vrot.slane %v3034_v1, 1  ;;  %v5240_v16 = vunpack.c.h.bf16 %v4111_v61  ;;  %v3364_v17 = vunpack.c.l.bf16 %v3356_v9 }
 0x1f5   : > { %v3136_v58 = vadd.f32 %v3082_v26, %v3000_v62  ;;  %v3216_v46 = vrot.slane %v3168_v38, 2  ;;  %v3219_v4 = vrot.slane %v3170_v44, 2  ;;  %v3324_v19 = vmul.f32 %v5237_v8, %v4615_v63 }
 0x1f6   : > { %v3084_v22 = vsel %vm1427_vm7, %v3081_v12, %v3083_v15  ;;  %v3325_v21 = vmul.f32 %v5240_v16, %v4615_v63  ;;  %v3372_v29 = vmul.f32 %v5237_v8, %v4618_v0  ;;  %v3373_v23 = vmul.f32 %v5240_v16, %v4618_v0 }
 0x1f7   : > { %v3137_v24 = vadd.f32 %v3084_v22, %v3001_v45  ;;  %v3218_v27 = vsel %vm1568_vm8, %v3216_v46, %v3217_v6  ;;  %v3220_v25 = vsel %vm1568_vm8, %v3217_v6, %v3219_v4  ;;  %v3374_v51 = vmul.f32 %v3364_v17, %v4618_v0 }
 0x1f8   : > { %v3272_v14 = vadd.f32 %v3218_v27, %v3136_v58  ;;  %v3420_v28 = vrot.slane %v3372_v29, 1  ;;  %v3421_v33 = vrot.slane %v3373_v23, 1  ;;  %v3500_v55 = vunpack.c.l.bf16 %v3492_v2  ;;  %v3017_v27 = vld [vmem:[#allocation2 + $0x80] sm:$0x1] }
 0x1f9   : > { %v3273_v34 = vadd.f32 %v3220_v25, %v3137_v24  ;;  %v3423_v37 = vrot.slane %v3374_v51, 1  ;;  %v3509_v39 = vmul.f32 %v5240_v16, %v4620_v7  ;;  %v3510_v11 = vmul.f32 %v3364_v17, %v4620_v7 }
 0x1fa   : > { %v3340_v42 = vadd.f32 %v3324_v19, %v3272_v14  ;;  %v3422_v40 = vsel %vm1427_vm7, %v3420_v28, %v3421_v33  ;;  %v3508_v30 = vmul.f32 %v3500_v55, %v4620_v7  ;;  %v2630_v35 = vunpack.c.l.bf16 %v2614_v50  ;;  %v3153_v28 = vld [vmem:[#allocation2 + $0x78] sm:$0xe] }
 0x1fb   : > { %v3341_v48 = vadd.f32 %v3325_v21, %v3273_v34  ;;  %v3424_v52 = vsel %vm1427_vm7, %v3421_v33, %v3423_v37  ;;  %v3557_v54 = vrot.slane %v3509_v39, 2  ;;  %v3559_v32 = vrot.slane %v3510_v11, 2 }
 0x1fc   : > { %v3476_v49 = vadd.f32 %v3422_v40, %v3340_v42  ;;  %v3556_v36 = vrot.slane %v3508_v30, 2  ;;  %v2631_v61 = vunpack.c.h.bf16 %v2614_v50  ;;  %v2646_v13 = vmul.f32 %v2630_v35, %v4578_v20 }
 0x1fd   : > { %v3477_v62 = vadd.f32 %v3424_v52, %v3341_v48  ;;  %v3560_v41 = vsel %vm1568_vm8, %v3557_v54, %v3559_v32  ;;  %v2685_v5 = vunpack.c.l.bf16 %v2677_v47  ;;  %v2695_v9 = vmul.f32 %v2630_v35, %v4571_v10  ;;  %v3294_v52 = vld [vmem:[#allocation2 + $0x84] sm:$0xff]  }
 0x1fe   : > { %v3558_v45 = vsel %vm1568_vm8, %v3556_v36, %v3557_v54  ;;  %v2647_v1 = vmul.f32 %v2631_v61, %v4578_v20  ;;  %v2696_v31 = vmul.f32 %v2631_v61, %v4571_v10  ;;  %v2821_v12 = vunpack.c.l.bf16 %v2813_v57  ;;  %v3357_v36 = vld [vmem:[#allocation2 + $0x8c] sm:$0x1] }
 0x1ff   : > { %v3612_v38 = vadd.f32 %v3558_v45, %v3476_v49  ;;  %v3613_v44 = vadd.f32 %v3560_v41, %v3477_v62  ;;  %v2697_v6 = vmul.f32 %v2685_v5, %v4571_v10  ;;  %v2745_v26 = vrot.slane %v2695_v9, 1 }
 0x200   : > { %v2746_v15 = vrot.slane %v2696_v31, 1  ;;  %v2831_v17 = vmul.f32 %v2821_v12, %v4575_v18  ;;  %v2832_v58 = vmul.f32 %v2631_v61, %v4575_v18  ;;  %v2833_v46 = vmul.f32 %v2685_v5, %v4575_v18 }
 0x201   : > { %v3628_v4 = vadd.f32 %v5125_v43, %v3612_v38  ;;  %v3629_v19 = vadd.f32 %v5125_v43, %v3613_v44  ;;  %v2748_v2 = vrot.slane %v2697_v6, 1  ;;  %v2986_v22 = vmul.f32 %v5237_v8, %v4608_v56 }
 0x202   : > { %v2747_v21 = vsel %vm1427_vm7, %v2745_v26, %v2746_v15  ;;  %v2881_v29 = vrot.slane %v2831_v17, 2  ;;  %v2882_v23 = vrot.slane %v2832_v58, 2  ;;  %v2884_v24 = vrot.slane %v2833_v46, 2  ;;  %v3493_v58 = vld [vmem:[#allocation2 + $0x84] sm:$0xe] }
 0x203   : > { %v3644_v25 = vmax.f32 %v3628_v4, 0.0  ;;  %v3645_v51 = vmax.f32 %v3629_v19, 0.0  ;;  %v2749_v50 = vsel %vm1427_vm7, %v2746_v15, %v2748_v2  ;;  %v2798_v14 = vadd.f32 %v2747_v21, %v2646_v13 }
 0x204   : > { %v2799_v33 = vadd.f32 %v2749_v50, %v2647_v1  ;;  %v2883_v55 = vsel %vm1568_vm8, %v2881_v29, %v2882_v23  ;;  %v2885_v34 = vsel %vm1568_vm8, %v2882_v23, %v2884_v24  ;;  %v2987_v37 = vmul.f32 %v5240_v16, %v4608_v56 }
 0x205   : > { %v3660_v39 = vmin.f32 %v3644_v25, 6.0  ;;  %v3661_v11 = vmin.f32 %v3645_v51, 6.0  ;;  %v2934_v42 = vadd.f32 %v2883_v55, %v2798_v14  ;;  %v3025_v40 = vunpack.c.l.bf16 %v3017_v27  ;;  %v2678_v55 = vld [vmem:[#allocation2 + $0x80] sm:$0x1] }
 0x206   : > { %v2935_v30 = vadd.f32 %v2885_v34, %v2799_v33  ;;  %v3035_v35 = vmul.f32 %v5237_v8, %v4611_v59  ;;  %v3036_v47 = vmul.f32 %v5240_v16, %v4611_v59  ;;  %v3161_v48 = vunpack.c.l.bf16 %v3153_v28 }
 0x207   : > { %v3676_v54 = vpack.c.bf16 %v3661_v11, %v3660_v39  ;;  %v3002_v32 = vadd.f32 %v2986_v22, %v2934_v42  ;;  %v3037_v57 = vmul.f32 %v3025_v40, %v4611_v59  ;;  %v3172_v49 = vmul.f32 %v5240_v16, %v4613_v60  ;;  %v2814_v42 = vld [vmem:[#allocation2 + $0x78] sm:$0xe] }
 0x208   : > { %v3003_v61 = vadd.f32 %v2987_v37, %v2935_v30  ;;  %v3085_v13 = vrot.slane %v3035_v35, 1  ;;  %v3086_v62 = vrot.slane %v3036_v47, 1  ;;  %v3171_v41 = vmul.f32 %v3161_v48, %v4613_v60 }
 0x209   : > { %4277 = vmatprep.mubr.bf16.mxu0 %v3676_v54  ;;  %v3088_v5 = vrot.slane %v3037_v57, 1  ;;  %v3173_v9 = vmul.f32 %v3025_v40, %v4613_v60  ;;  %v3222_v45 = vrot.slane %v3172_v49, 2  ;;  %v3310_v1 = vunpack.c.l.bf16 %v3294_v52 }
 0x20a   : > { %v3087_v31 = vsel %vm1427_vm7, %v3085_v13, %v3086_v62  ;;  %v3221_v12 = vrot.slane %v3171_v41, 2  ;;  %v3311_v38 = vunpack.c.h.bf16 %v3294_v52  ;;  %v3365_v44 = vunpack.c.l.bf16 %v3357_v36 }
 0x20b   : > { %v3089_v6 = vsel %vm1427_vm7, %v3086_v62, %v3088_v5  ;;  %v3138_v26 = vadd.f32 %v3087_v31, %v3002_v32  ;;  %v3224_v15 = vrot.slane %v3173_v9, 2  ;;  %v3326_v17 = vmul.f32 %v3310_v1, %v4615_v63  ;;  %v2956_v9 = vld [vmem:[#allocation2 + $0x84] sm:$0xff]  }
 0x20c   : > { %v3139_v46 = vadd.f32 %v3089_v6, %v3003_v61  ;;  %v3223_v4 = vsel %vm1568_vm8, %v3221_v12, %v3222_v45  ;;  %v3327_v19 = vmul.f32 %v3311_v38, %v4615_v63  ;;  %v3375_v2 = vmul.f32 %v3310_v1, %v4618_v0 }
 0x20d   : > { %v3225_v22 = vsel %vm1568_vm8, %v3222_v45, %v3224_v15  ;;  %v3274_v21 = vadd.f32 %v3223_v4, %v3138_v26  ;;  %v3376_v29 = vmul.f32 %v3311_v38, %v4618_v0  ;;  %v3377_v23 = vmul.f32 %v3365_v44, %v4618_v0 }
 0x20e   : > { %v3275_v24 = vadd.f32 %v3225_v22, %v3139_v46  ;;  %v3425_v27 = vrot.slane %v3375_v2, 1  ;;  %v3501_v25 = vunpack.c.l.bf16 %v3493_v58  ;;  %v3512_v51 = vmul.f32 %v3311_v38, %v4620_v7  ;;  %v3018_v2 = vld [vmem:[#allocation2 + $0x8c] sm:$0x1] }
 0x20f   : > { %v3342_v50 = vadd.f32 %v3326_v17, %v3274_v21  ;;  %v3426_v14 = vrot.slane %v3376_v29, 1  ;;  %v3428_v28 = vrot.slane %v3377_v23, 1  ;;  %v3513_v33 = vmul.f32 %v3365_v44, %v4620_v7 }
 0x210   : > { %v3343_v34 = vadd.f32 %v3327_v19, %v3275_v24  ;;  %v3511_v37 = vmul.f32 %v3501_v25, %v4620_v7  ;;  %v3562_v39 = vrot.slane %v3512_v51, 2  ;;  %v2648_v11 = vmul.f32 %v5237_v8, %v4578_v20  ;;  %v3154_v24 = vld [vmem:[#allocation2 + $0x84] sm:$0xe] }
 0x211   : > { %v3427_v40 = vsel %vm1427_vm7, %v3425_v27, %v3426_v14  ;;  %v3429_v30 = vsel %vm1427_vm7, %v3426_v14, %v3428_v28  ;;  %v3564_v35 = vrot.slane %v3513_v33, 2  ;;  %v2649_v47 = vmul.f32 %v5240_v16, %v4578_v20 }
 0x212   : > { %v3478_v48 = vadd.f32 %v3427_v40, %v3342_v50  ;;  %v3479_v52 = vadd.f32 %v3429_v30, %v3343_v34  ;;  %v3561_v54 = vrot.slane %v3511_v37, 2  ;;  %v2686_v32 = vunpack.c.l.bf16 %v2678_v55 }
 0x213   : > { %v3565_v57 = vsel %vm1568_vm8, %v3562_v39, %v3564_v35  ;;  %v2698_v49 = vmul.f32 %v5237_v8, %v4571_v10  ;;  %v2699_v36 = vmul.f32 %v5240_v16, %v4571_v10  ;;  %v2822_v61 = vunpack.c.l.bf16 %v2814_v42  ;;  %v4143_v42 = vld [vmem:[#allocation2 + $0x90] sm:$0xff]  }
 0x214   : > { %v3563_v13 = vsel %vm1568_vm8, %v3561_v54, %v3562_v39  ;;  %v3615_v62 = vadd.f32 %v3565_v57, %v3479_v52  ;;  %v2700_v41 = vmul.f32 %v2686_v32, %v4571_v10  ;;  %v2835_v5 = vmul.f32 %v5240_v16, %v4575_v18 }
 0x215   : > { %v3614_v45 = vadd.f32 %v3563_v13, %v3478_v48  ;;  %v2750_v1 = vrot.slane %v2698_v49, 1  ;;  %v2751_v31 = vrot.slane %v2699_v36, 1  ;;  %v2834_v12 = vmul.f32 %v2822_v61, %v4575_v18  ;;  %v3358_v48 = vld [vmem:[#allocation2 + $0x98] sm:$0x1] }
 0x216   : > { %v3631_v8 = vadd.f32 %v5125_v43, %v3615_v62  ;;  %v2753_v38 = vrot.slane %v2700_v41, 1  ;;  %v2836_v44 = vmul.f32 %v2686_v32, %v4575_v18  ;;  %v2887_v6 = vrot.slane %v2835_v5, 2 }
 0x217   : > { %v3630_v26 = vadd.f32 %v5125_v43, %v3614_v45  ;;  %v2752_v15 = vsel %vm1427_vm7, %v2750_v1, %v2751_v31  ;;  %v2886_v17 = vrot.slane %v2834_v12, 2  ;;  %v2972_v58 = vunpack.c.l.bf16 %v2956_v9  ;;  %v3494_v45 = vld [vmem:[#allocation2 + $0x90] sm:$0xe] }
 0x218   : > { %v3647_v46 = vmax.f32 %v3631_v8, 0.0  ;;  %v2754_v16 = vsel %vm1427_vm7, %v2751_v31, %v2753_v38  ;;  %v2800_v4 = vadd.f32 %v2752_v15, %v2648_v11  ;;  %v2889_v19 = vrot.slane %v2836_v44, 2 }
 0x219   : > { %v3646_v22 = vmax.f32 %v3630_v26, 0.0  ;;  %v2801_v21 = vadd.f32 %v2754_v16, %v2649_v47  ;;  %v2888_v29 = vsel %vm1568_vm8, %v2886_v17, %v2887_v6  ;;  %v2973_v23 = vunpack.c.h.bf16 %v2956_v9  ;;  %v2618_v16 = vld [vmem:[#allocation2 + $0x84] sm:$0xff]  }
 0x21a   : > { %v3663_v27 = vmin.f32 %v3647_v46, 6.0  ;;  %v2890_v25 = vsel %vm1568_vm8, %v2887_v6, %v2889_v19  ;;  %v2936_v51 = vadd.f32 %v2888_v29, %v2800_v4  ;;  %v2988_v50 = vmul.f32 %v2972_v58, %v4608_v56 }
 0x21b   : > { %v3662_v14 = vmin.f32 %v3646_v22, 6.0  ;;  %v2937_v28 = vadd.f32 %v2890_v25, %v2801_v21  ;;  %v2989_v33 = vmul.f32 %v2973_v23, %v4608_v56  ;;  %v3026_v55 = vunpack.c.l.bf16 %v3018_v2 }
 0x21c   : > { %v3004_v34 = vadd.f32 %v2988_v50, %v2936_v51  ;;  %v3038_v37 = vmul.f32 %v2972_v58, %v4611_v59  ;;  %v3039_v39 = vmul.f32 %v2973_v23, %v4611_v59  ;;  %v3162_v11 = vunpack.c.l.bf16 %v3154_v24 }
 0x21d   : > { %v3677_v40 = vpack.c.bf16 %v3663_v27, %v3662_v14  ;;  %v3005_v30 = vadd.f32 %v2989_v33, %v2937_v28  ;;  %v3040_v35 = vmul.f32 %v3026_v55, %v4611_v59  ;;  %v3175_v47 = vmul.f32 %v2973_v23, %v4613_v60  ;;  %v2679_v14 = vld [vmem:[#allocation2 + $0x8c] sm:$0x1] }
 0x21e   : > { %v3090_v52 = vrot.slane %v3038_v37, 1  ;;  %v3091_v54 = vrot.slane %v3039_v39, 1  ;;  %v3174_v32 = vmul.f32 %v3162_v11, %v4613_v60  ;;  %v3176_v57 = vmul.f32 %v3026_v55, %v4613_v60  ;;  %v2815_v37 = vld [vmem:[#allocation2 + $0x84] sm:$0xe] }
 0x21f   : > { %4278 = vmatmul.mubr.bf16.vlgmr.msra.gmra.mrb[32].mxu0 %v3677_v40  ;;  %v3093_v49 = vrot.slane %v3040_v35, 1  ;;  %v3227_v36 = vrot.slane %v3175_v47, 2  ;;  %v5332_v61 = vunpack.c.l.bf16 %v4143_v42  ;;  %v5334_v13 = vunpack.c.h.bf16 %v4143_v42 }
 0x220   : > { %v3092_v62 = vsel %vm1427_vm7, %v3090_v52, %v3091_v54  ;;  %v3226_v41 = vrot.slane %v3174_v32, 2  ;;  %v3229_v5 = vrot.slane %v3176_v57, 2  ;;  %v3366_v9 = vunpack.c.l.bf16 %v3358_v48 }
 0x221   : > { %v3094_v1 = vsel %vm1427_vm7, %v3091_v54, %v3093_v49  ;;  %v3140_v31 = vadd.f32 %v3092_v62, %v3004_v34  ;;  %v3328_v12 = vmul.f32 %v5332_v61, %v4615_v63  ;;  %v3329_v8 = vmul.f32 %v5334_v13, %v4615_v63 }
 0x222   : > { %v3141_v38 = vadd.f32 %v3094_v1, %v3005_v30  ;;  %v3228_v44 = vsel %vm1568_vm8, %v3226_v41, %v3227_v36  ;;  %v3230_v6 = vsel %vm1568_vm8, %v3227_v36, %v3229_v5  ;;  %v3378_v26 = vmul.f32 %v5332_v61, %v4618_v0 }
 0x223   : > { %v3276_v15 = vadd.f32 %v3228_v44, %v3140_v31  ;;  %v3379_v17 = vmul.f32 %v5334_v13, %v4618_v0  ;;  %v3380_v58 = vmul.f32 %v3366_v9, %v4618_v0  ;;  %v3502_v46 = vunpack.c.l.bf16 %v3494_v45 }
 0x224   : > { %v3277_v4 = vadd.f32 %v3230_v6, %v3141_v38  ;;  %v3430_v19 = vrot.slane %v3378_v26, 1  ;;  %v3515_v2 = vmul.f32 %v5334_v13, %v4620_v7  ;;  %v3516_v22 = vmul.f32 %v3366_v9, %v4620_v7 }
 0x225   : > { %v3344_v21 = vadd.f32 %v3328_v12, %v3276_v15  ;;  %v3431_v29 = vrot.slane %v3379_v17, 1  ;;  %v3433_v23 = vrot.slane %v3380_v58, 1  ;;  %v3514_v24 = vmul.f32 %v3502_v46, %v4620_v7  ;;  %v3019_v17 = vld [vmem:[#allocation2 + $0x98] sm:$0x1] }
 0x226   : > { %v3345_v27 = vadd.f32 %v3329_v8, %v3277_v4  ;;  %v3567_v25 = vrot.slane %v3515_v2, 2  ;;  %v3569_v51 = vrot.slane %v3516_v22, 2  ;;  %v2634_v50 = vunpack.c.l.bf16 %v2618_v16  ;;  %v3155_v4 = vld [vmem:[#allocation2 + $0x90] sm:$0xe] }
 0x227   : > { %v3432_v28 = vsel %vm1427_vm7, %v3430_v19, %v3431_v29  ;;  %v3434_v33 = vsel %vm1427_vm7, %v3431_v29, %v3433_v23  ;;  %v3566_v55 = vrot.slane %v3514_v24, 2  ;;  %v2635_v34 = vunpack.c.h.bf16 %v2618_v16 }
 0x228   : > { %v3480_v39 = vadd.f32 %v3432_v28, %v3344_v21  ;;  %v3481_v11 = vadd.f32 %v3434_v33, %v3345_v27  ;;  %v3570_v42 = vsel %vm1568_vm8, %v3567_v25, %v3569_v51  ;;  %v2650_v40 = vmul.f32 %v2634_v50, %v4578_v20  ;;  %v3298_v28 = vld [vmem:[#allocation2 + $0x9c] sm:$0xff]  }
 0x229   : > { %v3568_v30 = vsel %vm1568_vm8, %v3566_v55, %v3567_v25  ;;  %v2651_v35 = vmul.f32 %v2635_v34, %v4578_v20  ;;  %v2687_v47 = vunpack.c.l.bf16 %v2679_v14  ;;  %v2701_v48 = vmul.f32 %v2634_v50, %v4571_v10 }
 0x22a   : > { %v3616_v52 = vadd.f32 %v3568_v30, %v3480_v39  ;;  %v3617_v54 = vadd.f32 %v3570_v42, %v3481_v11  ;;  %v2702_v32 = vmul.f32 %v2635_v34, %v4571_v10  ;;  %v2823_v57 = vunpack.c.l.bf16 %v2815_v37  ;;  %v3359_v39 = vld [vmem:[#allocation2 + $0xa4] sm:$0x1] }
 0x22b   : > { %v2703_v49 = vmul.f32 %v2687_v47, %v4571_v10  ;;  %v2755_v36 = vrot.slane %v2701_v48, 1  ;;  %v2838_v62 = vmul.f32 %v2635_v34, %v4575_v18  ;;  %v2839_v41 = vmul.f32 %v2687_v47, %v4575_v18 }
 0x22c   : > { %v3632_v5 = vadd.f32 %v5125_v43, %v3616_v52  ;;  %v3633_v9 = vadd.f32 %v5125_v43, %v3617_v54  ;;  %v2756_v45 = vrot.slane %v2702_v32, 1  ;;  %v2837_v1 = vmul.f32 %v2823_v57, %v4575_v18 }
 0x22d   : > { %v2758_v31 = vrot.slane %v2703_v49, 1  ;;  %v2892_v12 = vrot.slane %v2838_v62, 2  ;;  %v2894_v8 = vrot.slane %v2839_v41, 2  ;;  %v2990_v38 = vmul.f32 %v5332_v61, %v4608_v56 }
 0x22e   : > { %v3648_v44 = vmax.f32 %v3632_v5, 0.0  ;;  %v3649_v6 = vmax.f32 %v3633_v9, 0.0  ;;  %v2757_v26 = vsel %vm1427_vm7, %v2755_v36, %v2756_v45  ;;  %v2891_v15 = vrot.slane %v2837_v1, 2  ;;  %v3495_v36 = vld [vmem:[#allocation2 + $0x9c] sm:$0xe] }
 0x22f   : > { %v2759_v58 = vsel %vm1427_vm7, %v2756_v45, %v2758_v31  ;;  %v2802_v46 = vadd.f32 %v2757_v26, %v2650_v40  ;;  %v2895_v43 = vsel %vm1568_vm8, %v2892_v12, %v2894_v8  ;;  %v2991_v16 = vmul.f32 %v5334_v13, %v4608_v56 }
 0x230   : > { %v3664_v19 = vmin.f32 %v3648_v44, 6.0  ;;  %v3665_v2 = vmin.f32 %v3649_v6, 6.0  ;;  %v2803_v22 = vadd.f32 %v2759_v58, %v2651_v35  ;;  %v2893_v21 = vsel %vm1568_vm8, %v2891_v15, %v2892_v12 }
 0x231   : > { %v2938_v29 = vadd.f32 %v2893_v21, %v2802_v46  ;;  %v3027_v23 = vunpack.c.l.bf16 %v3019_v17  ;;  %v3041_v24 = vmul.f32 %v5332_v61, %v4611_v59  ;;  %v3042_v27 = vmul.f32 %v5334_v13, %v4611_v59 }
 0x232   : > { %v3678_v25 = vpack.c.bf16 %v3665_v2, %v3664_v19  ;;  %v2939_v51 = vadd.f32 %v2895_v43, %v2803_v22  ;;  %v3163_v50 = vunpack.c.l.bf16 %v3155_v4  ;;  %v3178_v14 = vmul.f32 %v5334_v13, %v4613_v60  ;;  %v2680_v19 = vld [vmem:[#allocation2 + $0x98] sm:$0x1] }
 0x233   : > { %v3006_v33 = vadd.f32 %v2990_v38, %v2938_v29  ;;  %v3043_v55 = vmul.f32 %v3027_v23, %v4611_v59  ;;  %v3095_v34 = vrot.slane %v3041_v24, 1  ;;  %v3096_v37 = vrot.slane %v3042_v27, 1 }
 0x234   : > { %4281 = vmatprep.mubr.bf16.mxu1 %v3678_v25  ;;  %v3007_v11 = vadd.f32 %v2991_v16, %v2939_v51  ;;  %v3177_v42 = vmul.f32 %v3163_v50, %v4613_v60  ;;  %v3179_v40 = vmul.f32 %v3027_v23, %v4613_v60  ;;  %v3232_v30 = vrot.slane %v3178_v14, 2  ;;  %v2816_v23 = vld [vmem:[#allocation2 + $0x90] sm:$0xe] }
 0x235   : > { %v3097_v35 = vsel %vm1427_vm7, %v3095_v34, %v3096_v37  ;;  %v3098_v47 = vrot.slane %v3043_v55, 1  ;;  %v3314_v48 = vunpack.c.l.bf16 %v3298_v28  ;;  %v3315_v52 = vunpack.c.h.bf16 %v3298_v28 }
 0x236   : > { %v3142_v54 = vadd.f32 %v3097_v35, %v3006_v33  ;;  %v3231_v32 = vrot.slane %v3177_v42, 2  ;;  %v3234_v57 = vrot.slane %v3179_v40, 2  ;;  %v3367_v49 = vunpack.c.l.bf16 %v3359_v39 }
 0x237   : > { %v3099_v62 = vsel %vm1427_vm7, %v3096_v37, %v3098_v47  ;;  %v3330_v41 = vmul.f32 %v3314_v48, %v4615_v63  ;;  %v3331_v5 = vmul.f32 %v3315_v52, %v4615_v63  ;;  %v3381_v9 = vmul.f32 %v3314_v48, %v4618_v0 }
 0x238   : > { %v3143_v45 = vadd.f32 %v3099_v62, %v3007_v11  ;;  %v3233_v1 = vsel %vm1568_vm8, %v3231_v32, %v3232_v30  ;;  %v3235_v31 = vsel %vm1568_vm8, %v3232_v30, %v3234_v57  ;;  %v3382_v12 = vmul.f32 %v3315_v52, %v4618_v0  ;;  %v2960_v11 = vld [vmem:[#allocation2 + $0x9c] sm:$0xff]  }
 0x239   : > { %v3278_v8 = vadd.f32 %v3233_v1, %v3142_v54  ;;  %v3383_v38 = vmul.f32 %v3367_v49, %v4618_v0  ;;  %v3435_v44 = vrot.slane %v3381_v9, 1  ;;  %v3503_v6 = vunpack.c.l.bf16 %v3495_v36  ;;  %v5416_v54 = vld [vmem:[%s5772_s4] ss:$0 sm:$0xff] }
 0x23a   : > { %v3279_v26 = vadd.f32 %v3235_v31, %v3143_v45  ;;  %v3436_v15 = vrot.slane %v3382_v12, 1  ;;  %v3518_v17 = vmul.f32 %v3315_v52, %v4620_v7  ;;  %v3519_v58 = vmul.f32 %v3367_v49, %v4620_v7 }
 0x23b   : > { %v3346_v46 = vadd.f32 %v3330_v41, %v3278_v8  ;;  %v3438_v43 = vrot.slane %v3383_v38, 1  ;;  %v3517_v16 = vmul.f32 %v3503_v6, %v4620_v7  ;;  %v2652_v4 = vmul.f32 %v5332_v61, %v4578_v20  ;;  %v3020_v38 = vld [vmem:[#allocation2 + $0xa4] sm:$0x1] }
 0x23c   : > { %v3347_v2 = vadd.f32 %v3331_v5, %v3279_v26  ;;  %v3437_v22 = vsel %vm1427_vm7, %v3435_v44, %v3436_v15  ;;  %v3572_v21 = vrot.slane %v3518_v17, 2  ;;  %v3574_v29 = vrot.slane %v3519_v58, 2  ;;  %v3156_v58 = vld [vmem:[#allocation2 + $0x9c] sm:$0xe] }
 0x23d   : > { %v3439_v24 = vsel %vm1427_vm7, %v3436_v15, %v3438_v43  ;;  %v3482_v27 = vadd.f32 %v3437_v22, %v3346_v46  ;;  %v3571_v25 = vrot.slane %v3517_v16, 2  ;;  %v2653_v51 = vmul.f32 %v5334_v13, %v4578_v20 }
 0x23e   : > { %v3483_v50 = vadd.f32 %v3439_v24, %v3347_v2  ;;  %v3575_v14 = vsel %vm1568_vm8, %v3572_v21, %v3574_v29  ;;  %v2688_v28 = vunpack.c.l.bf16 %v2680_v19  ;;  %v2704_v33 = vmul.f32 %v5332_v61, %v4571_v10 }
 0x23f   : > { %v3573_v55 = vsel %vm1568_vm8, %v3571_v25, %v3572_v21  ;;  %v2705_v34 = vmul.f32 %v5334_v13, %v4571_v10  ;;  %v2824_v37 = vunpack.c.l.bf16 %v2816_v23  ;;  %v2841_v39 = vmul.f32 %v5334_v13, %v4575_v18  ;;  %v4144_v23 = vld [vmem:[#allocation2 + $0xa8] sm:$0xff]  }
 0x240   : > { %v3618_v42 = vadd.f32 %v3573_v55, %v3482_v27  ;;  %v3619_v40 = vadd.f32 %v3575_v14, %v3483_v50  ;;  %v2706_v30 = vmul.f32 %v2688_v28, %v4571_v10  ;;  %v2760_v35 = vrot.slane %v2704_v33, 1  ;;  %v3360_v50 = vld [vmem:[#allocation2 + $0xb0] sm:$0x1] }
 0x241   : > { %v2761_v47 = vrot.slane %v2705_v34, 1  ;;  %v2840_v48 = vmul.f32 %v2824_v37, %v4575_v18  ;;  %v2842_v61 = vmul.f32 %v2688_v28, %v4575_v18  ;;  %v2897_v52 = vrot.slane %v2841_v39, 2  ;;  %v5420_v36 = vpop.f32.mrb[0].mxu1 }
 0x242   : > { %v3634_v32 = vadd.f32 %v5416_v54, %v3618_v42  ;;  %v3635_v13 = vadd.f32 %v5416_v54, %v3619_v40  ;;  %v2763_v57 = vrot.slane %v2706_v30, 1  ;;  %v2976_v49 = vunpack.c.l.bf16 %v2960_v11  ;;  %v5423_v45 = vpop.f32.mrb[1].mxu1 }
 0x243   : > { %v2762_v62 = vsel %vm1427_vm7, %v2760_v35, %v2761_v47  ;;  %v2896_v41 = vrot.slane %v2840_v48, 2  ;;  %v2899_v5 = vrot.slane %v2842_v61, 2  ;;  %v2977_v9 = vunpack.c.h.bf16 %v2960_v11  ;;  %v5426_v44 = vpop.f32.mrb[2].mxu1 }
 0x244   : > { %v3650_v1 = vmax.f32 %v3634_v32, 0.0  ;;  %v3651_v31 = vmax.f32 %v3635_v13, 0.0  ;;  %v2764_v12 = vsel %vm1427_vm7, %v2761_v47, %v2763_v57  ;;  %v2804_v8 = vadd.f32 %v2762_v62, %v2652_v4  ;;  %v5431_v46 = vpop.f32.mrb[3].mxu1  ;;  %v3496_v32 = vld [vmem:[#allocation2 + $0xa8] sm:$0xe] }
 0x245   : > { %v2805_v6 = vadd.f32 %v2764_v12, %v2653_v51  ;;  %v2898_v26 = vsel %vm1568_vm8, %v2896_v41, %v2897_v52  ;;  %v2900_v15 = vsel %vm1568_vm8, %v2897_v52, %v2899_v5  ;;  %v2992_v17 = vmul.f32 %v2976_v49, %v4608_v56 }
 0x246   : > { %v3666_v43 = vmin.f32 %v3650_v1, 6.0  ;;  %v3667_v16 = vmin.f32 %v3651_v31, 6.0  ;;  %v2940_v19 = vadd.f32 %v2898_v26, %v2804_v8  ;;  %v2993_v2 = vmul.f32 %v2977_v9, %v4608_v56  ;;  %v2622_v31 = vld [vmem:[#allocation2 + $0x9c] sm:$0xff]  }
 0x247   : > { %v2941_v22 = vadd.f32 %v2900_v15, %v2805_v6  ;;  %v3028_v4 = vunpack.c.l.bf16 %v3020_v38  ;;  %v3044_v21 = vmul.f32 %v2976_v49, %v4611_v59  ;;  %v3045_v29 = vmul.f32 %v2977_v9, %v4611_v59 }
 0x248   : > { %v3679_v24 = vpack.c.bf16 %v3667_v16, %v3666_v43  ;;  %v3008_v27 = vadd.f32 %v2992_v17, %v2940_v19  ;;  %v3164_v25 = vunpack.c.l.bf16 %v3156_v58  ;;  %v3181_v51 = vmul.f32 %v2977_v9, %v4613_v60 }
 0x249   : > { %v3009_v14 = vadd.f32 %v2993_v2, %v2941_v22  ;;  %v3046_v28 = vmul.f32 %v3028_v4, %v4611_v59  ;;  %v3100_v33 = vrot.slane %v3044_v21, 1  ;;  %v3101_v55 = vrot.slane %v3045_v29, 1  ;;  %v2681_v22 = vld [vmem:[#allocation2 + $0xa4] sm:$0x1] }
 0x24a   : > { %4282 = vmatmul.mubr.bf16.vlgmr.msra.gmra.mrb[16].mxu1 %v3679_v24  ;;  %v3180_v34 = vmul.f32 %v3164_v25, %v4613_v60  ;;  %v3182_v37 = vmul.f32 %v3028_v4, %v4613_v60  ;;  %v3237_v39 = vrot.slane %v3181_v51, 2  ;;  %v5440_v11 = vunpack.c.l.bf16 %v4144_v23  ;;  %v2817_v24 = vld [vmem:[#allocation2 + $0x9c] sm:$0xe] }
 0x24b   : > { %v3102_v42 = vsel %vm1427_vm7, %v3100_v33, %v3101_v55  ;;  %v3103_v40 = vrot.slane %v3046_v28, 1  ;;  %v5443_v30 = vunpack.c.h.bf16 %v4144_v23  ;;  %v3368_v35 = vunpack.c.l.bf16 %v3360_v50 }
 0x24c   : > { %v3144_v47 = vadd.f32 %v3102_v42, %v3008_v27  ;;  %v3236_v48 = vrot.slane %v3180_v34, 2  ;;  %v3239_v61 = vrot.slane %v3182_v37, 2  ;;  %v3332_v52 = vmul.f32 %v5440_v11, %v4615_v63 }
 0x24d   : > { %v3104_v13 = vsel %vm1427_vm7, %v3101_v55, %v3103_v40  ;;  %v3333_v57 = vmul.f32 %v5443_v30, %v4615_v63  ;;  %v3384_v49 = vmul.f32 %v5440_v11, %v4618_v0  ;;  %v3385_v62 = vmul.f32 %v5443_v30, %v4618_v0 }
 0x24e   : > { %v3145_v41 = vadd.f32 %v3104_v13, %v3009_v14  ;;  %v3238_v5 = vsel %vm1568_vm8, %v3236_v48, %v3237_v39  ;;  %v3240_v9 = vsel %vm1568_vm8, %v3237_v39, %v3239_v61  ;;  %v3386_v1 = vmul.f32 %v3368_v35, %v4618_v0 }
 0x24f   : > { %v3280_v12 = vadd.f32 %v3238_v5, %v3144_v47  ;;  %v3440_v8 = vrot.slane %v3384_v49, 1  ;;  %v3441_v38 = vrot.slane %v3385_v62, 1  ;;  %v3504_v6 = vunpack.c.l.bf16 %v3496_v32 }
 0x250   : > { %v3281_v26 = vadd.f32 %v3240_v9, %v3145_v41  ;;  %v3443_v15 = vrot.slane %v3386_v1, 1  ;;  %v3521_v17 = vmul.f32 %v5443_v30, %v4620_v7  ;;  %v3522_v58 = vmul.f32 %v3368_v35, %v4620_v7 }
 0x251   : > { %v3348_v43 = vadd.f32 %v3332_v52, %v3280_v12  ;;  %v3442_v16 = vsel %vm1427_vm7, %v3440_v8, %v3441_v38  ;;  %v3520_v19 = vmul.f32 %v3504_v6, %v4620_v7  ;;  %v2638_v2 = vunpack.c.l.bf16 %v2622_v31  ;;  %v3021_v12 = vld [vmem:[#allocation2 + $0xb0] sm:$0x1] }
 0x252   : > { %v3349_v4 = vadd.f32 %v3333_v57, %v3281_v26  ;;  %v3444_v21 = vsel %vm1427_vm7, %v3441_v38, %v3443_v15  ;;  %v3577_v29 = vrot.slane %v3521_v17, 2  ;;  %v3579_v23 = vrot.slane %v3522_v58, 2  ;;  %v3157_v15 = vld [vmem:[#allocation2 + $0xa8] sm:$0xe] }
 0x253   : > { %v3484_v27 = vadd.f32 %v3442_v16, %v3348_v43  ;;  %v3576_v25 = vrot.slane %v3520_v19, 2  ;;  %v2639_v51 = vunpack.c.h.bf16 %v2622_v31  ;;  %v2654_v50 = vmul.f32 %v2638_v2, %v4578_v20 }
 0x254   : > { %v3485_v14 = vadd.f32 %v3444_v21, %v3349_v4  ;;  %v3580_v28 = vsel %vm1568_vm8, %v3577_v29, %v3579_v23  ;;  %v2689_v33 = vunpack.c.l.bf16 %v2681_v22  ;;  %v2707_v55 = vmul.f32 %v2638_v2, %v4571_v10 }
 0x255   : > { %v3578_v34 = vsel %vm1568_vm8, %v3576_v25, %v3577_v29  ;;  %v2655_v37 = vmul.f32 %v2639_v51, %v4578_v20  ;;  %v2708_v39 = vmul.f32 %v2639_v51, %v4571_v10  ;;  %v2825_v42 = vunpack.c.l.bf16 %v2817_v24 }
 0x256   : > { %v3620_v40 = vadd.f32 %v3578_v34, %v3484_v27  ;;  %v3621_v35 = vadd.f32 %v3580_v28, %v3485_v14  ;;  %v2709_v47 = vmul.f32 %v2689_v33, %v4571_v10  ;;  %v2765_v48 = vrot.slane %v2707_v55, 1  ;;  %v3302_v27 = vld [vmem:[#allocation2 + $0xb4] sm:$0xff]   ;;  %v3361_v28 = vld [vmem:[#allocation2 + $0xbc] sm:$0x1] }
 0x257   : > { %v2766_v61 = vrot.slane %v2708_v39, 1  ;;  %v2843_v52 = vmul.f32 %v2825_v42, %v4575_v18  ;;  %v2844_v32 = vmul.f32 %v2639_v51, %v4575_v18  ;;  %v2845_v13 = vmul.f32 %v2689_v33, %v4575_v18 }
 0x258   : > { %v3636_v57 = vadd.f32 %v5416_v54, %v3620_v40  ;;  %v3637_v49 = vadd.f32 %v5416_v54, %v3621_v35  ;;  %v2768_v62 = vrot.slane %v2709_v47, 1  ;;  %v2994_v41 = vmul.f32 %v5440_v11, %v4608_v56 }
 0x259   : > { %v2767_v5 = vsel %vm1427_vm7, %v2765_v48, %v2766_v61  ;;  %v2901_v9 = vrot.slane %v2843_v52, 2  ;;  %v2902_v1 = vrot.slane %v2844_v32, 2  ;;  %v2904_v31 = vrot.slane %v2845_v13, 2 }
 0x25a   : > { %v3652_v8 = vmax.f32 %v3636_v57, 0.0  ;;  %v3653_v38 = vmax.f32 %v3637_v49, 0.0  ;;  %v2769_v6 = vsel %vm1427_vm7, %v2766_v61, %v2768_v62  ;;  %v2806_v26 = vadd.f32 %v2767_v5, %v2654_v50  ;;  %v3497_v62 = vld [vmem:[#allocation2 + $0xb4] sm:$0xe] }
 0x25b   : > { %v2807_v17 = vadd.f32 %v2769_v6, %v2655_v37  ;;  %v2903_v58 = vsel %vm1568_vm8, %v2901_v9, %v2902_v1  ;;  %v2905_v43 = vsel %vm1568_vm8, %v2902_v1, %v2904_v31  ;;  %v2995_v16 = vmul.f32 %v5443_v30, %v4608_v56 }
 0x25c   : > { %v3668_v19 = vmin.f32 %v3652_v8, 6.0  ;;  %v3669_v2 = vmin.f32 %v3653_v38, 6.0  ;;  %v2942_v22 = vadd.f32 %v2903_v58, %v2806_v26  ;;  %v3029_v4 = vunpack.c.l.bf16 %v3021_v12 }
 0x25d   : > { %v2943_v21 = vadd.f32 %v2905_v43, %v2807_v17  ;;  %v3047_v29 = vmul.f32 %v5440_v11, %v4611_v59  ;;  %v3048_v23 = vmul.f32 %v5443_v30, %v4611_v59  ;;  %v3165_v24 = vunpack.c.l.bf16 %v3157_v15 }
 0x25e   : > { %v3680_v25 = vpack.c.bf16 %v3669_v2, %v3668_v19  ;;  %v3010_v51 = vadd.f32 %v2994_v41, %v2942_v22  ;;  %v3049_v50 = vmul.f32 %v3029_v4, %v4611_v59  ;;  %v3184_v14 = vmul.f32 %v5443_v30, %v4613_v60  ;;  %v2682_v2 = vld [vmem:[#allocation2 + $0xb0] sm:$0x1] }
 0x25f   : > { %v3011_v33 = vadd.f32 %v2995_v16, %v2943_v21  ;;  %v3105_v55 = vrot.slane %v3047_v29, 1  ;;  %v3106_v34 = vrot.slane %v3048_v23, 1  ;;  %v3183_v37 = vmul.f32 %v3165_v24, %v4613_v60  ;;  %v2818_v23 = vld [vmem:[#allocation2 + $0xa8] sm:$0xe] }
 0x260   : > { %4285 = vmatprep.mubr.bf16.mxu1 %v3680_v25  ;;  %v3108_v39 = vrot.slane %v3049_v50, 1  ;;  %v3185_v42 = vmul.f32 %v3029_v4, %v4613_v60  ;;  %v3242_v40 = vrot.slane %v3184_v14, 2  ;;  %v3318_v35 = vunpack.c.l.bf16 %v3302_v27 }
 0x261   : > { %v3107_v47 = vsel %vm1427_vm7, %v3105_v55, %v3106_v34  ;;  %v3241_v48 = vrot.slane %v3183_v37, 2  ;;  %v3319_v61 = vunpack.c.h.bf16 %v3302_v27  ;;  %v3369_v52 = vunpack.c.l.bf16 %v3361_v28 }
 0x262   : > { %v3109_v32 = vsel %vm1427_vm7, %v3106_v34, %v3108_v39  ;;  %v3146_v13 = vadd.f32 %v3107_v47, %v3010_v51  ;;  %v3244_v57 = vrot.slane %v3185_v42, 2  ;;  %v3334_v49 = vmul.f32 %v3318_v35, %v4615_v63 }
 0x263   : > { %v3147_v41 = vadd.f32 %v3109_v32, %v3011_v33  ;;  %v3243_v5 = vsel %vm1568_vm8, %v3241_v48, %v3242_v40  ;;  %v3335_v9 = vmul.f32 %v3319_v61, %v4615_v63  ;;  %v3387_v1 = vmul.f32 %v3318_v35, %v4618_v0  ;;  %v2964_v48 = vld [vmem:[#allocation2 + $0xb4] sm:$0xff]  }
 0x264   : > { %v3245_v31 = vsel %vm1568_vm8, %v3242_v40, %v3244_v57  ;;  %v3282_v12 = vadd.f32 %v3243_v5, %v3146_v13  ;;  %v3388_v8 = vmul.f32 %v3319_v61, %v4618_v0  ;;  %v3389_v38 = vmul.f32 %v3369_v52, %v4618_v0 }
 0x265   : > { %v3283_v6 = vadd.f32 %v3245_v31, %v3147_v41  ;;  %v3445_v26 = vrot.slane %v3387_v1, 1  ;;  %v3505_v15 = vunpack.c.l.bf16 %v3497_v62  ;;  %v3524_v17 = vmul.f32 %v3319_v61, %v4620_v7 }
 0x266   : > { %v3350_v58 = vadd.f32 %v3334_v49, %v3282_v12  ;;  %v3446_v43 = vrot.slane %v3388_v8, 1  ;;  %v3448_v16 = vrot.slane %v3389_v38, 1  ;;  %v3525_v19 = vmul.f32 %v3369_v52, %v4620_v7  ;;  %v3022_v38 = vld [vmem:[#allocation2 + $0xbc] sm:$0x1] }
 0x267   : > { %v3351_v22 = vadd.f32 %v3335_v9, %v3283_v6  ;;  %v3523_v4 = vmul.f32 %v3505_v15, %v4620_v7  ;;  %v3582_v21 = vrot.slane %v3524_v17, 2  ;;  %v2656_v29 = vmul.f32 %v5440_v11, %v4578_v20 }
 0x268   : > { %v3447_v24 = vsel %vm1427_vm7, %v3445_v26, %v3446_v43  ;;  %v3449_v27 = vsel %vm1427_vm7, %v3446_v43, %v3448_v16  ;;  %v3584_v25 = vrot.slane %v3525_v19, 2  ;;  %v2657_v51 = vmul.f32 %v5443_v30, %v4578_v20  ;;  %v3158_v43 = vld [vmem:[#allocation2 + $0xb4] sm:$0xe] }
 0x269   : > { %v3486_v50 = vadd.f32 %v3447_v24, %v3350_v58  ;;  %v3487_v14 = vadd.f32 %v3449_v27, %v3351_v22  ;;  %v3581_v28 = vrot.slane %v3523_v4, 2  ;;  %v2690_v33 = vunpack.c.l.bf16 %v2682_v2 }
 0x26a   : > { %v3585_v55 = vsel %vm1568_vm8, %v3582_v21, %v3584_v25  ;;  %v2710_v34 = vmul.f32 %v5440_v11, %v4571_v10  ;;  %v2711_v37 = vmul.f32 %v5443_v30, %v4571_v10  ;;  %v2826_v39 = vunpack.c.l.bf16 %v2818_v23 }
 0x26b   : > { %v3583_v42 = vsel %vm1568_vm8, %v3581_v28, %v3582_v21  ;;  %v3623_v40 = vadd.f32 %v3585_v55, %v3487_v14  ;;  %v2712_v35 = vmul.f32 %v2690_v33, %v4571_v10  ;;  %v2847_v47 = vmul.f32 %v5443_v30, %v4575_v18 }
 0x26c   : > { %v3622_v61 = vadd.f32 %v3583_v42, %v3486_v50  ;;  %v2770_v52 = vrot.slane %v2710_v34, 1  ;;  %v2771_v32 = vrot.slane %v2711_v37, 1  ;;  %v2846_v13 = vmul.f32 %v2826_v39, %v4575_v18  ;;  %v3362_v42 = vld [vmem:[#allocation2 + $0xc8] sm:$0x1] }
 0x26d   : > { %v3639_v11 = vadd.f32 %v5416_v54, %v3623_v40  ;;  %v2773_v57 = vrot.slane %v2712_v35, 1  ;;  %v2848_v49 = vmul.f32 %v2690_v33, %v4575_v18  ;;  %v2907_v62 = vrot.slane %v2847_v47, 2  ;;  %v4145_v33 = vld [vmem:[#allocation2 + $0xc0] sm:$0xff]  }
 0x26e   : > { %v3638_v41 = vadd.f32 %v5416_v54, %v3622_v61  ;;  %v2772_v5 = vsel %vm1427_vm7, %v2770_v52, %v2771_v32  ;;  %v2906_v9 = vrot.slane %v2846_v13, 2  ;;  %v2980_v1 = vunpack.c.l.bf16 %v2964_v48 }
 0x26f   : > { %v3655_v31 = vmax.f32 %v3639_v11, 0.0  ;;  %v2774_v30 = vsel %vm1427_vm7, %v2771_v32, %v2773_v57  ;;  %v2808_v12 = vadd.f32 %v2772_v5, %v2656_v29  ;;  %v2909_v8 = vrot.slane %v2848_v49, 2  ;;  %v5525_v6 = vpop.f32.mrb[4].mxu1 }
 0x270   : > { %v3654_v26 = vmax.f32 %v3638_v41, 0.0  ;;  %v2809_v15 = vadd.f32 %v2774_v30, %v2657_v51  ;;  %v2908_v17 = vsel %vm1568_vm8, %v2906_v9, %v2907_v62  ;;  %v2981_v58 = vunpack.c.h.bf16 %v2964_v48  ;;  %v5528_v16 = vpop.f32.mrb[5].mxu1  ;;  %v3498_v41 = vld [vmem:[#allocation2 + $0xc0] sm:$0xe] }
 0x271   : > { %v3671_v19 = vmin.f32 %v3655_v31, 6.0  ;;  %v2910_v2 = vsel %vm1568_vm8, %v2907_v62, %v2909_v8  ;;  %v2944_v22 = vadd.f32 %v2908_v17, %v2808_v12  ;;  %v2996_v4 = vmul.f32 %v2980_v1, %v4608_v56  ;;  %v5532_v21 = vpop.f32.mrb[6].mxu1 }
 0x272   : > { %v3670_v29 = vmin.f32 %v3654_v26, 6.0  ;;  %v2945_v23 = vadd.f32 %v2910_v2, %v2809_v15  ;;  %v2997_v24 = vmul.f32 %v2981_v58, %v4608_v56  ;;  %v3030_v27 = vunpack.c.l.bf16 %v3022_v38  ;;  %v5535_v25 = vpop.f32.mrb[7].mxu1 }
 0x273   : > { %v3012_v51 = vadd.f32 %v2996_v4, %v2944_v22  ;;  %v3050_v50 = vmul.f32 %v2980_v1, %v4611_v59  ;;  %v3051_v14 = vmul.f32 %v2981_v58, %v4611_v59  ;;  %v3166_v28 = vunpack.c.l.bf16 %v3158_v43  ;;  %v341_v43 = vld [vmem:[#allocation2 + $0xcc] sm:$0x1] }
 0x274   : > { %v3681_v55 = vpack.c.bf16 %v3671_v19, %v3670_v29  ;;  %v3013_v34 = vadd.f32 %v2997_v24, %v2945_v23  ;;  %v3052_v37 = vmul.f32 %v3030_v27, %v4611_v59  ;;  %v3187_v39 = vmul.f32 %v2981_v58, %v4613_v60  ;;  %v397_v29 = vld [vmem:[#allocation2 + $0xd4] sm:$0x1] }
 0x275   : > { %v3110_v40 = vrot.slane %v3050_v50, 1  ;;  %v3111_v35 = vrot.slane %v3051_v14, 1  ;;  %v3186_v47 = vmul.f32 %v3166_v28, %v4613_v60  ;;  %v3188_v48 = vmul.f32 %v3030_v27, %v4613_v60  ;;  %v2626_v50 = vld [vmem:[#allocation2 + $0xb4] sm:$0xff]  }
 0x276   : > { %4286 = vmatmul.mubr.bf16.gmra.mrb[20].mxu1 %v3681_v55  ;;  %v3113_v61 = vrot.slane %v3052_v37, 1  ;;  %v3247_v52 = vrot.slane %v3187_v39, 2  ;;  %v5543_v32 = vunpack.c.l.bf16 %v4145_v33  ;;  %v5545_v13 = vunpack.c.h.bf16 %v4145_v33  ;;  %v2819_v14 = vld [vmem:[#allocation2 + $0xb4] sm:$0xe]  ;;  %v2683_v37 = vld [vmem:[#allocation2 + $0xbc] sm:$0x1] }
 0x277   : > { %v3112_v11 = vsel %vm1427_vm7, %v3110_v40, %v3111_v35  ;;  %v3246_v57 = vrot.slane %v3186_v47, 2  ;;  %v3249_v49 = vrot.slane %v3188_v48, 2  ;;  %v3370_v62 = vunpack.c.l.bf16 %v3362_v42 }
 0x278   : > { %v3114_v5 = vsel %vm1427_vm7, %v3111_v35, %v3113_v61  ;;  %v3148_v9 = vadd.f32 %v3112_v11, %v3012_v51  ;;  %v3336_v1 = vmul.f32 %v5543_v32, %v4615_v63  ;;  %v3337_v31 = vmul.f32 %v5545_v13, %v4615_v63 }
 0x279   : > { %v3149_v30 = vadd.f32 %v3114_v5, %v3013_v34  ;;  %v3248_v12 = vsel %vm1568_vm8, %v3246_v57, %v3247_v52  ;;  %v3250_v8 = vsel %vm1568_vm8, %v3247_v52, %v3249_v49  ;;  %v3390_v38 = vmul.f32 %v5543_v32, %v4618_v0 }
 0x27a   : > { %v3284_v26 = vadd.f32 %v3248_v12, %v3148_v9  ;;  %v3391_v15 = vmul.f32 %v5545_v13, %v4618_v0  ;;  %v3392_v17 = vmul.f32 %v3370_v62, %v4618_v0  ;;  %v3506_v58 = vunpack.c.l.bf16 %v3498_v41 }
 0x27b   : > { %v3285_v19 = vadd.f32 %v3250_v8, %v3149_v30  ;;  %v3450_v2 = vrot.slane %v3390_v38, 1  ;;  %v3527_v22 = vmul.f32 %v5545_v13, %v4620_v7  ;;  %v3528_v4 = vmul.f32 %v3370_v62, %v4620_v7 }
 0x27c   : > { %v3352_v23 = vadd.f32 %v3336_v1, %v3284_v26  ;;  %v3451_v24 = vrot.slane %v3391_v15, 1  ;;  %v3453_v27 = vrot.slane %v3392_v17, 1  ;;  %v3526_v51 = vmul.f32 %v3506_v58, %v4620_v7 }
 0x27d   : > { %v3353_v28 = vadd.f32 %v3337_v31, %v3285_v19  ;;  %v3587_v33 = vrot.slane %v3527_v22, 2  ;;  %v3589_v55 = vrot.slane %v3528_v4, 2  ;;  %v342_v34 = vsel %vm4402_vm3, 0, %v341_v43  ;;  %v3023_v22 = vld [vmem:[#allocation2 + $0xc8] sm:$0x1] }
 0x27e   : > { %v3452_v39 = vsel %vm1427_vm7, %v3450_v2, %v3451_v24  ;;  %v3454_v42 = vsel %vm1427_vm7, %v3451_v24, %v3453_v27  ;;  %v3586_v40 = vrot.slane %v3526_v51, 2  ;;  %343 = vst [vmem:[#allocation2 + $0xcc] sm:$0x1] %v342_v34  ;;  %v398_v35 = vsel %vm4466_vm6, 0, %v397_v29 }
 0x27f   : > { %v3488_v47 = vadd.f32 %v3452_v39, %v3352_v23  ;;  %v3489_v48 = vadd.f32 %v3454_v42, %v3353_v28  ;;  %v3590_v61 = vsel %vm1568_vm8, %v3587_v33, %v3589_v55  ;;  %399 = vst [vmem:[#allocation2 + $0xd4] sm:$0x1] %v398_v35  ;;  %v2642_v52 = vunpack.c.l.bf16 %v2626_v50 }
 0x280   : > { %v3588_v11 = vsel %vm1568_vm8, %v3586_v40, %v3587_v33  ;;  %v2643_v3 = vunpack.c.h.bf16 %v2626_v50  ;;  %v2691_v57 = vunpack.c.l.bf16 %v2683_v37  ;;  %v2827_v49 = vunpack.c.l.bf16 %v2819_v14  ;;  %v3159_v14 = vld [vmem:[#allocation2 + $0xc0] sm:$0xe] }
 0x281   : > { %v3624_v62 = vadd.f32 %v3588_v11, %v3488_v47  ;;  %v3625_v41 = vadd.f32 %v3590_v61, %v3489_v48  ;;  %v2658_v5 = vmul.f32 %v2642_v52, %v4578_v20  ;;  %v2713_v9 = vmul.f32 %v2642_v52, %v4571_v10 }
 0x282   : > { %v2659_v53 = vmul.f32 %v2643_v3, %v4578_v20  ;;  %v2714_v1 = vmul.f32 %v2643_v3, %v4571_v10  ;;  %v2715_v31 = vmul.f32 %v2691_v57, %v4571_v10  ;;  %v2849_v30 = vmul.f32 %v2827_v49, %v4575_v18 }
 0x283   : > { %v3640_v12 = vadd.f32 %v5416_v54, %v3624_v62  ;;  %v3641_v8 = vadd.f32 %v5416_v54, %v3625_v41  ;;  %v2775_v38 = vrot.slane %v2713_v9, 1  ;;  %v2850_v26 = vmul.f32 %v2643_v3, %v4575_v18 }
 0x284   : > { %v2776_v15 = vrot.slane %v2714_v1, 1  ;;  %v2778_v17 = vrot.slane %v2715_v31, 1  ;;  %v2851_v58 = vmul.f32 %v2691_v57, %v4575_v18  ;;  %v2911_v43 = vrot.slane %v2849_v30, 2  ;;  %v3499_v31 = vld [vmem:[#allocation2 + $0xcc] sm:$0xe] }
 0x285   : > { %v3656_v19 = vmax.f32 %v3640_v12, 0.0  ;;  %v3657_v20 = vmax.f32 %v3641_v8, 0.0  ;;  %v2912_v2 = vrot.slane %v2850_v26, 2  ;;  %v2998_v10 = vmul.f32 %v5543_v32, %v4608_v56 }
 0x286   : > { %v2777_v4 = vsel %vm1427_vm7, %v2775_v38, %v2776_v15  ;;  %v2779_v29 = vsel %vm1427_vm7, %v2776_v15, %v2778_v17  ;;  %v2914_v23 = vrot.slane %v2851_v58, 2  ;;  %v2999_v24 = vmul.f32 %v5545_v13, %v4608_v56  ;;  %v3306_v56 = vld [vmem:[#allocation2 + $0xcc] sm:$0xff]   ;;  %v3363_v52 = vld [vmem:[#allocation2 + $0xd4] sm:$0x1] }
 0x287   : > { %v3672_v27 = vmin.f32 %v3656_v19, 6.0  ;;  %v3673_v51 = vmin.f32 %v3657_v20, 6.0  ;;  %v2810_v50 = vadd.f32 %v2777_v4, %v2658_v5  ;;  %v2811_v18 = vadd.f32 %v2779_v29, %v2659_v53  ;;  %v5611_v20 = vld [vmem:[%s5774_s6] ss:$0 sm:$0xff] }
 0x288   : > { %v2913_v28 = vsel %vm1568_vm8, %v2911_v43, %v2912_v2  ;;  %v2915_v33 = vsel %vm1568_vm8, %v2912_v2, %v2914_v23  ;;  %v3031_v55 = vunpack.c.l.bf16 %v3023_v22  ;;  %v3053_v34 = vmul.f32 %v5543_v32, %v4611_v59 }
 0x289   : > { %v3682_v37 = vpack.c.bf16 %v3673_v51, %v3672_v27  ;;  %v2946_v39 = vadd.f32 %v2913_v28, %v2810_v50  ;;  %v2947_v42 = vadd.f32 %v2915_v33, %v2811_v18  ;;  %v3054_v40 = vmul.f32 %v5545_v13, %v4611_v59 }
 0x28a   : > { %v3055_v35 = vmul.f32 %v3031_v55, %v4611_v59  ;;  %v3115_v47 = vrot.slane %v3053_v34, 1  ;;  %v3167_v48 = vunpack.c.l.bf16 %v3159_v14  ;;  %v3190_v61 = vmul.f32 %v5545_v13, %v4613_v60 }
 0x28b   : > { %4289 = vmatprep.mubr.bf16.mxu1 %v3682_v37  ;;  %v3014_v11 = vadd.f32 %v2998_v10, %v2946_v39  ;;  %v3015_v3 = vadd.f32 %v2999_v24, %v2947_v42  ;;  %v3116_v57 = vrot.slane %v3054_v40, 1  ;;  %v3191_v32 = vmul.f32 %v3031_v55, %v4613_v60  ;;  %v2563_v42 = vld [vmem:[%s4414_s8 + $0x18] sm:$0xff]  ;;  %v2561_v40 = vld [vmem:[%s4414_s8 + $0x8] sm:$0xff] }
 0x28c   : > { %v3118_v49 = vrot.slane %v3055_v35, 1  ;;  %v3189_v62 = vmul.f32 %v3167_v48, %v4613_v60  ;;  %v3252_v41 = vrot.slane %v3190_v61, 2  ;;  %v3322_v5 = vunpack.c.l.bf16 %v3306_v56  ;;  %v2566_v61 = vld [vmem:[%s4414_s8 + $0x30] sm:$0xff] }
 0x28d   : > { %v3117_v9 = vsel %vm1427_vm7, %v3115_v47, %v3116_v57  ;;  %v3254_v59 = vrot.slane %v3191_v32, 2  ;;  %v3323_v53 = vunpack.c.h.bf16 %v3306_v56  ;;  %v3371_v1 = vunpack.c.l.bf16 %v3363_v52  ;;  %v2567_v32 = vld [vmem:[%s4414_s8 + $0x38] sm:$0xff] }
 0x28e   : > { %v3119_v13 = vsel %vm1427_vm7, %v3116_v57, %v3118_v49  ;;  %v3150_v30 = vadd.f32 %v3117_v9, %v3014_v11  ;;  %v3251_v12 = vrot.slane %v3189_v62, 2  ;;  %v3338_v8 = vmul.f32 %v3322_v5, %v4615_v63  ;;  %v2564_v57 = vld [vmem:[%s4414_s8 + $0x20] sm:$0xff] }
 0x28f   : > { %v3151_v38 = vadd.f32 %v3119_v13, %v3015_v3  ;;  %v3255_v26 = vsel %vm1568_vm8, %v3252_v41, %v3254_v59  ;;  %v3339_v60 = vmul.f32 %v3323_v53, %v4615_v63  ;;  %v3393_v15 = vmul.f32 %v3322_v5, %v4618_v0  ;;  %v2570_v13 = vld [vmem:[%s4414_s8 + $0x50] sm:$0xff] }
 0x290   : > { %v3253_v17 = vsel %vm1568_vm8, %v3251_v12, %v3252_v41  ;;  %v3394_v58 = vmul.f32 %v3323_v53, %v4618_v0  ;;  %v3395_v43 = vmul.f32 %v3371_v1, %v4618_v0  ;;  %v3507_v19 = vunpack.c.l.bf16 %v3499_v31  ;;  %v2562_v0 = vld [vmem:[%s4414_s8 + $0x10] sm:$0xff]  ;;  %v2565_v41 = vld [vmem:[%s4414_s8 + $0x28] sm:$0xff]  ;;  %v2568_v12 = vld [vmem:[%s4414_s8 + $0x40] sm:$0xff] }
 0x291   : > { %v3286_v2 = vadd.f32 %v3253_v17, %v3150_v30  ;;  %v3287_v10 = vadd.f32 %v3255_v26, %v3151_v38  ;;  %v3455_v22 = vrot.slane %v3393_v15, 1  ;;  %v3530_v63 = vmul.f32 %v3323_v53, %v4620_v7  ;;  %v2571_v15 = vld [vmem:[%s4414_s8 + $0x58] sm:$0xff] }
 0x292   : > { %v3456_v4 = vrot.slane %v3394_v58, 1  ;;  %v3458_v29 = vrot.slane %v3395_v43, 1  ;;  %v3529_v23 = vmul.f32 %v3507_v19, %v4620_v7  ;;  %v3531_v24 = vmul.f32 %v3371_v1, %v4620_v7  ;;  %v2560_v7 = vld [vmem:[%s4414_s8] sm:$0xff]  ;;  %v2569_v19 = vld [vmem:[%s4414_s8 + $0x48] sm:$0xff] }
 0x293   : > { %v3354_v27 = vadd.f32 %v3338_v8, %v3286_v2  ;;  %v3355_v51 = vadd.f32 %v3339_v60, %v3287_v10  ;;  %v3592_v50 = vrot.slane %v3530_v63, 2  ;;  %v2504_v18 = vadd.f32 %v5420_v36, %v5611_v20 }
 0x294   : > { %v3457_v14 = vsel %vm1427_vm7, %v3455_v22, %v3456_v4  ;;  %v3459_v28 = vsel %vm1427_vm7, %v3456_v4, %v3458_v29  ;;  %v3591_v33 = vrot.slane %v3529_v23, 2  ;;  %v3594_v55 = vrot.slane %v3531_v24, 2  ;;  %v2574_v23 = vld [vmem:[%s4414_s8 + $0x70] sm:$0xff] }
 0x295   : > { %v3490_v34 = vadd.f32 %v3457_v14, %v3354_v27  ;;  %v3491_v37 = vadd.f32 %v3459_v28, %v3355_v51  ;;  %v2578_v36 = vadd.f32 %v2562_v0, %v2504_v18  ;;  %v2496_v39 = vadd.f32 %v5611_v20, %v5423_v45  ;;  %v2572_v27 = vld [vmem:[%s4414_s8 + $0x60] sm:$0xff]  ;;  %v2575_v18 = vld [vmem:[%s4414_s8 + $0x78] sm:$0xff] }
 0x296   : > { %v3593_v56 = vsel %vm1568_vm8, %v3591_v33, %v3592_v50  ;;  %v3595_v35 = vsel %vm1568_vm8, %v3592_v50, %v3594_v55  ;;  %v2507_v47 = vadd.f32 %v5426_v44, %v5611_v20  ;;  %v2499_v48 = vadd.f32 %v5611_v20, %v5431_v46  ;;  %v2573_v55 = vld [vmem:[%s4414_s8 + $0x68] sm:$0xff] }
 0x297   : > { %v3626_v52 = vadd.f32 %v3593_v56, %v3490_v34  ;;  %v3627_v11 = vadd.f32 %v3595_v35, %v3491_v37  ;;  %2595 = vst.msk [vmem:[%s5626_s23 + $0x10] sm:$0xff] %vm456_vm4, %v2578_v36  ;;  %v2576_v45 = vadd.f32 %v2560_v7, %v2496_v39  ;;  %v2520_v3 = vadd.f32 %v5525_v6, %v5611_v20  ;;  %v3962_v35 = vld [vmem:[%s4414_s8 + $0x80] sm:$0xff] }
 0x298   : > { %v2579_v49 = vadd.f32 %v2563_v42, %v2507_v47  ;;  %v2577_v44 = vadd.f32 %v2561_v40, %v2499_v48  ;;  %v2512_v46 = vadd.f32 %v5611_v20, %v5528_v16  ;;  %v2523_v62 = vadd.f32 %v5532_v21, %v5611_v20  ;;  %v3964_v42 = vld [vmem:[%s4414_s8 + $0x90] sm:$0xff] }
 0x299   : > { %v3642_v5 = vadd.f32 %v5416_v54, %v3626_v52  ;;  %v3643_v9 = vadd.f32 %v5416_v54, %v3627_v11  ;;  %2593 = vst.msk [vmem:[%s5626_s23] sm:$0xff] %vm456_vm4, %v2576_v45  ;;  %v2582_v6 = vadd.f32 %v2566_v61, %v2520_v3  ;;  %v2515_v59 = vadd.f32 %v5611_v20, %v5535_v25  ;;  %v3965_v61 = vld [vmem:[%s4414_s8 + $0x98] sm:$0xff]  ;;  %v3963_v3 = vld [vmem:[%s4414_s8 + $0x88] sm:$0xff] }
 0x29a   : > { %2596 = vst.msk [vmem:[%s5626_s23 + $0x18] sm:$0xff] %vm456_vm4, %v2579_v49  ;;  %2594 = vst.msk [vmem:[%s5626_s23 + $0x8] sm:$0xff] %vm456_vm4, %v2577_v44  ;;  %v2580_v16 = vadd.f32 %v2564_v57, %v2512_v46  ;;  %v2583_v21 = vadd.f32 %v2567_v32, %v2523_v62  ;;  %v3968_v62 = vld [vmem:[%s4414_s8 + $0xb0] sm:$0xff] }
 0x29b   : > { %v3658_v53 = vmax.f32 %v3642_v5, 0.0  ;;  %v3659_v1 = vmax.f32 %v3643_v9, 0.0  ;;  %2599 = vst.msk [vmem:[%s5626_s23 + $0x30] sm:$0xff] %vm456_vm4, %v2582_v6  ;;  %v2581_v54 = vadd.f32 %v2565_v41, %v2515_v59  ;;  %v4255_v31 = vpop.f32.mrb[8].mxu1  ;;  %v3966_v9 = vld [vmem:[%s4414_s8 + $0xa0] sm:$0xff] }
 0x29c   : > { %2597 = vst.msk [vmem:[%s5626_s23 + $0x20] sm:$0xff] %vm456_vm4, %v2580_v16  ;;  %2600 = vst.msk [vmem:[%s5626_s23 + $0x38] sm:$0xff] %vm456_vm4, %v2583_v21  ;;  %v2536_v25 = vadd.f32 %v4255_v31, %v5611_v20  ;;  %v2527_v30 = vpop.f32.mrb[9].mxu1  ;;  %v3969_v16 = vld [vmem:[%s4414_s8 + $0xb8] sm:$0xff] }
 0x29d   : > { %v3674_v8 = vmin.f32 %v3658_v53, 6.0  ;;  %v3675_v38 = vmin.f32 %v3659_v1, 6.0  ;;  %2598 = vst.msk [vmem:[%s5626_s23 + $0x28] sm:$0xff] %vm456_vm4, %v2581_v54  ;;  %v2528_v26 = vadd.f32 %v5611_v20, %v2527_v30  ;;  %v4256_v60 = vpop.f32.mrb[10].mxu1  ;;  %v3967_v54 = vld [vmem:[%s4414_s8 + $0xa8] sm:$0xff] }
 0x29e   : > { %v2586_v17 = vadd.f32 %v2570_v13, %v2536_v25  ;;  %v2539_v58 = vadd.f32 %v4256_v60, %v5611_v20  ;;  %v2530_v43 = vpop.f32.mrb[11].mxu1  ;;  %v3970_v60 = vld [vmem:[%s4414_s8 + $0xc0] sm:$0xff] }
 0x29f   : > { %v3683_v2 = vpack.c.bf16 %v3675_v38, %v3674_v8  ;;  %v2584_v10 = vadd.f32 %v2568_v12, %v2528_v26  ;;  %v2531_v22 = vadd.f32 %v5611_v20, %v2530_v43  ;;  %v3972_v8 = vld [vmem:[%s4414_s8 + $0xd0] sm:$0xff] }
 0x2a0   : > { %2603 = vst.msk [vmem:[%s5626_s23 + $0x50] sm:$0xff] %vm456_vm4, %v2586_v17  ;;  %v2587_v63 = vadd.f32 %v2571_v15, %v2539_v58  ;;  %v3973_v58 = vld [vmem:[%s4414_s8 + $0xd8] sm:$0xff] }
 0x2a1   : > { %4290 = vmatmul.mubr.bf16.gmra.mrb[24].mxu1 %v3683_v2  ;;  %2601 = vst.msk [vmem:[%s5626_s23 + $0x40] sm:$0xff] %vm456_vm4, %v2584_v10  ;;  %v2585_v4 = vadd.f32 %v2569_v19, %v2531_v22  ;;  %v3971_v10 = vld [vmem:[%s4414_s8 + $0xc8] sm:$0xff] }
 0x2a2   : > { %2604 = vst.msk [vmem:[%s5626_s23 + $0x58] sm:$0xff] %vm456_vm4, %v2587_v63 }
 0x2a3   : > { %2602 = vst.msk [vmem:[%s5626_s23 + $0x48] sm:$0xff] %vm456_vm4, %v2585_v4 }
 0x2c6   : > { %v4259_v29 = vpop.f32.mrb[12].mxu1 }
 0x2c7   : > { %v2552_v24 = vadd.f32 %v4259_v29, %v5611_v20  ;;  %v2543_v0 = vpop.f32.mrb[13].mxu1 }
 0x2c8   : > { %v2544_v51 = vadd.f32 %v5611_v20, %v2543_v0  ;;  %v4260_v50 = vpop.f32.mrb[14].mxu1 }
 0x2c9   : > { %v2590_v14 = vadd.f32 %v2574_v23, %v2552_v24  ;;  %v2555_v28 = vadd.f32 %v4260_v50, %v5611_v20  ;;  %v2546_v33 = vpop.f32.mrb[15].mxu1  ;;  %v3976_v24 = vld [vmem:[%s4414_s8 + $0xf0] sm:$0xff] }
 0x2ca   : > { %v2588_v7 = vadd.f32 %v2572_v27, %v2544_v51  ;;  %v2547_v34 = vadd.f32 %v5611_v20, %v2546_v33  ;;  %v3974_v51 = vld [vmem:[%s4414_s8 + $0xe0] sm:$0xff] }
 0x2cb   : > { %2607 = vst.msk [vmem:[%s5626_s23 + $0x70] sm:$0xff] %vm456_vm4, %v2590_v14  ;;  %v2591_v37 = vadd.f32 %v2575_v18, %v2555_v28  ;;  %v3977_v14 = vld [vmem:[%s4414_s8 + $0xf8] sm:$0xff] }
 0x2cc   : > { %2605 = vst.msk [vmem:[%s5626_s23 + $0x60] sm:$0xff] %vm456_vm4, %v2588_v7  ;;  %v2589_v36 = vadd.f32 %v2573_v55, %v2547_v34  ;;  %v3975_v7 = vld [vmem:[%s4414_s8 + $0xe8] sm:$0xff] }
 0x2cd   : > { %2608 = vst.msk [vmem:[%s5626_s23 + $0x78] sm:$0xff] %vm456_vm4, %v2591_v37 }
 0x2ce   : > { %2606 = vst.msk [vmem:[%s5626_s23 + $0x68] sm:$0xff] %vm456_vm4, %v2589_v36 }
 0x2f2   : > { %v4279_v39 = vpop.f32.mrb[32].mxu0 }
 0x2f3   : > { %v3727_v40 = vadd.f32 %v4279_v39, %v5611_v20  ;;  %v3718_v56 = vpop.f32.mrb[33].mxu0 }
 0x2f4   : > { %v3719_v47 = vadd.f32 %v5611_v20, %v3718_v56  ;;  %v4280_v48 = vpop.f32.mrb[34].mxu0 }
 0x2f5   : > { %v3801_v52 = vadd.f32 %v3964_v42, %v3727_v40  ;;  %v3730_v11 = vadd.f32 %v4280_v48, %v5611_v20  ;;  %v3721_v45 = vpop.f32.mrb[35].mxu0 }
 0x2f6   : > { %v3799_v57 = vadd.f32 %v3962_v35, %v3719_v47  ;;  %v3722_v32 = vadd.f32 %v5611_v20, %v3721_v45 }
 0x2f7   : > { %3980 = vst.msk [vmem:[%s5626_s23 + $0x90] sm:$0xff] %vm456_vm4, %v3801_v52  ;;  %v3802_v49 = vadd.f32 %v3965_v61, %v3730_v11 }
 0x2f8   : > { %3978 = vst.msk [vmem:[%s5626_s23 + $0x80] sm:$0xff] %vm456_vm4, %v3799_v57  ;;  %v3800_v44 = vadd.f32 %v3963_v3, %v3722_v32 }
 0x2f9   : > { %3981 = vst.msk [vmem:[%s5626_s23 + $0x98] sm:$0xff] %vm456_vm4, %v3802_v49 }
 0x2fa   : > { %3979 = vst.msk [vmem:[%s5626_s23 + $0x88] sm:$0xff] %vm456_vm4, %v3800_v44 }
 0x31d   : > { %v4283_v46 = vpop.f32.mrb[16].mxu1 }
 0x31e   : > { %v3743_v41 = vadd.f32 %v4283_v46, %v5611_v20  ;;  %v3734_v5 = vpop.f32.mrb[17].mxu1 }
 0x31f   : > { %v3735_v6 = vadd.f32 %v5611_v20, %v3734_v5  ;;  %v4284_v59 = vpop.f32.mrb[18].mxu1 }
 0x320   : > { %v3805_v21 = vadd.f32 %v3968_v62, %v3743_v41  ;;  %v3746_v53 = vadd.f32 %v4284_v59, %v5611_v20  ;;  %v3737_v1 = vpop.f32.mrb[19].mxu1 }
 0x321   : > { %v3803_v31 = vadd.f32 %v3966_v9, %v3735_v6  ;;  %v3738_v13 = vadd.f32 %v5611_v20, %v3737_v1 }
 0x322   : > { %3984 = vst.msk [vmem:[%s5626_s23 + $0xb0] sm:$0xff] %vm456_vm4, %v3805_v21  ;;  %v3806_v25 = vadd.f32 %v3969_v16, %v3746_v53 }
 0x323   : > { %3982 = vst.msk [vmem:[%s5626_s23 + $0xa0] sm:$0xff] %vm456_vm4, %v3803_v31  ;;  %v3804_v30 = vadd.f32 %v3967_v54, %v3738_v13 }
 0x324   : > { %3985 = vst.msk [vmem:[%s5626_s23 + $0xb8] sm:$0xff] %vm456_vm4, %v3806_v25 }
 0x325   : > { %3983 = vst.msk [vmem:[%s5626_s23 + $0xa8] sm:$0xff] %vm456_vm4, %v3804_v30 }
 0x349   : > { %v4287_v12 = vpop.f32.mrb[20].mxu1 }
 0x34a   : > { %v3759_v38 = vadd.f32 %v4287_v12, %v5611_v20  ;;  %v3750_v26 = vpop.f32.mrb[21].mxu1 }
 0x34b   : > { %v3751_v15 = vadd.f32 %v5611_v20, %v3750_v26  ;;  %v4288_v17 = vpop.f32.mrb[22].mxu1 }
 0x34c   : > { %v3809_v43 = vadd.f32 %v3972_v8, %v3759_v38  ;;  %v3762_v19 = vadd.f32 %v4288_v17, %v5611_v20  ;;  %v3753_v2 = vpop.f32.mrb[23].mxu1 }
 0x34d   : > { %v3807_v22 = vadd.f32 %v3970_v60, %v3751_v15  ;;  %v3754_v63 = vadd.f32 %v5611_v20, %v3753_v2 }
 0x34e   : > { %3988 = vst.msk [vmem:[%s5626_s23 + $0xd0] sm:$0xff] %vm456_vm4, %v3809_v43  ;;  %v3810_v4 = vadd.f32 %v3973_v58, %v3762_v19 }
 0x34f   : > { %3986 = vst.msk [vmem:[%s5626_s23 + $0xc0] sm:$0xff] %vm456_vm4, %v3807_v22  ;;  %v3808_v29 = vadd.f32 %v3971_v10, %v3754_v63 }
 0x350   : > { %3989 = vst.msk [vmem:[%s5626_s23 + $0xd8] sm:$0xff] %vm456_vm4, %v3810_v4 }
 0x351   : > { %3987 = vst.msk [vmem:[%s5626_s23 + $0xc8] sm:$0xff] %vm456_vm4, %v3808_v29 }
 0x374   : > { %v4291_v23 = vpop.f32.mrb[24].mxu1 }
 0x375   : > { %v3775_v0 = vadd.f32 %v4291_v23, %v5611_v20  ;;  %v3766_v27 = vpop.f32.mrb[25].mxu1 }
 0x376   : > { %v3767_v50 = vadd.f32 %v5611_v20, %v3766_v27  ;;  %v4292_v18 = vpop.f32.mrb[26].mxu1 }
 0x377   : > { %v3813_v28 = vadd.f32 %v3976_v24, %v3775_v0  ;;  %v3778_v33 = vadd.f32 %v4292_v18, %v5611_v20  ;;  %v3769_v55 = vpop.f32.mrb[27].mxu1 }
 0x378   : > { %v3811_v34 = vadd.f32 %v3974_v51, %v3767_v50  ;;  %v3770_v37 = vadd.f32 %v5611_v20, %v3769_v55 }
 0x379   : > { %3992 = vst.msk [vmem:[%s5626_s23 + $0xf0] sm:$0xff] %vm456_vm4, %v3813_v28  ;;  %v3814_v36 = vadd.f32 %v3977_v14, %v3778_v33 }
 0x37a   : > { %3990 = vst.msk [vmem:[%s5626_s23 + $0xe0] sm:$0xff] %vm456_vm4, %v3811_v34  ;;  %v3812_v39 = vadd.f32 %v3975_v7, %v3770_v37 }
 0x37b   : > { %3993 = vst.msk [vmem:[%s5626_s23 + $0xf8] sm:$0xff] %vm456_vm4, %v3814_v36 }
 0x37c   : > { %3991 = vst.msk [vmem:[%s5626_s23 + $0xe8] sm:$0xff] %vm456_vm4, %v3812_v39 }
 0x37d PF: > { %s17_s24 = sadd.s32 1, %s4344_s24  }
 0x37e   : > { %p14_p4 = scmp.ge.s32.totalorder %s17_s24, 4  }
 0x380   :  { %16 = sbr.rel (!%p14_p4) target bundleno = 1 (0x1), region = 90 }

</bundles_post_ra>
